<compile_context>
chip_gen: v5e
topology: v5e:2x2
jax: 0.10.0
libtpu: 0.0.40
codegen_flags: <defaults>
</compile_context>

<pallas_src>
import functools

import jax
import jax.numpy as jnp
from jax import lax
from jax.experimental import pallas as pl
from jax.experimental.pallas import tpu as pltpu


_VMEM_LIMIT_BYTES = 48 * 1024 * 1024   # fits v7x's 64 MiB/TC with headroom
_ROW_TILE_BUDGET = 12 * 1024 * 1024    # per-step tile budget used to pick TH
_MAX_FUSED_K = 256                     # MXU contraction depth on v6e/v7x


# --------------------------------------------------------------------------
# Kernel
# --------------------------------------------------------------------------
def _conv_kernel(x_ref, w_ref, b_ref, o_ref, *, TH, W, shifts, relu, squeeze_out):
    """One (batch, row-block) grid step of a 3x3 (or pre-im2col'ed 1x1) conv.

    x_ref: (1, TH + hy, W + hx, Cin)  bf16 input slab (hy/hx = halo: 2 or 0)
    w_ref: (G, Kg, Cout)              bf16 weights, Kg = len(group) * Cin
    b_ref: (1, Cout)                  f32 bias
    o_ref: (1, TH, W, Cout)  or  (1, TH, W) when squeeze_out (Cout == 1)
    """
    xp = x_ref[0]
    Cin = xp.shape[-1]
    Cout = w_ref.shape[-1]

    acc = None
    for g, group in enumerate(shifts):
        # Fused-K patch for this tap group: concat of the shifted windows along
        # channels -> one (TH*W, len(group)*Cin) @ (len(group)*Cin, Cout) MXU matmul.
        wins = [xp[dy:dy + TH, dx:dx + W, :] for (dy, dx) in group]
        patch = wins[0] if len(wins) == 1 else jnp.concatenate(wins, axis=-1)
        patch = patch.reshape(TH * W, len(group) * Cin)
        part = jnp.dot(patch, w_ref[g], preferred_element_type=jnp.float32)
        acc = part if acc is None else acc + part

    acc = acc + b_ref[0]
    if relu:
        acc = jnp.maximum(acc, 0.0)          # ReLU on the f32 accumulator

    if squeeze_out:                           # lane-dense store for Cout == 1
        o_ref[0] = acc.reshape(TH, W).astype(o_ref.dtype)
    else:
        o_ref[0] = acc.reshape(TH, W, Cout).astype(o_ref.dtype)


# --------------------------------------------------------------------------
# Helpers
# --------------------------------------------------------------------------
def _pick_row_tile(H, W, Cin, Cout, out_itemsize,
                   budget_bytes=_ROW_TILE_BUDGET, cap=256):
    """Largest divisor of H (<= cap) whose double-buffered in/out slabs plus
    the f32 accumulator fit the per-step VMEM budget."""
    per_row = (2 * (W + 2) * Cin * 2            # double-buffered bf16 input rows
               + 2 * W * Cout * out_itemsize    # double-buffered output rows
               + W * Cout * 4)                  # f32 accumulator row
    target = min(cap, max(1, budget_bytes // max(per_row, 1)))
    if target >= H:
        return H
    best = 1
    for d in range(1, target + 1):
        if H % d == 0:
            best = d
    return best


def _probe_kernel(x_ref, o_ref):
    o_ref[0] = x_ref[0][1:9, :, :]


@functools.lru_cache(maxsize=None)
def _element_halo_supported():
    """Runtime probe: overlapping halo windows via a pl.Element-indexed H axis.

    If unsupported on this jax/libtpu, fall back to whole-image row blocks
    (still correct, just less tiling)."""
    try:
        f = pl.pallas_call(
            _probe_kernel,
            out_shape=jax.ShapeDtypeStruct((2, 16, 8, 128), jnp.float32),
            grid=(2, 2),
            in_specs=[pl.BlockSpec((1, pl.Element(10), 8, 128),
                                   lambda n, t: (n, t * 8, 0, 0))],
            out_specs=pl.BlockSpec((1, 8, 8, 128), lambda n, t: (n, t, 0, 0)),
        )
        x = jnp.arange(2 * 18 * 8 * 128, dtype=jnp.float32).reshape(2, 18, 8, 128)
        y = jax.block_until_ready(f(x))
        return bool(jnp.allclose(y, x[:, 1:17]))
    except Exception:
        return False


# --------------------------------------------------------------------------
# Per-layer wrapper
# --------------------------------------------------------------------------
def conv3x3_layer(x, w, b, *, relu, out_dtype=jnp.bfloat16, row_tile=None):
    """One Conv2d(3x3, stride=1, pad=1, bias=True) [+ ReLU] layer.

    x: (N, H, W, Cin) activations; w: (3, 3, Cin, Cout) f32; b: (Cout,) f32.
    Returns (N, H, W, Cout) in `out_dtype`.
    """
    N, H, W, Cin = x.shape
    Cout = w.shape[-1]
    x = x.astype(jnp.bfloat16)
    wq = w.astype(jnp.bfloat16)
    b2 = b.reshape(1, Cout).astype(jnp.float32)
    out_itemsize = jnp.dtype(out_dtype).itemsize

    pointwise = Cin <= 2        # head layer: im2col once in the wrapper (K = 9*Cin)
    squeeze_out = Cout == 1     # tail layer: lane-dense (N, H, W) output

    if pointwise:
        xp = jnp.pad(x, ((0, 0), (1, 1), (1, 1), (0, 0)))
        cols = [xp[:, dy:dy + H, dx:dx + W, :] for dy in range(3) for dx in range(3)]
        x_in = jnp.concatenate(cols, axis=-1)               # (N, H, W, 9*Cin)
        w_k = wq.reshape(1, 9 * Cin, Cout)                   # (dy, dx, cin) order
        shifts = (((0, 0),),)
        halo = 0
        Cin_eff = 9 * Cin
    else:
        # TODO(synk): zero the halo rows/cols inside the kernel so this per-layer
        #             HBM pad round trip disappears (currently a single bf16 pad).
        x_in = jnp.pad(x, ((0, 0), (1, 1), (1, 1), (0, 0)))  # (N, H+2, W+2, Cin)
        if 9 * Cin <= _MAX_FUSED_K:
            shifts = (tuple((dy, dx) for dy in range(3) for dx in range(3)),)
            w_k = wq.reshape(1, 9 * Cin, Cout)               # one K=9*Cin matmul
        else:
            shifts = tuple(tuple((dy, dx) for dx in range(3)) for dy in range(3))
            w_k = wq.reshape(3, 3 * Cin, Cout)               # three K=3*Cin matmuls
        halo = 2
        Cin_eff = Cin

    # --- pick the row tile --------------------------------------------------
    if row_tile is not None and H % row_tile == 0:
        TH = row_tile
    else:
        TH = _pick_row_tile(H, W, Cin_eff, Cout, out_itemsize)
    if halo and TH < H and not _element_halo_supported():
        TH = H          # fallback: no overlapping-halo BlockSpec available
    if squeeze_out and TH % 8 != 0 and TH != H:
        TH = H          # keep the squeezed (TH, W) output block (8,128)-legal

    grid = (N, H // TH)

    # --- BlockSpecs -----------------------------------------------------------
    if halo == 0:
        in_x_spec = pl.BlockSpec((1, TH, W, Cin_eff), lambda n, t: (n, t, 0, 0))
    elif TH == H:
        in_x_spec = pl.BlockSpec((1, H + 2, W + 2, Cin_eff),
                                 lambda n, t: (n, 0, 0, 0))
    else:
        # Overlapping (TH+2)-row halo slab: element offset on the H axis.
        in_x_spec = pl.BlockSpec((1, pl.Element(TH + 2), W + 2, Cin_eff),
                                 lambda n, t: (n, t * TH, 0, 0))

    if squeeze_out:
        out_shape = jax.ShapeDtypeStruct((N, H, W), out_dtype)
        out_spec = pl.BlockSpec((1, TH, W), lambda n, t: (n, t, 0))
    else:
        out_shape = jax.ShapeDtypeStruct((N, H, W, Cout), out_dtype)
        out_spec = pl.BlockSpec((1, TH, W, Cout), lambda n, t: (n, t, 0, 0))

    kernel = functools.partial(_conv_kernel, TH=TH, W=W, shifts=shifts,
                               relu=relu, squeeze_out=squeeze_out)

    cost = pl.CostEstimate(
        flops=2 * N * H * W * Cout * 9 * Cin,
        transcendentals=0,
        bytes_accessed=(x_in.size * 2 + w_k.size * 2 + b2.size * 4
                        + N * H * W * Cout * out_itemsize))

    y = pl.pallas_call(
        kernel,
        out_shape=out_shape,
        grid=grid,
        in_specs=[
            in_x_spec,
            pl.BlockSpec(w_k.shape, lambda n, t: (0, 0, 0)),
            pl.BlockSpec(b2.shape, lambda n, t: (0, 0)),
        ],
        out_specs=out_spec,
        compiler_params=pltpu.CompilerParams(
            dimension_semantics=("parallel", "parallel"),
            vmem_limit_bytes=_VMEM_LIMIT_BYTES),
        cost_estimate=cost,
    )(x_in, w_k, b2)

    if squeeze_out:
        y = y[..., None]
    return y


# --------------------------------------------------------------------------
# Model: params + forward
# --------------------------------------------------------------------------
def init_dncnn_params(key, in_nc=1, out_nc=1, nc=64, nb=17):
    """Deterministic parameters for the conv stack (act_mode='R').

    head: Conv(in_nc -> nc) + ReLU
    body: (nb-2) x [Conv(nc -> nc) + ReLU]
    tail: Conv(nc -> out_nc)                 (no activation)
    Weights stored as (3, 3, Cin, Cout); bias as (Cout,).
    """
    plan = [(in_nc, nc, True)] + [(nc, nc, True)] * (nb - 2) + [(nc, out_nc, False)]
    params = []
    for (cin, cout, relu) in plan:
        key, kw, kb = jax.random.split(key, 3)
        bound = 1.0 / jnp.sqrt(cin * 9)
        w = jax.random.uniform(kw, (3, 3, cin, cout), jnp.float32, -bound, bound)
        b = jax.random.uniform(kb, (cout,), jnp.float32, -bound, bound)
        params.append((w, b, relu))
    return params


def dncnn_forward(x_nchw, params, *, row_tile=None):
    """PyTorch-compatible interface: x is NCHW f32; returns NCHW f32."""
    h = jnp.transpose(x_nchw, (0, 2, 3, 1))                # NCHW -> NHWC
    n_layers = len(params)
    for i, (w, b, relu) in enumerate(params):
        last = i == n_layers - 1
        h = conv3x3_layer(h, w, b, relu=relu,
                          out_dtype=jnp.float32 if last else jnp.bfloat16,
                          row_tile=row_tile)
    return jnp.transpose(h, (0, 3, 1, 2))                  # NHWC -> NCHW


def _reference_forward(x_nchw, params):
    """Pure-JAX reference (lax.conv) with matching bf16/f32 numerics."""
    h = jnp.transpose(x_nchw, (0, 2, 3, 1)).astype(jnp.bfloat16)
    n_layers = len(params)
    for i, (w, b, relu) in enumerate(params):
        last = i == n_layers - 1
        y = lax.conv_general_dilated(
            h, w.astype(jnp.bfloat16), window_strides=(1, 1),
            padding=((1, 1), (1, 1)),
            dimension_numbers=("NHWC", "HWIO", "NHWC"),
            preferred_element_type=jnp.float32)
        y = y + b.astype(jnp.float32)
        if relu:
            y = jnp.maximum(y, 0.0)
        h = y if last else y.astype(jnp.bfloat16)
    return jnp.transpose(h, (0, 3, 1, 2))


# --------------------------------------------------------------------------
# Demo / self-check
# --------------------------------------------------------------------------
if __name__ == "__main__":
    _element_halo_supported()   # prime the probe outside any trace

    def check(in_nc, out_nc, nc, nb, N, H, W, row_tile, key):
        key, kx = jax.random.split(key)
        x = jax.random.normal(kx, (N, in_nc, H, W), jnp.float32)
        params = init_dncnn_params(key, in_nc=in_nc, out_nc=out_nc, nc=nc, nb=nb)
        fwd = jax.jit(lambda xx: dncnn_forward(xx, params, row_tile=row_tile))
        out = jax.block_until_ready(fwd(x))
        ref = _reference_forward(x, params)
        assert out.shape == (N, out_nc, H, W)
        err = float(jnp.max(jnp.abs(out - ref)))
        assert err < 2e-2, f"mismatch vs lax.conv reference: max abs err {err}"

    # Main config: 2 row blocks per image -> exercises the halo across block edges,
    # the im2col'ed Cin=1 head and the lane-dense Cout=1 tail.
    check(in_nc=1, out_nc=1, nc=16, nb=5, N=2, H=16, W=16, row_tile=8,
          key=jax.random.PRNGKey(0))
    # Secondary config: 6 row blocks, per-dy tap grouping (9*Cin > 256), and a row
    # tile that is not a multiple of 8 so the lane-dense tail falls back to TH=H.
    check(in_nc=1, out_nc=1, nc=32, nb=3, N=1, H=24, W=16, row_tile=4,
          key=jax.random.PRNGKey(1))

    print("KERNEL_OK")
</pallas_src>

<mosaic_0001>
module attributes {stable_mosaic.version = 11 : i64} {
  func.func @_conv_kernel(%arg0: i32, %arg1: i32, %arg2: memref<1x8x16x9xbf16, #tpu.memory_space<vmem>>, %arg3: memref<1x9x16xbf16, #tpu.memory_space<vmem>>, %arg4: memref<1x16xf32, #tpu.memory_space<vmem>>, %arg5: memref<1x8x16x16xbf16, #tpu.memory_space<vmem>>) attributes {dimension_semantics = [#tpu.dimension_semantics<parallel>, #tpu.dimension_semantics<parallel>], iteration_bounds = array<i64: 2, 2>, scalar_prefetch = 0 : i64, scratch_operands = 0 : i64, tpu.core_type = #tpu.core_type<tc>, window_params = [{transform_indices = @transform_0, window_bounds = array<i64: 1, 8, 16, 9>}, {pipeline_mode = #tpu.pipeline_mode<synchronous>, transform_indices = @transform_1, window_bounds = array<i64: 1, 9, 16>}, {pipeline_mode = #tpu.pipeline_mode<synchronous>, transform_indices = @transform_2, window_bounds = array<i64: 1, 16>}, {transform_indices = @transform_3, window_bounds = array<i64: 1, 8, 16, 16>}]} {
    %c0 = arith.constant 0 : index
    %c0_0 = arith.constant 0 : index
    %c0_1 = arith.constant 0 : index
    %c0_2 = arith.constant 0 : index
    %0 = vector.load %arg2[%c0, %c0_0, %c0_1, %c0_2] : memref<1x8x16x9xbf16, #tpu.memory_space<vmem>>, vector<1x8x16x9xbf16>
    %1 = vector.shape_cast %0 : vector<1x8x16x9xbf16> to vector<8x16x9xbf16>
    %2 = vector.shape_cast %1 : vector<8x16x9xbf16> to vector<128x9xbf16>
    %c0_3 = arith.constant 0 : index
    %c0_4 = arith.constant 0 : index
    %c0_5 = arith.constant 0 : index
    %3 = vector.load %arg3[%c0_3, %c0_4, %c0_5] : memref<1x9x16xbf16, #tpu.memory_space<vmem>>, vector<1x9x16xbf16>
    %4 = vector.shape_cast %3 : vector<1x9x16xbf16> to vector<9x16xbf16>
    %cst = arith.constant dense<0.000000e+00> : vector<128x16xf32>
    %5 = tpu.matmul %2, %4, %cst {dimension_numbers = #tpu.dot_dimension_numbers<[1], [0], [0], [1], [0, 0, 1, 1], [], []>} : vector<128x9xbf16>, vector<9x16xbf16>, vector<128x16xf32> -> vector<128x16xf32>
    %c0_6 = arith.constant 0 : index
    %c0_7 = arith.constant 0 : index
    %6 = vector.load %arg4[%c0_6, %c0_7] : memref<1x16xf32, #tpu.memory_space<vmem>>, vector<1x16xf32>
    %7 = vector.shape_cast %6 : vector<1x16xf32> to vector<16xf32>
    %8 = vector.shape_cast %7 : vector<16xf32> to vector<1x16xf32>
    %9 = vector.broadcast %8 : vector<1x16xf32> to vector<128x16xf32>
    %10 = arith.addf %5, %9 : vector<128x16xf32>
    %cst_8 = arith.constant 0.000000e+00 : f32
    %11 = vector.broadcast %cst_8 : f32 to vector<128x16xf32>
    %12 = arith.maximumf %10, %11 : vector<128x16xf32>
    %13 = vector.shape_cast %12 : vector<128x16xf32> to vector<8x16x16xf32>
    %14 = arith.truncf %13 : vector<8x16x16xf32> to vector<8x16x16xbf16>
    %c0_9 = arith.constant 0 : index
    %c0_10 = arith.constant 0 : index
    %c0_11 = arith.constant 0 : index
    %c0_12 = arith.constant 0 : index
    %15 = vector.load %arg5[%c0_9, %c0_10, %c0_11, %c0_12] : memref<1x8x16x16xbf16, #tpu.memory_space<vmem>>, vector<1x8x16x16xbf16>
    %16 = vector.shape_cast %15 : vector<1x8x16x16xbf16> to vector<8x16x16xbf16>
    %17 = vector.shape_cast %14 : vector<8x16x16xbf16> to vector<1x8x16x16xbf16>
    tpu.vector_store %arg5[%c0_9, %c0_10, %c0_11, %c0_12], %17 {strides = array<i32>} : memref<1x8x16x16xbf16, #tpu.memory_space<vmem>>, vector<1x8x16x16xbf16>,
    return
  }
  func.func @transform_0(%arg0: i32, %arg1: i32) -> (i32, i32, i32, i32) {
    %c0_i32 = arith.constant 0 : i32
    %c0_i32_0 = arith.constant 0 : i32
    %c0_i32_1 = arith.constant 0 : i32
    return %arg0, %arg1, %c0_i32, %c0_i32_0 : i32, i32, i32, i32
  }
  func.func @transform_1(%arg0: i32, %arg1: i32) -> (i32, i32, i32) {
    %c0_i32 = arith.constant 0 : i32
    %c0_i32_0 = arith.constant 0 : i32
    %c0_i32_1 = arith.constant 0 : i32
    %c0_i32_2 = arith.constant 0 : i32
    return %c0_i32, %c0_i32_0, %c0_i32_1 : i32, i32, i32
  }
  func.func @transform_2(%arg0: i32, %arg1: i32) -> (i32, i32) {
    %c0_i32 = arith.constant 0 : i32
    %c0_i32_0 = arith.constant 0 : i32
    %c0_i32_1 = arith.constant 0 : i32
    return %c0_i32, %c0_i32_0 : i32, i32
  }
  func.func @transform_3(%arg0: i32, %arg1: i32) -> (i32, i32, i32, i32) {
    %c0_i32 = arith.constant 0 : i32
    %c0_i32_0 = arith.constant 0 : i32
    %c0_i32_1 = arith.constant 0 : i32
    return %arg0, %arg1, %c0_i32, %c0_i32_0 : i32, i32, i32, i32
  }
}

module attributes {stable_mosaic.version = 11 : i64} {
  func.func @_conv_kernel(%arg0: i32, %arg1: i32, %arg2: memref<1x18x18x16xbf16, #tpu.memory_space<vmem>>, %arg3: memref<1x144x16xbf16, #tpu.memory_space<vmem>>, %arg4: memref<1x16xf32, #tpu.memory_space<vmem>>, %arg5: memref<1x16x16x16xbf16, #tpu.memory_space<vmem>>) attributes {dimension_semantics = [#tpu.dimension_semantics<parallel>, #tpu.dimension_semantics<parallel>], iteration_bounds = array<i64: 2, 1>, scalar_prefetch = 0 : i64, scratch_operands = 0 : i64, tpu.core_type = #tpu.core_type<tc>, window_params = [{transform_indices = @transform_0, window_bounds = array<i64: 1, 18, 18, 16>}, {pipeline_mode = #tpu.pipeline_mode<synchronous>, transform_indices = @transform_1, window_bounds = array<i64: 1, 144, 16>}, {pipeline_mode = #tpu.pipeline_mode<synchronous>, transform_indices = @transform_2, window_bounds = array<i64: 1, 16>}, {transform_indices = @transform_3, window_bounds = array<i64: 1, 16, 16, 16>}]} {
    %c0 = arith.constant 0 : index
    %c0_0 = arith.constant 0 : index
    %c0_1 = arith.constant 0 : index
    %c0_2 = arith.constant 0 : index
    %0 = vector.load %arg2[%c0, %c0_0, %c0_1, %c0_2] : memref<1x18x18x16xbf16, #tpu.memory_space<vmem>>, vector<1x18x18x16xbf16>
    %1 = vector.shape_cast %0 : vector<1x18x18x16xbf16> to vector<18x18x16xbf16>
    %2 = vector.extract_strided_slice %1 {offsets = [0, 0, 0], sizes = [16, 16, 16], strides = [1, 1, 1]} : vector<18x18x16xbf16> to vector<16x16x16xbf16>
    %3 = vector.extract_strided_slice %1 {offsets = [0, 1, 0], sizes = [16, 16, 16], strides = [1, 1, 1]} : vector<18x18x16xbf16> to vector<16x16x16xbf16>
    %4 = vector.extract_strided_slice %1 {offsets = [0, 2, 0], sizes = [16, 16, 16], strides = [1, 1, 1]} : vector<18x18x16xbf16> to vector<16x16x16xbf16>
    %5 = vector.extract_strided_slice %1 {offsets = [1, 0, 0], sizes = [16, 16, 16], strides = [1, 1, 1]} : vector<18x18x16xbf16> to vector<16x16x16xbf16>
    %6 = vector.extract_strided_slice %1 {offsets = [1, 1, 0], sizes = [16, 16, 16], strides = [1, 1, 1]} : vector<18x18x16xbf16> to vector<16x16x16xbf16>
    %7 = vector.extract_strided_slice %1 {offsets = [1, 2, 0], sizes = [16, 16, 16], strides = [1, 1, 1]} : vector<18x18x16xbf16> to vector<16x16x16xbf16>
    %8 = vector.extract_strided_slice %1 {offsets = [2, 0, 0], sizes = [16, 16, 16], strides = [1, 1, 1]} : vector<18x18x16xbf16> to vector<16x16x16xbf16>
    %9 = vector.extract_strided_slice %1 {offsets = [2, 1, 0], sizes = [16, 16, 16], strides = [1, 1, 1]} : vector<18x18x16xbf16> to vector<16x16x16xbf16>
    %10 = vector.extract_strided_slice %1 {offsets = [2, 2, 0], sizes = [16, 16, 16], strides = [1, 1, 1]} : vector<18x18x16xbf16> to vector<16x16x16xbf16>
    %11 = tpu.concatenate %2, %3, %4, %5, %6, %7, %8, %9, %10 in 2 : vector<16x16x16xbf16>, vector<16x16x16xbf16>, vector<16x16x16xbf16>, vector<16x16x16xbf16>, vector<16x16x16xbf16>, vector<16x16x16xbf16>, vector<16x16x16xbf16>, vector<16x16x16xbf16>, vector<16x16x16xbf16> -> vector<16x16x144xbf16>
    %12 = vector.shape_cast %11 : vector<16x16x144xbf16> to vector<256x144xbf16>
    %c0_3 = arith.constant 0 : index
    %c0_4 = arith.constant 0 : index
    %c0_5 = arith.constant 0 : index
    %13 = vector.load %arg3[%c0_3, %c0_4, %c0_5] : memref<1x144x16xbf16, #tpu.memory_space<vmem>>, vector<1x144x16xbf16>
    %14 = vector.shape_cast %13 : vector<1x144x16xbf16> to vector<144x16xbf16>
    %cst = arith.constant dense<0.000000e+00> : vector<256x16xf32>
    %15 = tpu.matmul %12, %14, %cst {dimension_numbers = #tpu.dot_dimension_numbers<[1], [0], [0], [1], [0, 0, 1, 1], [], []>} : vector<256x144xbf16>, vector<144x16xbf16>, vector<256x16xf32> -> vector<256x16xf32>
    %c0_6 = arith.constant 0 : index
    %c0_7 = arith.constant 0 : index
    %16 = vector.load %arg4[%c0_6, %c0_7] : memref<1x16xf32, #tpu.memory_space<vmem>>, vector<1x16xf32>
    %17 = vector.shape_cast %16 : vector<1x16xf32> to vector<16xf32>
    %18 = vector.shape_cast %17 : vector<16xf32> to vector<1x16xf32>
    %19 = vector.broadcast %18 : vector<1x16xf32> to vector<256x16xf32>
    %20 = arith.addf %15, %19 : vector<256x16xf32>
    %cst_8 = arith.constant 0.000000e+00 : f32
    %21 = vector.broadcast %cst_8 : f32 to vector<256x16xf32>
    %22 = arith.maximumf %20, %21 : vector<256x16xf32>
    %23 = vector.shape_cast %22 : vector<256x16xf32> to vector<16x16x16xf32>
    %24 = arith.truncf %23 : vector<16x16x16xf32> to vector<16x16x16xbf16>
    %c0_9 = arith.constant 0 : index
    %c0_10 = arith.constant 0 : index
    %c0_11 = arith.constant 0 : index
    %c0_12 = arith.constant 0 : index
    %25 = vector.load %arg5[%c0_9, %c0_10, %c0_11, %c0_12] : memref<1x16x16x16xbf16, #tpu.memory_space<vmem>>, vector<1x16x16x16xbf16>
    %26 = vector.shape_cast %25 : vector<1x16x16x16xbf16> to vector<16x16x16xbf16>
    %27 = vector.shape_cast %24 : vector<16x16x16xbf16> to vector<1x16x16x16xbf16>
    tpu.vector_store %arg5[%c0_9, %c0_10, %c0_11, %c0_12], %27 {strides = array<i32>} : memref<1x16x16x16xbf16, #tpu.memory_space<vmem>>, vector<1x16x16x16xbf16>,
    return
  }
  func.func @transform_0(%arg0: i32, %arg1: i32) -> (i32, i32, i32, i32) {
    %c0_i32 = arith.constant 0 : i32
    %c0_i32_0 = arith.constant 0 : i32
    %c0_i32_1 = arith.constant 0 : i32
    %c0_i32_2 = arith.constant 0 : i32
    return %arg0, %c0_i32, %c0_i32_0, %c0_i32_1 : i32, i32, i32, i32
  }
  func.func @transform_1(%arg0: i32, %arg1: i32) -> (i32, i32, i32) {
    %c0_i32 = arith.constant 0 : i32
    %c0_i32_0 = arith.constant 0 : i32
    %c0_i32_1 = arith.constant 0 : i32
    %c0_i32_2 = arith.constant 0 : i32
    return %c0_i32, %c0_i32_0, %c0_i32_1 : i32, i32, i32
  }
  func.func @transform_2(%arg0: i32, %arg1: i32) -> (i32, i32) {
    %c0_i32 = arith.constant 0 : i32
    %c0_i32_0 = arith.constant 0 : i32
    %c0_i32_1 = arith.constant 0 : i32
    return %c0_i32, %c0_i32_0 : i32, i32
  }
  func.func @transform_3(%arg0: i32, %arg1: i32) -> (i32, i32, i32, i32) {
    %c0_i32 = arith.constant 0 : i32
    %c0_i32_0 = arith.constant 0 : i32
    %c0_i32_1 = arith.constant 0 : i32
    return %arg0, %arg1, %c0_i32, %c0_i32_0 : i32, i32, i32, i32
  }
}

module attributes {stable_mosaic.version = 11 : i64} {
  func.func @_conv_kernel(%arg0: i32, %arg1: i32, %arg2: memref<1x18x18x16xbf16, #tpu.memory_space<vmem>>, %arg3: memref<1x144x1xbf16, #tpu.memory_space<vmem>>, %arg4: memref<1x1xf32, #tpu.memory_space<vmem>>, %arg5: memref<1x16x16xf32, #tpu.memory_space<vmem>>) attributes {dimension_semantics = [#tpu.dimension_semantics<parallel>, #tpu.dimension_semantics<parallel>], iteration_bounds = array<i64: 2, 1>, scalar_prefetch = 0 : i64, scratch_operands = 0 : i64, tpu.core_type = #tpu.core_type<tc>, window_params = [{transform_indices = @transform_0, window_bounds = array<i64: 1, 18, 18, 16>}, {pipeline_mode = #tpu.pipeline_mode<synchronous>, transform_indices = @transform_1, window_bounds = array<i64: 1, 144, 1>}, {pipeline_mode = #tpu.pipeline_mode<synchronous>, transform_indices = @transform_2, window_bounds = array<i64: 1, 1>}, {transform_indices = @transform_3, window_bounds = array<i64: 1, 16, 16>}]} {
    %c0 = arith.constant 0 : index
    %c0_0 = arith.constant 0 : index
    %c0_1 = arith.constant 0 : index
    %c0_2 = arith.constant 0 : index
    %0 = vector.load %arg2[%c0, %c0_0, %c0_1, %c0_2] : memref<1x18x18x16xbf16, #tpu.memory_space<vmem>>, vector<1x18x18x16xbf16>
    %1 = vector.shape_cast %0 : vector<1x18x18x16xbf16> to vector<18x18x16xbf16>
    %2 = vector.extract_strided_slice %1 {offsets = [0, 0, 0], sizes = [16, 16, 16], strides = [1, 1, 1]} : vector<18x18x16xbf16> to vector<16x16x16xbf16>
    %3 = vector.extract_strided_slice %1 {offsets = [0, 1, 0], sizes = [16, 16, 16], strides = [1, 1, 1]} : vector<18x18x16xbf16> to vector<16x16x16xbf16>
    %4 = vector.extract_strided_slice %1 {offsets = [0, 2, 0], sizes = [16, 16, 16], strides = [1, 1, 1]} : vector<18x18x16xbf16> to vector<16x16x16xbf16>
    %5 = vector.extract_strided_slice %1 {offsets = [1, 0, 0], sizes = [16, 16, 16], strides = [1, 1, 1]} : vector<18x18x16xbf16> to vector<16x16x16xbf16>
    %6 = vector.extract_strided_slice %1 {offsets = [1, 1, 0], sizes = [16, 16, 16], strides = [1, 1, 1]} : vector<18x18x16xbf16> to vector<16x16x16xbf16>
    %7 = vector.extract_strided_slice %1 {offsets = [1, 2, 0], sizes = [16, 16, 16], strides = [1, 1, 1]} : vector<18x18x16xbf16> to vector<16x16x16xbf16>
    %8 = vector.extract_strided_slice %1 {offsets = [2, 0, 0], sizes = [16, 16, 16], strides = [1, 1, 1]} : vector<18x18x16xbf16> to vector<16x16x16xbf16>
    %9 = vector.extract_strided_slice %1 {offsets = [2, 1, 0], sizes = [16, 16, 16], strides = [1, 1, 1]} : vector<18x18x16xbf16> to vector<16x16x16xbf16>
    %10 = vector.extract_strided_slice %1 {offsets = [2, 2, 0], sizes = [16, 16, 16], strides = [1, 1, 1]} : vector<18x18x16xbf16> to vector<16x16x16xbf16>
    %11 = tpu.concatenate %2, %3, %4, %5, %6, %7, %8, %9, %10 in 2 : vector<16x16x16xbf16>, vector<16x16x16xbf16>, vector<16x16x16xbf16>, vector<16x16x16xbf16>, vector<16x16x16xbf16>, vector<16x16x16xbf16>, vector<16x16x16xbf16>, vector<16x16x16xbf16>, vector<16x16x16xbf16> -> vector<16x16x144xbf16>
    %12 = vector.shape_cast %11 : vector<16x16x144xbf16> to vector<256x144xbf16>
    %c0_3 = arith.constant 0 : index
    %c0_4 = arith.constant 0 : index
    %c0_5 = arith.constant 0 : index
    %13 = vector.load %arg3[%c0_3, %c0_4, %c0_5] : memref<1x144x1xbf16, #tpu.memory_space<vmem>>, vector<1x144x1xbf16>
    %14 = vector.shape_cast %13 : vector<1x144x1xbf16> to vector<144x1xbf16>
    %cst = arith.constant dense<0.000000e+00> : vector<256x1xf32>
    %15 = tpu.matmul %12, %14, %cst {dimension_numbers = #tpu.dot_dimension_numbers<[1], [0], [0], [1], [0, 0, 1, 1], [], []>} : vector<256x144xbf16>, vector<144x1xbf16>, vector<256x1xf32> -> vector<256x1xf32>
    %c0_6 = arith.constant 0 : index
    %c0_7 = arith.constant 0 : index
    %16 = vector.load %arg4[%c0_6, %c0_7] : memref<1x1xf32, #tpu.memory_space<vmem>>, vector<1x1xf32>
    %17 = vector.shape_cast %16 : vector<1x1xf32> to vector<1xf32>
    %18 = vector.shape_cast %17 : vector<1xf32> to vector<1x1xf32>
    %19 = vector.broadcast %18 : vector<1x1xf32> to vector<256x1xf32>
    %20 = arith.addf %15, %19 : vector<256x1xf32>
    %21 = vector.shape_cast %20 : vector<256x1xf32> to vector<16x16xf32>
    %c0_8 = arith.constant 0 : index
    %c0_9 = arith.constant 0 : index
    %c0_10 = arith.constant 0 : index
    %22 = vector.load %arg5[%c0_8, %c0_9, %c0_10] : memref<1x16x16xf32, #tpu.memory_space<vmem>>, vector<1x16x16xf32>
    %23 = vector.shape_cast %22 : vector<1x16x16xf32> to vector<16x16xf32>
    %24 = vector.shape_cast %21 : vector<16x16xf32> to vector<1x16x16xf32>
    tpu.vector_store %arg5[%c0_8, %c0_9, %c0_10], %24 {strides = array<i32>} : memref<1x16x16xf32, #tpu.memory_space<vmem>>, vector<1x16x16xf32>,
    return
  }
  func.func @transform_0(%arg0: i32, %arg1: i32) -> (i32, i32, i32, i32) {
    %c0_i32 = arith.constant 0 : i32
    %c0_i32_0 = arith.constant 0 : i32
    %c0_i32_1 = arith.constant 0 : i32
    %c0_i32_2 = arith.constant 0 : i32
    return %arg0, %c0_i32, %c0_i32_0, %c0_i32_1 : i32, i32, i32, i32
  }
  func.func @transform_1(%arg0: i32, %arg1: i32) -> (i32, i32, i32) {
    %c0_i32 = arith.constant 0 : i32
    %c0_i32_0 = arith.constant 0 : i32
    %c0_i32_1 = arith.constant 0 : i32
    %c0_i32_2 = arith.constant 0 : i32
    return %c0_i32, %c0_i32_0, %c0_i32_1 : i32, i32, i32
  }
  func.func @transform_2(%arg0: i32, %arg1: i32) -> (i32, i32) {
    %c0_i32 = arith.constant 0 : i32
    %c0_i32_0 = arith.constant 0 : i32
    %c0_i32_1 = arith.constant 0 : i32
    return %c0_i32, %c0_i32_0 : i32, i32
  }
  func.func @transform_3(%arg0: i32, %arg1: i32) -> (i32, i32, i32) {
    %c0_i32 = arith.constant 0 : i32
    %c0_i32_0 = arith.constant 0 : i32
    return %arg0, %arg1, %c0_i32 : i32, i32, i32
  }
}

</mosaic_0001>

<bundles_post_ra>
// kernel: _lambda_.5
= control target key start
LH: loop header
LB: loop body
LE: loop exit
PB: predicated region body
PF: predicated region fallthrough
CT: control target
= control target key end

     0   :  { %s686_s12 = smov 0   ;;  %s688_s13 = smov 0   ;;  %s809_s0 = inlined_call_operand.vmem [shape: bf16[2,16,16,9], index: 0, kind: input, shape index: {}]   ;;  %s810_s1 = inlined_call_operand.vmem [shape: bf16[1,9,16], index: 1, kind: input, shape index: {}]   ;;  %s811_s2 = inlined_call_operand.vmem [shape: f32[1,16], index: 2, kind: input, shape index: {}]   ;;  %s812_s3 = inlined_call_operand.vmem [shape: bf16[2,16,16,16], index: 3, kind: output, shape index: {}]  }
   0x1   :  { %s690_s14 = smov 0   ;;  %s692_s15 = smov 0  }
   0x2   :  { %s694_s16 = smov 0  }
   0x3 LB: > { %s22_s17 = sadd.s32 1, %s655_s14  ;;  %s25_s18 = sadd.s32 1, %s659_s15  ;;  %s663_s16 = sphi %s694_s16, %s13_s16   ;;  %s659_s15 = sphi %s692_s15, %s816_s15   ;;  %s655_s14 = sphi %s690_s14, %s815_s14   ;;  %s651_s13 = sphi %s688_s13, %s814_s13   ;;  %s647_s12 = sphi %s686_s12, %s813_s12  }
   0x4   : > { %p23_p0 = scmp.ge.s32.totalorder %s22_s17, 2  ;;  %p516_p1 = scmp.ge.s32.totalorder %s663_s16, 1 }
   0x5   : > { %p159_p2 = scmp.lt.s32.totalorder %s663_s16, 5 }
   0x6   : > { %s818_s17 = smov (%p23_p0, %s22_s17), 0  ;;  %s820_s18 = smov (!%p23_p0, %s25_s18), %s659_s15 }
   0x7   : > { %p160_p3 = pnand %p516_p1, %p159_p2  ;;  %p27_p4 = scmp.ge.s32.totalorder %s820_s18, 2 }
   0x8   : > { %s517_s23 = sshll.u32 (!%p160_p3), %s647_s12, 3  ;;  %p194_p5 = scmp.lt.s32.totalorder (!%p160_p3), %s651_s13, 1 }
   0x9   : > { %s822_s18 = smov (%p27_p4, %s820_s18), 0  ;;  %163 = sbr.rel (%p160_p3) target bundleno = 188 (0xbc), region = 32 }
   0xa   : > { %p196_p6 = scmp.lt.s32.totalorder (!%p160_p3), %s517_s23, 15 }
   0xe   : > { %v559_v0 = vld [vmem:[%s810_s1] sm:$0xf]  ;;  %v579_v1 = vld [vmem:[%s810_s1] sm:$0x10]  ;;  %vm308_vm0 = vcmask 1043456   ;;  %vm309_vm1 = vcmask 1044480  }
   0xf   : > { %v560_v2 = vor.u32 %v579_v1, %v559_v0  ;;  %v665_v3 = vmov 65535   ;;  %s824_s13 = smov (!%p194_p5, %s651_s13), 1  ;;  %s826_s23 = smov (!%p196_p6, %s517_s23), 15  ;;  %vm283_vm2 = vcmask 72704   ;;  %v739_v15 = vld [vmem:[%s811_s2] ss:$0 sm:$0xff] }
  0x10   : > { %v310_v4 = vsel %vm308_vm0, 4294967295, %v665_v3  ;;  %s519_s24 = sshll.u32 %s824_s13, 5  ;;  %s518_s25 = sshll.u32 %s826_s23, 1  ;;  %vm396_vm3 = vcmask 125952  }
  0x11   : > { %v311_v5 = vsel %vm309_vm1, %v310_v4, 0  ;;  %s200_s26 = sadd.s32 %s519_s24, %s518_s25 }
  0x12   : > { %v313_v6 = vand.u32 %v560_v2, %v311_v5  ;;  %s520_s27 = sshll.u32 %s200_s26, 2 }
  0x13   : > { %s202_s30 = scalar_lea.vmem %s809_s0, %s520_s27  ;;  %s746_s8 = scalar_lea.vmem %s812_s3, %s520_s27 }
  0x14   : > { %322 = vmatpush.bf16.msra.mxu0 %v313_v6  ;;  %580 = vmatpush.bf16.msra.mxu1 %v313_v6  ;;  %v571_v7 = vld [vmem:[%s202_s30] sm:$0xff]  ;;  %v573_v8 = vld [vmem:[%s202_s30 + $0x10] sm:$0xff]  ;;  %v572_v11 = vld [vmem:[%s202_s30 + $0x8] sm:$0xff] }
  0x15   : > { %581 = vmatpush.bf16.msra.mxu2 %v313_v6  ;;  %582 = vmatpush.bf16.msra.mxu3 %v313_v6  ;;  %v575_v9 = vld [vmem:[%s202_s30 + $0x20] sm:$0xff]  ;;  %v577_v10 = vld [vmem:[%s202_s30 + $0x30] sm:$0xff]  ;;  %v574_v12 = vld [vmem:[%s202_s30 + $0x18] sm:$0xff] }
  0x16   : > { %v576_v13 = vld [vmem:[%s202_s30 + $0x28] sm:$0xff]  ;;  %v578_v14 = vld [vmem:[%s202_s30 + $0x38] sm:$0xff] }
  0x17   : > { %561 = vmatmul.msk.bf16.vlgmr.msra.gmra.mxu0 %vm283_vm2, %v571_v7  ;;  %563 = vmatmul.msk.bf16.vlgmr.msra.gmra.mxu1 %vm283_vm2, %v573_v8 }
  0x18   : > { %565 = vmatmul.msk.bf16.vlgmr.msra.gmra.mxu2 %vm283_vm2, %v575_v9  ;;  %567 = vmatmul.msk.bf16.vlgmr.msra.gmra.mxu3 %vm283_vm2, %v577_v10 }
  0x27   : > { %562 = vmatmul.msk.bf16.gmra.mxu0 %vm283_vm2, %v572_v11  ;;  %564 = vmatmul.msk.bf16.gmra.mxu1 %vm283_vm2, %v574_v12 }
  0x28   : > { %566 = vmatmul.msk.bf16.gmra.mxu2 %vm283_vm2, %v576_v13  ;;  %568 = vmatmul.msk.bf16.gmra.mxu3 %vm283_vm2, %v578_v14 }
  0x94   : > { %v324_v16 = vpop.f32.mrf.mxu0  ;;  %v334_v17 = vpop.f32.mrf.mxu1 }
  0x95   : > { %v325_v18 = vadd.f32 %v739_v15, %v324_v16  ;;  %v335_v19 = vadd.f32 %v739_v15, %v334_v17 }
  0x97   : > { %v364_v20 = vmax.f32 %v325_v18, 0.0  ;;  %v368_v21 = vmax.f32 %v335_v19, 0.0 }
  0x99   : > { %v380_v22 = vpack.c.bf16 %v364_v20, %v364_v20  ;;  %v384_v23 = vpack.c.bf16 %v368_v21, %v368_v21 }
  0x9b   : > { %397 = vst.msk [vmem:[%s746_s8] sm:$0xf] %vm396_vm3, %v380_v22  ;;  %v344_v24 = vpop.f32.mrf.mxu2  ;;  %v354_v25 = vpop.f32.mrf.mxu3 }
  0x9c   : > { %401 = vst.msk [vmem:[%s746_s8 + $0x10] sm:$0xf] %vm396_vm3, %v384_v23  ;;  %v345_v26 = vadd.f32 %v739_v15, %v344_v24  ;;  %v355_v27 = vadd.f32 %v739_v15, %v354_v25  ;;  %v326_v28 = vpop.f32.mrf.mxu0  ;;  %v336_v29 = vpop.f32.mrf.mxu1 }
  0x9d   : > { %v327_v30 = vadd.f32 %v739_v15, %v326_v28  ;;  %v337_v31 = vadd.f32 %v739_v15, %v336_v29 }
  0x9e   : > { %v372_v32 = vmax.f32 %v345_v26, 0.0  ;;  %v376_v33 = vmax.f32 %v355_v27, 0.0 }
  0x9f   : > { %v365_v34 = vmax.f32 %v327_v30, 0.0  ;;  %v369_v35 = vmax.f32 %v337_v31, 0.0 }
  0xa0   : > { %v388_v36 = vpack.c.bf16 %v372_v32, %v372_v32  ;;  %v392_v37 = vpack.c.bf16 %v376_v33, %v376_v33 }
  0xa1   : > { %v381_v38 = vpack.c.bf16 %v365_v34, %v365_v34  ;;  %v385_v39 = vpack.c.bf16 %v369_v35, %v369_v35 }
  0xa2   : > { %405 = vst.msk [vmem:[%s746_s8 + $0x20] sm:$0xf] %vm396_vm3, %v388_v36 }
  0xa3   : > { %409 = vst.msk [vmem:[%s746_s8 + $0x30] sm:$0xf] %vm396_vm3, %v392_v37  ;;  %v346_v40 = vpop.f32.mrf.mxu2  ;;  %v356_v41 = vpop.f32.mrf.mxu3 }
  0xa4   : > { %398 = vst.msk [vmem:[%s746_s8 + $0x4] sm:$0xf] %vm396_vm3, %v381_v38  ;;  %v347_v42 = vadd.f32 %v739_v15, %v346_v40  ;;  %v357_v43 = vadd.f32 %v739_v15, %v356_v41  ;;  %v329_v44 = vpop.f32.mrf.mxu0  ;;  %v339_v45 = vpop.f32.mrf.mxu1 }
  0xa5   : > { %402 = vst.msk [vmem:[%s746_s8 + $0x14] sm:$0xf] %vm396_vm3, %v385_v39  ;;  %v330_v46 = vadd.f32 %v739_v15, %v329_v44  ;;  %v340_v47 = vadd.f32 %v739_v15, %v339_v45 }
  0xa6   : > { %v373_v48 = vmax.f32 %v347_v42, 0.0  ;;  %v377_v49 = vmax.f32 %v357_v43, 0.0 }
  0xa7   : > { %v366_v50 = vmax.f32 %v330_v46, 0.0  ;;  %v370_v51 = vmax.f32 %v340_v47, 0.0 }
  0xa8   : > { %v389_v52 = vpack.c.bf16 %v373_v48, %v373_v48  ;;  %v393_v53 = vpack.c.bf16 %v377_v49, %v377_v49 }
  0xa9   : > { %v382_v54 = vpack.c.bf16 %v366_v50, %v366_v50  ;;  %v386_v55 = vpack.c.bf16 %v370_v51, %v370_v51 }
  0xaa   : > { %406 = vst.msk [vmem:[%s746_s8 + $0x24] sm:$0xf] %vm396_vm3, %v389_v52 }
  0xab   : > { %410 = vst.msk [vmem:[%s746_s8 + $0x34] sm:$0xf] %vm396_vm3, %v393_v53  ;;  %v349_v56 = vpop.f32.mrf.mxu2  ;;  %v359_v57 = vpop.f32.mrf.mxu3 }
  0xac   : > { %399 = vst.msk [vmem:[%s746_s8 + $0x8] sm:$0xf] %vm396_vm3, %v382_v54  ;;  %v350_v58 = vadd.f32 %v739_v15, %v349_v56  ;;  %v360_v59 = vadd.f32 %v739_v15, %v359_v57  ;;  %v331_v60 = vpop.f32.mrf.mxu0  ;;  %v341_v61 = vpop.f32.mrf.mxu1 }
  0xad   : > { %403 = vst.msk [vmem:[%s746_s8 + $0x18] sm:$0xf] %vm396_vm3, %v386_v55  ;;  %v332_v62 = vadd.f32 %v739_v15, %v331_v60  ;;  %v342_v63 = vadd.f32 %v739_v15, %v341_v61 }
  0xae   : > { %v374_v0 = vmax.f32 %v350_v58, 0.0  ;;  %v378_v1 = vmax.f32 %v360_v59, 0.0 }
  0xaf   : > { %v367_v2 = vmax.f32 %v332_v62, 0.0  ;;  %v371_v3 = vmax.f32 %v342_v63, 0.0 }
  0xb0   : > { %v390_v4 = vpack.c.bf16 %v374_v0, %v374_v0  ;;  %v394_v5 = vpack.c.bf16 %v378_v1, %v378_v1 }
  0xb1   : > { %v383_v6 = vpack.c.bf16 %v367_v2, %v367_v2  ;;  %v387_v7 = vpack.c.bf16 %v371_v3, %v371_v3 }
  0xb2   : > { %407 = vst.msk [vmem:[%s746_s8 + $0x28] sm:$0xf] %vm396_vm3, %v390_v4 }
  0xb3   : > { %411 = vst.msk [vmem:[%s746_s8 + $0x38] sm:$0xf] %vm396_vm3, %v394_v5  ;;  %v351_v8 = vpop.f32.mrf.mxu2  ;;  %v361_v9 = vpop.f32.mrf.mxu3 }
  0xb4   : > { %400 = vst.msk [vmem:[%s746_s8 + $0xc] sm:$0xf] %vm396_vm3, %v383_v6  ;;  %v352_v10 = vadd.f32 %v739_v15, %v351_v8  ;;  %v362_v11 = vadd.f32 %v739_v15, %v361_v9 }
  0xb5   : > { %404 = vst.msk [vmem:[%s746_s8 + $0x1c] sm:$0xf] %vm396_vm3, %v387_v7 }
  0xb6   : > { %v375_v12 = vmax.f32 %v352_v10, 0.0  ;;  %v379_v13 = vmax.f32 %v362_v11, 0.0 }
  0xb8   : > { %v391_v14 = vpack.c.bf16 %v375_v12, %v375_v12  ;;  %v395_v16 = vpack.c.bf16 %v379_v13, %v379_v13 }
  0xba   : > { %408 = vst.msk [vmem:[%s746_s8 + $0x2c] sm:$0xf] %vm396_vm3, %v391_v14 }
  0xbb   : > { %412 = vst.msk [vmem:[%s746_s8 + $0x3c] sm:$0xf] %vm396_vm3, %v395_v16 }
  0xbc PF: > { %s13_s16 = sadd.s32 1, %s663_s16   ;;  %s813_s12 = smov %s655_s14 }
  0xbd   : > { %p10_p7 = scmp.ge.s32.totalorder %s13_s16, 6   ;;  %s814_s13 = smov %s659_s15 }
  0xbe   : > { %s815_s14 = smov %s818_s17  ;;  %s816_s15 = smov %s822_s18 }
  0xbf   :  { %12 = sbr.rel (!%p10_p7) target bundleno = 3 (0x3), region = 62 }

// kernel: _lambda_.6
= control target key start
LH: loop header
LB: loop body
LE: loop exit
PB: predicated region body
PF: predicated region fallthrough
CT: control target
= control target key end

     0   :  { %s1883_s12 = smov 0   ;;  %s1885_s13 = smov 0   ;;  %s2784_s0 = inlined_call_operand.vmem [shape: bf16[2,18,18,16], index: 0, kind: input, shape index: {}]   ;;  %s2785_s1 = inlined_call_operand.vmem [shape: bf16[1,144,16], index: 1, kind: input, shape index: {}]   ;;  %s2786_s2 = inlined_call_operand.vmem [shape: f32[1,16], index: 2, kind: input, shape index: {}]   ;;  %s2787_s3 = inlined_call_operand.vmem [shape: bf16[2,16,16,16], index: 3, kind: output, shape index: {}]  }
   0x1   :  { %s1887_s14 = smov 0  }
   0x2 LB: > { %s25_s15 = sadd.s32 1, %s1850_s13  ;;  %p1628_p0 = scmp.ge.s32.totalorder %s1854_s14, 1  ;;  %s1854_s14 = sphi %s1887_s14, %s13_s14   ;;  %s1850_s13 = sphi %s1885_s13, %s2789_s13   ;;  %s1846_s12 = sphi %s1883_s12, %s2788_s12  }
   0x3   : > { %p27_p1 = scmp.ge.s32.totalorder %s25_s15, 2  ;;  %p151_p2 = scmp.lt.s32.totalorder %s1854_s14, 3 }
   0x5   : > { %s2791_s15 = smov (%p27_p1, %s25_s15), 0  ;;  %p152_p3 = pnand %p1628_p0, %p151_p2 }
   0x6   : > { %p180_p4 = scmp.lt.s32.totalorder (!%p152_p3), %s1846_s12, 1  ;;  %s1856_s20 = smov (!%p152_p3), 16  }
   0x7   : > { %155 = sbr.rel (%p152_p3) target bundleno = 582 (0x246), region = 32  ;;  %s1857_s23 = smov (!%p152_p3), 32  }
   0x8   : > { %s1858_s24 = smov (!%p152_p3), 80   ;;  %s1859_s25 = smov (!%p152_p3), 64  }
   0x9   : > { %s1860_s26 = smov (!%p152_p3), 48   ;;  %s1861_s27 = smov (!%p152_p3), 112  }
   0xa   : > { %s1862_s28 = smov (!%p152_p3), 96  }
   0xc   : > { %s2793_s12 = smov (!%p180_p4, %s1846_s12), 1  ;;  %vm379_vm0 = vsmask.f32 7424  ;;  %v1785_v61 = vld [vmem:[%s2785_s1 + $0x40] sm:$0xff]  ;;  %vm604_vm1 = vcmask 1046528   ;;  %vm891_vm2 = vcmask 130048  }
   0xd   : > { %s1795_s16 = smul.u32 216, %s2793_s12  ;;  %1358 = vmatpush.bf16.msra.mxu1 %v1785_v61  ;;  %1794 = vmatpush.bf16.msra.mxu3 %v1785_v61  ;;  %vm957_vm3 = vcmask 392192   ;;  %vm924_vm4 = vcmask 261120   ;;  %vm990_vm5 = vcmask 523264   ;;  %vm1023_vm6 = vcmask 654336  }
   0xe   : > { %vm1056_vm7 = vcmask 785408   ;;  %vm1089_vm8 = vcmask 916480   ;;  %vm1504_vm9 = vcmask 125952  }
   0xf   : > { %s1907_s19 = scalar_lea.vmem %s2784_s0, %s1795_s16 }
  0x10   : > { %v1910_v0 = vld [vmem:[%s1907_s19 + $0x30] sm:$0xff]  ;;  %v211_v1 = vld [vmem:[%s1907_s19 + $0x38] sm:$0x1]  ;;  %v205_v4 = vld [vmem:[%s1907_s19 + $0x20] sm:$0x1] }
  0x11   : > { %v1914_v2 = vld [vmem:[%s1907_s19 + $0x18] sm:$0xff]  ;;  %v351_v3 = vunpack.c.l.b16 %v211_v1  ;;  %v1918_v5 = vld [vmem:[%s1907_s19] sm:$0xff]  ;;  %v199_v6 = vld [vmem:[%s1907_s19 + $0x8] sm:$0x1]  ;;  %v429_v7 = vshrl.u32 %v1910_v0, 16  ;;  %v431_v8 = vshll.u32 %v1910_v0, 16  ;;  %v349_v9 = vunpack.c.l.b16 %v205_v4 }
  0x12   : > { %v405_v10 = vshrl.u32 %v1914_v2, 16  ;;  %v214_v11 = vld [vmem:[%s1907_s19 + $0x44] sm:$0x1]  ;;  %v407_v13 = vshll.u32 %v1914_v2, 16  ;;  %v347_v14 = vunpack.c.l.b16 %v199_v6  ;;  %v381_v15 = vshrl.u32 %v1918_v5, 16  ;;  %v1930_v16 = vld [vmem:[%s1907_s19 + $0x3c] sm:$0xff] }
  0x13   : > { %v1925_v12 = vpack.c.b16 %v351_v3, %v351_v3  ;;  %v433_v17 = vrot.slane %v431_v8, 1  ;;  %v1932_v18 = vpack.c.b16 %v349_v9, %v349_v9  ;;  %v383_v19 = vshll.u32 %v1918_v5, 16  ;;  %v208_v25 = vld [vmem:[%s1907_s19 + $0x2c] sm:$0x1]  ;;  %v1944_v30 = vld [vmem:[%s1907_s19 + $0x24] sm:$0xff]  ;;  %v1974_v55 = vld [vmem:[%s1907_s19 + $0x54] sm:$0xff] }
  0x14   : > { %v352_v20 = vunpack.c.l.b16 %v214_v11  ;;  %v409_v22 = vrot.slane %v407_v13, 1  ;;  %v1936_v23 = vpack.c.b16 %v347_v14, %v347_v14  ;;  %v441_v24 = vshrl.u32 %v1930_v16, 16  ;;  %v1950_v39 = vld [vmem:[%s1907_s19 + $0xc] sm:$0xff]  ;;  %v202_v40 = vld [vmem:[%s1907_s19 + $0x14] sm:$0x1]  ;;  %v1958_v45 = vld [vmem:[%s1907_s19 + $0x60] sm:$0xff] }
  0x15   : > { %v436_v21 = vshll.u32 %v1925_v12, 16  ;;  %v434_v26 = vor.u32 %v433_v17, %v429_v7  ;;  %v412_v27 = vshll.u32 %v1932_v18, 16  ;;  %v385_v28 = vrot.slane %v383_v19, 1  ;;  %v223_v46 = vld [vmem:[%s1907_s19 + $0x68] sm:$0x1] }
  0x16   : > { %v1941_v29 = vpack.c.b16 %v352_v20, %v352_v20  ;;  %v410_v32 = vor.u32 %v409_v22, %v405_v10  ;;  %v388_v33 = vshll.u32 %v1936_v23, 16  ;;  %v443_v34 = vshll.u32 %v1930_v16, 16  ;;  %v220_v60 = vld [vmem:[%s1907_s19 + $0x5c] sm:$0x1]  ;;  %v1993_v9 = vld [vmem:[%s1907_s19 + $0x48] sm:$0xff] }
  0x17   : > { %v438_v31 = vrot.slane %v436_v21, 1  ;;  %v414_v35 = vrot.slane %v412_v27, 1  ;;  %v386_v36 = vor.u32 %v385_v28, %v381_v15  ;;  %v350_v38 = vunpack.c.l.b16 %v208_v25  ;;  %v217_v10 = vld [vmem:[%s1907_s19 + $0x50] sm:$0x1]  ;;  %v2006_v27 = vld [vmem:[%s1907_s19 + $0x78] sm:$0xff] }
  0x18   : > { %v448_v37 = vshll.u32 %v1941_v29, 16  ;;  %v390_v42 = vrot.slane %v388_v33, 1  ;;  %v445_v43 = vrot.slane %v443_v34, 1  ;;  %v417_v44 = vshrl.u32 %v1944_v30, 16  ;;  %v229_v34 = vld [vmem:[%s1907_s19 + $0x80] sm:$0x1] }
  0x19   : > { %v1954_v41 = vsel %vm379_vm0, %v434_v26, %v438_v31  ;;  %v1964_v47 = vsel %vm379_vm0, %v410_v32, %v414_v35  ;;  %v1966_v49 = vpack.c.b16 %v350_v38, %v350_v38  ;;  %v419_v50 = vshll.u32 %v1944_v30, 16  ;;  %v226_v38 = vld [vmem:[%s1907_s19 + $0x74] sm:$0x1] }
  0x1a   : > { %580 = vrot.lane.b32.xlu2 %v1954_v41, %s1856_s20  ;;  %v450_v48 = vrot.slane %v448_v37, 1  ;;  %576 = vrot.lane.b32.xlu1 %v1964_v47, %s1856_s20  ;;  %v391_v51 = vsel %vm379_vm0, %v386_v36, %v390_v42  ;;  %v446_v52 = vor.u32 %v445_v43, %v441_v24  ;;  %v348_v53 = vunpack.c.l.b16 %v202_v40  ;;  %v2025_v43 = vld [vmem:[%s1907_s19 + $0x6c] sm:$0xff] }
  0x1b   : > { %v393_v54 = vshrl.u32 %v1950_v39, 16  ;;  %572 = vrot.lane.b32.xlu0 %v391_v51, %s1856_s20  ;;  %v421_v56 = vrot.slane %v419_v50, 1  ;;  %v424_v57 = vshll.u32 %v1966_v49, 16  ;;  %v395_v58 = vshll.u32 %v1950_v39, 16 }
  0x1c   : > { %v355_v59 = vunpack.c.l.b16 %v223_v46  ;;  %v1984_v62 = vsel %vm379_vm0, %v446_v52, %v450_v48  ;;  %v1986_v63 = vpack.c.b16 %v348_v53, %v348_v53  ;;  %v477_v1 = vshrl.u32 %v1958_v45, 16 }
  0x1d   : > { %v479_v3 = vshll.u32 %v1958_v45, 16  ;;  %v422_v4 = vor.u32 %v421_v56, %v417_v44  ;;  %v426_v6 = vrot.slane %v424_v57, 1  ;;  %v397_v7 = vrot.slane %v395_v58, 1 }
  0x1e   : > { %v1990_v8 = vpack.c.b16 %v355_v59, %v355_v59  ;;  %v400_v11 = vshll.u32 %v1986_v63, 16  ;;  %v354_v14 = vunpack.c.l.b16 %v220_v60  ;;  %v465_v15 = vshrl.u32 %v1974_v55, 16 }
  0x1f   : > { %v481_v13 = vrot.slane %v479_v3, 1  ;;  %v1999_v17 = vsel %vm379_vm0, %v422_v4, %v426_v6  ;;  %v398_v19 = vor.u32 %v397_v7, %v393_v54  ;;  %v467_v21 = vshll.u32 %v1974_v55, 16 }
  0x20   : > { %v484_v20 = vshll.u32 %v1990_v8, 16  ;;  %v402_v22 = vrot.slane %v400_v11, 1  ;;  %v2003_v25 = vpack.c.b16 %v354_v14, %v354_v14  ;;  %v353_v26 = vunpack.c.l.b16 %v217_v10 }
  0x21   : > { %v482_v24 = vor.u32 %v481_v13, %v477_v1  ;;  %v469_v31 = vrot.slane %v467_v21, 1  ;;  %v453_v32 = vshrl.u32 %v1993_v9, 16  ;;  %v455_v33 = vshll.u32 %v1993_v9, 16 }
  0x22   : > { %582 = vrot.lane.b32.xlu2 %v1984_v62, %s1856_s20  ;;  %v486_v28 = vrot.slane %v484_v20, 1  ;;  %578 = vrot.lane.b32.xlu1 %v1999_v17, %s1856_s20  ;;  %v2016_v35 = vsel %vm379_vm0, %v398_v19, %v402_v22  ;;  %v472_v36 = vshll.u32 %v2003_v25, 16  ;;  %v2019_v37 = vpack.c.b16 %v353_v26, %v353_v26 }
  0x23   : > { %574 = vrot.lane.b32.xlu0 %v2016_v35, %s1856_s20  ;;  %v470_v40 = vor.u32 %v469_v31, %v465_v15  ;;  %v457_v42 = vrot.slane %v455_v33, 1  ;;  %v357_v48 = vunpack.c.l.b16 %v229_v34  ;;  %v503_v52 = vshll.u32 %v2006_v27, 16 }
  0x24   : > { %v474_v44 = vrot.slane %v472_v36, 1  ;;  %v460_v46 = vshll.u32 %v2019_v37, 16  ;;  %v2029_v50 = vsel %vm379_vm0, %v482_v24, %v486_v28  ;;  %v356_v53 = vunpack.c.l.b16 %v226_v38 }
  0x25   : > { %v458_v51 = vor.u32 %v457_v42, %v453_v32  ;;  %v2035_v57 = vpack.c.b16 %v357_v48, %v357_v48  ;;  %v501_v58 = vshrl.u32 %v2006_v27, 16  ;;  %v505_v59 = vrot.slane %v503_v52, 1 }
  0x26   : > { %v2033_v54 = vsel %vm379_vm0, %v470_v40, %v474_v44  ;;  %v462_v56 = vrot.slane %v460_v46, 1  ;;  %v372_v60 = vpack.c.b16 %v356_v53, %v356_v53  ;;  %v489_v61 = vshrl.u32 %v2025_v43, 16 }
  0x27   : > { %v491_v1 = vshll.u32 %v2025_v43, 16  ;;  %v508_v4 = vshll.u32 %v2035_v57, 16  ;;  %v611_v6 = vrot.slane %v1914_v2, 1  ;;  %v612_v7 = vrot.slane %v1932_v18, 1 }
  0x28   : > { %v2041_v3 = vsel %vm379_vm0, %v458_v51, %v462_v56  ;;  %v496_v11 = vshll.u32 %v372_v60, 16  ;;  %v629_v13 = vrot.slane %v1958_v45, 1  ;;  %v630_v14 = vrot.slane %v1990_v8, 1  ;;  %v2112_v51 = vld [vmem:[%s1907_s19 + $0x84] sm:$0xff] }
  0x29   : > { %v493_v10 = vrot.slane %v491_v1, 1  ;;  %v2053_v15 = vsel %vm604_vm1, %v611_v6, %v612_v7  ;;  %v506_v18 = vor.u32 %v505_v59, %v501_v58  ;;  %v510_v19 = vrot.slane %v508_v4, 1 }
  0x2a   : > { %588 = vrot.lane.b32.xlu2 %v2029_v50, %s1856_s20  ;;  %586 = vrot.lane.b32.xlu1 %v2033_v54, %s1856_s20  ;;  %v498_v21 = vrot.slane %v496_v11, 1  ;;  %v2060_v22 = vsel %vm604_vm1, %v629_v13, %v630_v14  ;;  %v632_v26 = vrot.slane %v2025_v43, 1  ;;  %v633_v28 = vrot.slane %v372_v60, 1 }
  0x2b   : > { %584 = vrot.lane.b32.xlu0 %v2041_v3, %s1856_s20  ;;  %1740 = vmatmul.msk.bf16.vlgmr.msra.gmra.mxu1 %vm891_vm2, %v2053_v15  ;;  %v494_v20 = vor.u32 %v493_v10, %v489_v61  ;;  %v511_v24 = vsel %vm379_vm0, %v506_v18, %v510_v19  ;;  %v614_v31 = vrot.slane %v1944_v30, 1  ;;  %v615_v32 = vrot.slane %v1966_v49, 1 }
  0x2c   : > { %v2075_v33 = vsel %vm604_vm1, %v632_v26, %v633_v28  ;;  %v605_v36 = vrot.slane %v1918_v5, 1  ;;  %v606_v38 = vrot.slane %v1936_v23, 1  ;;  %v608_v40 = vrot.slane %v1950_v39, 1 }
  0x2d   : > { %v2064_v8 = vsel %vm379_vm0, %v494_v20, %v498_v21  ;;  %v2078_v34 = vsel %vm604_vm1, %v614_v31, %v615_v32  ;;  %v609_v23 = vrot.slane %v1986_v63, 1  ;;  %v617_v42 = vrot.slane %v1910_v0, 1  ;;  %v232_v63 = vld [vmem:[%s1907_s19 + $0x8c] sm:$0x1]  ;;  %v235_v20 = vld [vmem:[%s1907_s19 + $0x98] sm:$0x1] }
  0x2e   : > { %v607_v49 = vsel %vm604_vm1, %v605_v36, %v606_v38  ;;  %v618_v44 = vrot.slane %v1925_v12, 1  ;;  %v358_v12 = vunpack.c.l.b16 %v232_v63  ;;  %v635_v52 = vrot.slane %v2006_v27, 1  ;;  %v2168_v21 = vld [vmem:[%s1907_s19 + $0x90] sm:$0xff]  ;;  %v1784_v32 = vld [vmem:[%s2785_s1 + $0x38] sm:$0xff] }
  0x2f   : > { %v610_v46 = vsel %vm604_vm1, %v608_v40, %v609_v23  ;;  %v515_v56 = vshll.u32 %v2112_v51, 16  ;;  %v620_v58 = vrot.slane %v1930_v16, 1  ;;  %v621_v59 = vrot.slane %v1941_v29, 1  ;;  %1786 = vmatpush.bf16.msra.mxu2 %v1784_v32  ;;  %1262 = vmatpush.bf16.msra.mxu0 %v1784_v32 }
  0x30   : > { %v2101_v48 = vsel %vm604_vm1, %v617_v42, %v618_v44  ;;  %v374_v53 = vpack.c.b16 %v358_v12, %v358_v12  ;;  %v513_v61 = vshrl.u32 %v2112_v51, 16  ;;  %v623_v14 = vrot.slane %v1993_v9, 1  ;;  %v1783_v44 = vld [vmem:[%s2785_s1 + $0x30] sm:$0xff] }
  0x31   : > { %v517_v1 = vrot.slane %v515_v56, 1  ;;  %v2130_v6 = vsel %vm604_vm1, %v620_v58, %v621_v59  ;;  %v624_v18 = vrot.slane %v2019_v37, 1  ;;  %v527_v26 = vshll.u32 %v2168_v21, 16  ;;  %v1781_v56 = vld [vmem:[%s2785_s1 + $0x20] sm:$0xff] }
  0x32   : > { %669 = vrot.lane.b32.xlu2 %v2060_v22, %s1857_s23  ;;  %592 = vrot.lane.b32.xlu1 %v511_v24, %s1856_s20  ;;  %v520_v4 = vshll.u32 %v374_v53, 16  ;;  %v639_v7 = vrot.slane %v374_v53, 1  ;;  %v626_v28 = vrot.slane %v1974_v55, 1  ;;  %v627_v31 = vrot.slane %v2003_v25, 1  ;;  %v238_v59 = vld [vmem:[%s1907_s19 + $0xa4] sm:$0x1] }
  0x33   : > { %590 = vrot.lane.b32.xlu0 %v2064_v8, %s1856_s20  ;;  %v518_v29 = vor.u32 %v517_v1, %v513_v61  ;;  %v2156_v19 = vsel %vm604_vm1, %v623_v14, %v624_v18  ;;  %v525_v36 = vshrl.u32 %v2168_v21, 16  ;;  %v529_v38 = vrot.slane %v527_v26, 1  ;;  %1787 = vmatpush.bf16.msra.mxu2 %v1783_v44  ;;  %v1779_v61 = vld [vmem:[%s2785_s1 + $0x10] sm:$0xff]  ;;  %v1777_v18 = vld [vmem:[%s2785_s1] sm:$0xff] }
  0x34   : > { %v522_v10 = vrot.slane %v520_v4, 1  ;;  %v2186_v40 = vsel %vm604_vm1, %v626_v28, %v627_v31  ;;  %1263 = vmatpush.bf16.msra.mxu0 %v1783_v44  ;;  %v641_v12 = vrot.slane %v2168_v21, 1 }
  0x35   : > { %v530_v23 = vor.u32 %v529_v38, %v525_v36 }
  0x36   : > { %v2146_v13 = vsel %vm379_vm0, %v518_v29, %v522_v10 }
  0x3a   : > { %788 = vrot.lane.b32.xlu2 %v2075_v33, %s1858_s24  ;;  %753 = vrot.lane.b32.xlu1 %v2064_v8, %s1859_s25 }
  0x3b   : > { %706 = vrot.lane.b32.xlu0 %v2025_v43, %s1860_s26  ;;  %1741 = vmatmul.msk.bf16.gmra.mxu1 %vm891_vm2, %v2078_v34 }
  0x42   : > { %653 = vrot.lane.b32.xlu2 %v607_v49, %s1857_s23  ;;  %872 = vrot.lane.b32.xlu1 %v511_v24, %s1861_s27 }
  0x43   : > { %825 = vrot.lane.b32.xlu0 %v2006_v27, %s1862_s28 }
  0x4a   : > { %772 = vrot.lane.b32.xlu2 %v610_v46, %s1858_s24  ;;  %737 = vrot.lane.b32.xlu1 %v2016_v35, %s1859_s25  ;;  %v636_v35 = vrot.slane %v2035_v57, 1  ;;  %v638_v57 = vrot.slane %v2112_v51, 1 }
  0x4b   : > { %690 = vrot.lane.b32.xlu0 %v1950_v39, %s1860_s26  ;;  %1742 = vmatmul.msk.bf16.gmra.mxu1 %vm891_vm2, %v2101_v48 }
  0x4c   : > { %v2126_v60 = vsel %vm604_vm1, %v635_v52, %v636_v35  ;;  %v2141_v11 = vsel %vm604_vm1, %v638_v57, %v639_v7  ;;  %v2242_v57 = vld [vmem:[%s1907_s19 + $0x9c] sm:$0xff]  ;;  %v1778_v7 = vld [vmem:[%s2785_s1 + $0x8] sm:$0xff] }
  0x4d   : > { %1749 = vmatmul.msk.bf16.vlgmr.msra.gmra.mxu3 %vm891_vm2, %v2141_v11  ;;  %v539_v10 = vshll.u32 %v2242_v57, 16 }
  0x52   : > { %671 = vrot.lane.b32.xlu2 %v2075_v33, %s1857_s23  ;;  %856 = vrot.lane.b32.xlu1 %v1964_v47, %s1861_s27 }
  0x53   : > { %809 = vrot.lane.b32.xlu0 %v1914_v2, %s1862_s28 }
  0x5a   : > { %790 = vrot.lane.b32.xlu2 %v2126_v60, %s1858_s24  ;;  %755 = vrot.lane.b32.xlu1 %v511_v24, %s1859_s25  ;;  %v359_v24 = vunpack.c.l.b16 %v235_v20 }
  0x5b   : > { %708 = vrot.lane.b32.xlu0 %v2006_v27, %s1860_s26  ;;  %1743 = vmatmul.msk.bf16.gmra.mxu1 %vm891_vm2, %v2130_v6 }
  0x5c   : > { %v375_v37 = vpack.c.b16 %v359_v24, %v359_v24 }
  0x5e   : > { %v532_v49 = vshll.u32 %v375_v37, 16  ;;  %v642_v52 = vrot.slane %v375_v37, 1  ;;  %v541_v37 = vrot.slane %v539_v10, 1 }
  0x60   : > { %v534_v42 = vrot.slane %v532_v49, 1  ;;  %v2213_v35 = vsel %vm604_vm1, %v641_v12, %v642_v52 }
  0x61   : > { %1750 = vmatmul.msk.bf16.gmra.mxu3 %vm891_vm2, %v2213_v35 }
  0x62   : > { %655 = vrot.lane.b32.xlu2 %v610_v46, %s1857_s23  ;;  %874 = vrot.lane.b32.xlu1 %v2146_v13, %s1861_s27  ;;  %v1782_v46 = vld [vmem:[%s2785_s1 + $0x28] sm:$0xff]  ;;  %v2205_v63 = vsel %vm379_vm0, %v530_v23, %v534_v42  ;;  %v644_v23 = vrot.slane %v2242_v57, 1 }
  0x63   : > { %827 = vrot.lane.b32.xlu0 %v2112_v51, %s1862_s28  ;;  %1788 = vmatpush.bf16.msra.mxu2 %v1782_v46 }
  0x64   : > { %1264 = vmatpush.bf16.msra.mxu0 %v1782_v46 }
  0x67   : > { %1789 = vmatpush.bf16.msra.mxu2 %v1781_v56 }
  0x68   : > { %1265 = vmatpush.bf16.msra.mxu0 %v1781_v56 }
  0x6a   : > { %774 = vrot.lane.b32.xlu2 %v2053_v15, %s1858_s24  ;;  %739 = vrot.lane.b32.xlu1 %v1964_v47, %s1859_s25 }
  0x6b   : > { %692 = vrot.lane.b32.xlu0 %v1914_v2, %s1860_s26  ;;  %1744 = vmatmul.msk.bf16.gmra.mxu1 %vm891_vm2, %v2156_v19 }
  0x72   : > { %673 = vrot.lane.b32.xlu2 %v2126_v60, %s1857_s23  ;;  %858 = vrot.lane.b32.xlu1 %v1999_v17, %s1861_s27 }
  0x73   : > { %811 = vrot.lane.b32.xlu0 %v1944_v30, %s1862_s28 }
  0x74   : > { %v2176_v47 = vpop.permute.xlu2 %580 }
  0x7a   : > { %792 = vrot.lane.b32.xlu2 %v2141_v11, %s1858_s24  ;;  %757 = vrot.lane.b32.xlu1 %v2146_v13, %s1859_s25 }
  0x7b   : > { %710 = vrot.lane.b32.xlu0 %v2112_v51, %s1860_s26  ;;  %1745 = vmatmul.msk.bf16.gmra.mxu1 %vm891_vm2, %v2186_v40 }
  0x7c   : > { %v2194_v25 = vpop.permute.xlu2 %582 }
  0x82   : > { %657 = vrot.lane.b32.xlu2 %v2053_v15, %s1857_s23  ;;  %876 = vrot.lane.b32.xlu1 %v2205_v63, %s1861_s27  ;;  %v1780_v15 = vld [vmem:[%s2785_s1 + $0x18] sm:$0xff] }
  0x83   : > { %829 = vrot.lane.b32.xlu0 %v2168_v21, %s1862_s28  ;;  %1790 = vmatpush.bf16.msra.mxu2 %v1780_v15 }
  0x84   : > { %v589_v53 = vpop.permute.xlu2 %588  ;;  %1266 = vmatpush.bf16.msra.mxu0 %v1780_v15 }
  0x85   : > { %v909_v52 = vsel %vm891_vm2, %v1958_v45, %v589_v53 }
  0x87   : > { %1791 = vmatpush.bf16.msra.mxu2 %v1779_v61 }
  0x88   : > { %1267 = vmatpush.bf16.msra.mxu0 %v1779_v61 }
  0x8a   : > { %776 = vrot.lane.b32.xlu2 %v2078_v34, %s1858_s24  ;;  %741 = vrot.lane.b32.xlu1 %v1999_v17, %s1859_s25  ;;  %v360_v17 = vunpack.c.l.b16 %v238_v59 }
  0x8b   : > { %694 = vrot.lane.b32.xlu0 %v1944_v30, %s1860_s26  ;;  %1746 = vmatmul.msk.bf16.gmra.mxu1 %vm891_vm2, %v2060_v22 }
  0x8c   : > { %v670_v58 = vpop.permute.xlu2 %669  ;;  %v2237_v1 = vpop.permute.xlu1 %576  ;;  %1792 = vmatpush.bf16.msra.mxu2 %v1778_v7  ;;  %v376_v29 = vpack.c.b16 %v360_v17, %v360_v17  ;;  %1268 = vmatpush.bf16.msra.mxu0 %v1778_v7  ;;  %v241_v7 = vld [vmem:[%s1907_s19 + $0xb0] sm:$0x1] }
  0x8d   : > { %v2239_v4 = vpop.permute.xlu0 %572 }
  0x8e   : > { %v544_v26 = vshll.u32 %v376_v29, 16  ;;  %v645_v42 = vrot.slane %v376_v29, 1 }
  0x90   : > { %1793 = vmatpush.bf16.msra.mxu2 %v1777_v18  ;;  %1269 = vmatpush.bf16.msra.mxu0 %v1777_v18  ;;  %v546_v31 = vrot.slane %v544_v26, 1  ;;  %v2281_v44 = vsel %vm604_vm1, %v644_v23, %v645_v42  ;;  %v2327_v18 = vld [vmem:[%s1907_s19 + $0xa8] sm:$0xff]  ;;  %v893_v23 = vsel %vm891_vm2, %v1918_v5, %v2239_v4 }
  0x91   : > { %1751 = vmatmul.msk.bf16.gmra.mxu3 %vm891_vm2, %v2281_v44 }
  0x92   : > { %594 = vrot.lane.b32.xlu2 %v2146_v13, %s1856_s20  ;;  %860 = vrot.lane.b32.xlu1 %v1954_v41, %s1861_s27  ;;  %v537_v13 = vshrl.u32 %v2242_v57, 16 }
  0x93   : > { %813 = vrot.lane.b32.xlu0 %v1910_v0, %s1862_s28 }
  0x94   : > { %v789_v14 = vpop.permute.xlu2 %788  ;;  %v2257_v20 = vpop.permute.xlu1 %578  ;;  %v542_v28 = vor.u32 %v541_v37, %v537_v13  ;;  %v361_v13 = vunpack.c.l.b16 %v241_v7 }
  0x95   : > { %v2259_v24 = vpop.permute.xlu0 %574 }
  0x96   : > { %v2275_v49 = vsel %vm379_vm0, %v542_v28, %v546_v31  ;;  %v377_v28 = vpack.c.b16 %v361_v13, %v361_v13  ;;  %v551_v31 = vshll.u32 %v2327_v18, 16 }
  0x9a   : > { %759 = vrot.lane.b32.xlu2 %v2205_v63, %s1859_s25  ;;  %712 = vrot.lane.b32.xlu1 %v2168_v21, %s1860_s26 }
  0x9b   : > { %675 = vrot.lane.b32.xlu0 %v2141_v11, %s1857_s23  ;;  %1747 = vmatmul.msk.bf16.gmra.mxu1 %vm891_vm2, %v2075_v33 }
  0x9c   : > { %v654_v32 = vpop.permute.xlu2 %653  ;;  %v2270_v36 = vpop.permute.xlu1 %586 }
  0x9d   : > { %v2272_v38 = vpop.permute.xlu0 %584 }
  0xa2   : > { %878 = vrot.lane.b32.xlu2 %v2275_v49, %s1861_s27  ;;  %831 = vrot.lane.b32.xlu1 %v2242_v57, %s1862_s28 }
  0xa3   : > { %794 = vrot.lane.b32.xlu0 %v2213_v35, %s1858_s24 }
  0xa4   : > { %v2289_v33 = vpop.permute.xlu2 %772  ;;  %v2291_v11 = vpop.permute.xlu1 %592 }
  0xa5   : > { %v2293_v46 = vpop.permute.xlu0 %590 }
  0xa8   : > { %v2295_v12 = vpop.f32.mrf.mxu1 }
  0xaa   : > { %743 = vrot.lane.b32.xlu2 %v1954_v41, %s1859_s25  ;;  %696 = vrot.lane.b32.xlu1 %v1910_v0, %s1860_s26  ;;  %v942_v41 = vsel %vm924_vm4, %v909_v52, %v670_v58  ;;  %v926_v52 = vsel %vm924_vm4, %v893_v23, %v654_v32  ;;  %v911_v23 = vsel %vm891_vm2, %v2025_v43, %v2293_v46 }
  0xab   : > { %659 = vrot.lane.b32.xlu0 %v2078_v34, %s1857_s23  ;;  %1748 = vmatmul.msk.bf16.gmra.mxu1 %vm891_vm2, %v2126_v60 }
  0xac   : > { %v2305_v56 = vpop.permute.xlu2 %671  ;;  %v754_v15 = vpop.permute.xlu1 %753 }
  0xad   : > { %v707_v59 = vpop.permute.xlu0 %706 }
  0xae   : > { %v975_v0 = vsel %vm957_vm3, %v942_v41, %v707_v59  ;;  %v553_v59 = vrot.slane %v551_v31, 1  ;;  %v556_v41 = vshll.u32 %v377_v28, 16 }
  0xaf   : > { %v1008_v34 = vsel %vm990_vm5, %v975_v0, %v754_v15  ;;  %v647_v0 = vrot.slane %v2327_v18, 1 }
  0xb0   : > { %v2311_v61 = vpop.f32.mrf.mxu1  ;;  %v1041_v58 = vsel %vm1023_vm6, %v1008_v34, %v789_v14  ;;  %v648_v34 = vrot.slane %v377_v28, 1 }
  0xb2   : > { %862 = vrot.lane.b32.xlu2 %v1984_v62, %s1861_s27  ;;  %815 = vrot.lane.b32.xlu1 %v1930_v16, %s1862_s28  ;;  %v2355_v5 = vsel %vm604_vm1, %v647_v0, %v648_v34 }
  0xb3   : > { %778 = vrot.lane.b32.xlu0 %v2101_v48, %s1858_s24  ;;  %1752 = vmatmul.msk.bf16.gmra.mxu3 %vm891_vm2, %v2355_v5 }
  0xb4   : > { %v2320_v60 = vpop.permute.xlu2 %790  ;;  %v873_v53 = vpop.permute.xlu1 %872 }
  0xb5   : > { %v826_v17 = vpop.permute.xlu0 %825 }
  0xb6   : > { %v1074_v29 = vsel %vm1056_vm7, %v1041_v58, %v826_v17  ;;  %v558_v17 = vrot.slane %v556_v41, 1 }
  0xb7   : > { %v1115_v10 = vsel %vm1089_vm8, %v1074_v29, %v873_v53 }
  0xb8   : > { %1310 = vmatmul.bf16.vlgmr.msra.gmra.mxu2 %v1115_v10  ;;  %v2329_v37 = vpop.f32.mrf.mxu1 }
  0xba   : > { %714 = vrot.lane.b32.xlu2 %v2242_v57, %s1860_s26  ;;  %677 = vrot.lane.b32.xlu1 %v2213_v35, %s1857_s23  ;;  %v549_v35 = vshrl.u32 %v2327_v18, 16 }
  0xbb   : > { %596 = vrot.lane.b32.xlu0 %v2205_v63, %s1856_s20 }
  0xbc   : > { %v2337_v14 = vpop.permute.xlu2 %655  ;;  %v738_v26 = vpop.permute.xlu1 %737  ;;  %v554_v58 = vor.u32 %v553_v59, %v549_v35  ;;  %v244_v59 = vld [vmem:[%s1907_s19 + $0xbc] sm:$0x1] }
  0xbd   : > { %v691_v42 = vpop.permute.xlu0 %690 }
  0xbe   : > { %v959_v15 = vsel %vm957_vm3, %v926_v52, %v691_v42  ;;  %v944_v52 = vsel %vm924_vm4, %v911_v23, %v2305_v56 }
  0xbf   : > { %v992_v53 = vsel %vm990_vm5, %v959_v15, %v738_v26  ;;  %v2366_v26 = vsel %vm379_vm0, %v554_v58, %v558_v17 }
  0xc0   : > { %v2346_v63 = vpop.f32.mrf.mxu1  ;;  %v1025_v7 = vsel %vm1023_vm6, %v992_v53, %v2289_v33  ;;  %v2399_v53 = vld [vmem:[%s1907_s19 + $0xb4] sm:$0xff] }
  0xc1   : > { %v563_v17 = vshll.u32 %v2399_v53, 16 }
  0xc2   : > { %833 = vrot.lane.b32.xlu2 %v2327_v18, %s1862_s28  ;;  %796 = vrot.lane.b32.xlu1 %v2281_v44, %s1858_s24 }
  0xc3   : > { %761 = vrot.lane.b32.xlu0 %v2275_v49, %s1859_s25 }
  0xc4   : > { %v775_v4 = vpop.permute.xlu2 %774  ;;  %v857_v32 = vpop.permute.xlu1 %856 }
  0xc5   : > { %v810_v29 = vpop.permute.xlu0 %809 }
  0xc6   : > { %v1058_v10 = vsel %vm1056_vm7, %v1025_v7, %v810_v29  ;;  %v895_v29 = vsel %vm891_vm2, %v1950_v39, %v2259_v24 }
  0xc7   : > { %v1091_v13 = vsel %vm1089_vm8, %v1058_v10, %v857_v32  ;;  %v362_v32 = vunpack.c.l.b16 %v244_v59 }
  0xc8   : > { %1270 = vmatmul.bf16.vlgmr.msra.gmra.mxu0 %v1091_v13  ;;  %v2368_v28 = vpop.f32.mrf.mxu1 }
  0xca   : > { %698 = vrot.lane.b32.xlu2 %v1930_v16, %s1860_s26  ;;  %661 = vrot.lane.b32.xlu1 %v2101_v48, %s1857_s23 }
  0xcb   : > { %880 = vrot.lane.b32.xlu0 %v2366_v26, %s1861_s27 }
  0xcc   : > { %v2376_v33 = vpop.permute.xlu2 %673  ;;  %v756_v31 = vpop.permute.xlu1 %755 }
  0xcd   : > { %v709_v42 = vpop.permute.xlu0 %708 }
  0xce   : > { %v977_v16 = vsel %vm957_vm3, %v944_v52, %v709_v42 }
  0xcf   : > { %v1010_v48 = vsel %vm990_vm5, %v977_v16, %v756_v31  ;;  %v565_v31 = vrot.slane %v563_v17, 1 }
  0xd0   : > { %v2384_v15 = vpop.f32.mrf.mxu1  ;;  %v1043_v56 = vsel %vm1023_vm6, %v1010_v48, %v2320_v60  ;;  %v378_v60 = vpack.c.b16 %v362_v32, %v362_v32 }
  0xd2   : > { %817 = vrot.lane.b32.xlu2 %v1993_v9, %s1862_s28  ;;  %780 = vrot.lane.b32.xlu1 %v2130_v6, %s1858_s24  ;;  %v568_v23 = vshll.u32 %v378_v60, 16 }
  0xd3   : > { %745 = vrot.lane.b32.xlu0 %v1984_v62, %s1859_s25 }
  0xd4   : > { %v793_v46 = vpop.permute.xlu2 %792  ;;  %v875_v35 = vpop.permute.xlu1 %874 }
  0xd5   : > { %v828_v41 = vpop.permute.xlu0 %827 }
  0xd6   : > { %v1076_v0 = vsel %vm1056_vm7, %v1043_v56, %v828_v41 }
  0xd7   : > { %v1118_v34 = vsel %vm1089_vm8, %v1076_v0, %v875_v35  ;;  %v650_v0 = vrot.slane %v2399_v53, 1 }
  0xd8   : > { %1315 = vmatmul.bf16.gmra.mxu2 %v1118_v34  ;;  %v2401_v58 = vpop.f32.mrf.mxu1  ;;  %v651_v34 = vrot.slane %v378_v60, 1 }
  0xda   : > { %679 = vrot.lane.b32.xlu2 %v2281_v44, %s1857_s23  ;;  %598 = vrot.lane.b32.xlu1 %v2275_v49, %s1856_s20  ;;  %v928_v44 = vsel %vm924_vm4, %v895_v29, %v2337_v14  ;;  %v561_v49 = vshrl.u32 %v2399_v53, 16  ;;  %v570_v14 = vrot.slane %v568_v23, 1 }
  0xdb   : > { %864 = vrot.lane.b32.xlu0 %v2041_v3, %s1861_s27 }
  0xdc   : > { %v2409_v62 = vpop.permute.xlu2 %657  ;;  %v740_v7 = vpop.permute.xlu1 %739  ;;  %v566_v24 = vor.u32 %v565_v31, %v561_v49 }
  0xdd   : > { %v693_v10 = vpop.permute.xlu0 %692 }
  0xde   : > { %v961_v13 = vsel %vm957_vm3, %v928_v44, %v693_v10  ;;  %v2434_v41 = vsel %vm379_vm0, %v566_v24, %v570_v14  ;;  %v897_v14 = vsel %vm891_vm2, %v1914_v2, %v2237_v1 }
  0xdf   : > { %v994_v52 = vsel %vm990_vm5, %v961_v13, %v740_v7 }
  0xe0   : > { %v2419_v42 = vpop.f32.mrf.mxu1  ;;  %v1027_v48 = vsel %vm1023_vm6, %v994_v52, %v775_v4  ;;  %v2444_v4 = vsel %vm604_vm1, %v650_v0, %v651_v34  ;;  %v2476_v52 = vld [vmem:[%s1907_s19 + $0xc0] sm:$0xff] }
  0xe1   : > { %1753 = vmatmul.msk.bf16.gmra.mxu3 %vm891_vm2, %v2444_v4  ;;  %v726_v0 = vshrl.u32 %v2476_v52, 16 }
  0xe2   : > { %798 = vrot.lane.b32.xlu2 %v2355_v5, %s1858_s24  ;;  %763 = vrot.lane.b32.xlu1 %v2366_v26, %s1859_s25 }
  0xe3   : > { %716 = vrot.lane.b32.xlu0 %v2327_v18, %s1860_s26 }
  0xe4   : > { %v2428_v39 = vpop.permute.xlu2 %776  ;;  %v859_v16 = vpop.permute.xlu1 %858 }
  0xe5   : > { %v812_v35 = vpop.permute.xlu0 %811 }
  0xe6   : > { %v1060_v59 = vsel %vm1056_vm7, %v1027_v48, %v812_v35  ;;  %v728_v35 = vshll.u32 %v2476_v52, 16 }
  0xe7   : > { %v1094_v56 = vsel %vm1089_vm8, %v1060_v59, %v859_v16  ;;  %v930_v59 = vsel %vm924_vm4, %v897_v14, %v2409_v62 }
  0xe8   : > { %1275 = vmatmul.bf16.gmra.mxu0 %v1094_v56  ;;  %v2439_v32 = vpop.f32.mrf.mxu1  ;;  %v730_v34 = vrot.slane %v728_v35, 1 }
  0xea   : > { %663 = vrot.lane.b32.xlu2 %v2130_v6, %s1857_s23  ;;  %882 = vrot.lane.b32.xlu1 %v2434_v41, %s1861_s27  ;;  %v913_v6 = vsel %vm891_vm2, %v2006_v27, %v2291_v11  ;;  %v731_v1 = vor.u32 %v730_v34, %v726_v0  ;;  %v250_v34 = vld [vmem:[%s1907_s19 + $0xd4] sm:$0x1] }
  0xeb   : > { %835 = vrot.lane.b32.xlu0 %v2399_v53, %s1862_s28  ;;  %v946_v29 = vsel %vm924_vm4, %v913_v6, %v2376_v33 }
  0xec   : > { %v595_v17 = vpop.permute.xlu2 %594  ;;  %v758_v7 = vpop.permute.xlu1 %757 }
  0xed   : > { %v711_v60 = vpop.permute.xlu0 %710 }
  0xee   : > { %v979_v10 = vsel %vm957_vm3, %v946_v29, %v711_v60 }
  0xef   : > { %v1012_v44 = vsel %vm990_vm5, %v979_v10, %v758_v7 }
  0xf0   : > { %v2463_v11 = vpop.f32.mrf.mxu1  ;;  %v1045_v33 = vsel %vm1023_vm6, %v1012_v44, %v793_v46 }
  0xf2   : > { %782 = vrot.lane.b32.xlu2 %v2156_v19, %s1858_s24  ;;  %747 = vrot.lane.b32.xlu1 %v2041_v3, %s1859_s25  ;;  %v247_v3 = vld [vmem:[%s1907_s19 + $0xc8] sm:$0x1] }
  0xf3   : > { %700 = vrot.lane.b32.xlu0 %v1993_v9, %s1860_s26  ;;  %v723_v46 = vunpack.c.l.b16 %v247_v3  ;;  %v915_v3 = vsel %vm891_vm2, %v2112_v51, %v595_v17 }
  0xf4   : > { %v760_v27 = vpop.permute.xlu2 %759  ;;  %v877_v13 = vpop.permute.xlu1 %876 }
  0xf5   : > { %v830_v49 = vpop.permute.xlu0 %829 }
  0xf6   : > { %v1078_v31 = vsel %vm1056_vm7, %v1045_v33, %v830_v49 }
  0xf7   : > { %v1121_v23 = vsel %vm1089_vm8, %v1078_v31, %v877_v13  ;;  %v769_v31 = vrot.slane %v2476_v52, 1 }
  0xf8   : > { %1320 = vmatmul.bf16.gmra.mxu2 %v1121_v23  ;;  %v2481_v48 = vpop.f32.mrf.mxu1 }
  0xfa   : > { %600 = vrot.lane.b32.xlu2 %v2366_v26, %s1856_s20  ;;  %866 = vrot.lane.b32.xlu1 %v2033_v54, %s1861_s27  ;;  %v724_v26 = vpack.c.b16 %v723_v46, %v723_v46 }
  0xfb   : > { %819 = vrot.lane.b32.xlu0 %v1974_v55, %s1862_s28 }
  0xfc   : > { %v879_v9 = vpop.permute.xlu2 %878  ;;  %v742_v24 = vpop.permute.xlu1 %741  ;;  %v733_v7 = vshll.u32 %v724_v26, 16  ;;  %v770_v23 = vrot.slane %v724_v26, 1 }
  0xfd   : > { %v695_v16 = vpop.permute.xlu0 %694 }
  0xfe   : > { %v963_v56 = vsel %vm957_vm3, %v930_v59, %v695_v16  ;;  %v735_v6 = vrot.slane %v733_v7, 1  ;;  %v899_v7 = vsel %vm891_vm2, %v1944_v30, %v2257_v20 }
  0xff   : > { %v996_v2 = vsel %vm990_vm5, %v963_v56, %v742_v24 }
 0x100   : > { %v1029_v29 = vsel %vm1023_vm6, %v996_v2, %v2428_v39  ;;  %v736_v13 = vsel %vm379_vm0, %v731_v1, %v735_v6  ;;  %v2500_v49 = vpop.f32.mrf.mxu1  ;;  %v2540_v1 = vld [vmem:[%s1907_s19 + $0xcc] sm:$0xff]  ;;  %v842_v6 = vunpack.c.l.b16 %v250_v34 }
 0x101   : > { %v847_v30 = vshll.u32 %v2540_v1, 16 }
 0x102   : > { %765 = vrot.lane.b32.xlu2 %v2434_v41, %s1859_s25  ;;  %718 = vrot.lane.b32.xlu1 %v2399_v53, %s1860_s26 }
 0x103   : > { %681 = vrot.lane.b32.xlu0 %v2355_v5, %s1857_s23  ;;  %v771_v5 = vsel %vm604_vm1, %v769_v31, %v770_v23 }
 0x104   : > { %v744_v62 = vpop.permute.xlu2 %743  ;;  %v861_v60 = vpop.permute.xlu1 %860  ;;  %1754 = vmatmul.msk.bf16.gmra.mxu3 %vm891_vm2, %v771_v5 }
 0x105   : > { %v814_v10 = vpop.permute.xlu0 %813 }
 0x106   : > { %v1062_v44 = vsel %vm1056_vm7, %v1029_v29, %v814_v10  ;;  %v2549_v10 = vpack.c.b16 %v842_v6, %v842_v6 }
 0x107   : > { %v1097_v33 = vsel %vm1089_vm8, %v1062_v44, %v861_v60 }
 0x108   : > { %1280 = vmatmul.bf16.gmra.mxu0 %v1097_v33  ;;  %v2513_v16 = vpop.f32.mrf.mxu1 }
 0x10a   : > { %884 = vrot.lane.b32.xlu2 %v736_v13, %s1861_s27  ;;  %837 = vrot.lane.b32.xlu1 %v2476_v52, %s1862_s28 }
 0x10b   : > { %800 = vrot.lane.b32.xlu0 %v2444_v4, %s1858_s24 }
 0x10c   : > { %v863_v39 = vpop.permute.xlu2 %862  ;;  %v713_v46 = vpop.permute.xlu1 %712 }
 0x10d   : > { %v676_v24 = vpop.permute.xlu0 %675 }
 0x10e   : > { %v948_v14 = vsel %vm924_vm4, %v915_v3, %v676_v24  ;;  %v845_v3 = vshrl.u32 %v2540_v1, 16 }
 0x10f   : > { %v981_v26 = vsel %vm957_vm3, %v948_v14, %v713_v46  ;;  %v852_v46 = vshll.u32 %v2549_v10, 16 }
 0x110   : > { %v1014_v17 = vsel %vm990_vm5, %v981_v26, %v760_v27 }
 0x111   : > { %v854_v14 = vrot.slane %v852_v46, 1 }
 0x112   : > { %749 = vrot.lane.b32.xlu2 %v2033_v54, %s1859_s25  ;;  %702 = vrot.lane.b32.xlu1 %v1974_v55, %s1860_s26  ;;  %v2532_v55 = vpop.f32.mrf.mxu1 }
 0x113   : > { %665 = vrot.lane.b32.xlu0 %v2156_v19, %s1857_s23 }
 0x114   : > { %v832_v35 = vpop.permute.xlu1 %831  ;;  %v715_v51 = vpop.permute.xlu2 %714 }
 0x115   : > { %v795_v59 = vpop.permute.xlu0 %794 }
 0x116   : > { %v1047_v56 = vsel %vm1023_vm6, %v1014_v17, %v795_v59 }
 0x117   : > { %v1080_v0 = vsel %vm1056_vm7, %v1047_v56, %v832_v35 }
 0x118   : > { %v1124_v54 = vsel %vm1089_vm8, %v1080_v0, %v879_v9 }
 0x119   : > { %1325 = vmatmul.bf16.gmra.mxu2 %v1124_v54  ;;  %v2580_v54 = vld [vmem:[%s2786_s2] ss:$0 sm:$0xff] }
 0x11a   : > { %868 = vrot.lane.b32.xlu2 %v2029_v50, %s1861_s27  ;;  %821 = vrot.lane.b32.xlu1 %v1958_v45, %s1862_s28  ;;  %v2553_v33 = vpop.f32.mrf.mxu1 }
 0x11b   : > { %784 = vrot.lane.b32.xlu0 %v2186_v40, %s1858_s24 }
 0x11c   : > { %v697_v19 = vpop.permute.xlu1 %696  ;;  %v834_v9 = vpop.permute.xlu2 %833 }
 0x11d   : > { %v660_v27 = vpop.permute.xlu0 %659 }
 0x11e   : > { %v932_v2 = vsel %vm924_vm4, %v899_v7, %v660_v27 }
 0x11f   : > { %v965_v60 = vsel %vm957_vm3, %v932_v2, %v697_v19 }
 0x120   : > { %v998_v20 = vsel %vm990_vm5, %v965_v60, %v744_v62 }
 0x122   : > { %720 = vrot.lane.b32.xlu2 %v2476_v52, %s1860_s26  ;;  %683 = vrot.lane.b32.xlu1 %v2444_v4, %s1857_s23  ;;  %v2564_v35 = vpop.f32.mrf.mxu1 }
 0x123   : > { %602 = vrot.lane.b32.xlu0 %v2434_v41, %s1856_s20  ;;  %v849_v41 = vrot.slane %v847_v30, 1 }
 0x124   : > { %v816_v29 = vpop.permute.xlu1 %815  ;;  %v699_v23 = vpop.permute.xlu2 %698 }
 0x125   : > { %v779_v44 = vpop.permute.xlu0 %778  ;;  %v850_v24 = vor.u32 %v849_v41, %v845_v3 }
 0x126   : > { %v1031_v52 = vsel %vm1023_vm6, %v998_v20, %v779_v44 }
 0x127   : > { %v1064_v31 = vsel %vm1056_vm7, %v1031_v52, %v816_v29  ;;  %v855_v17 = vsel %vm379_vm0, %v850_v24, %v854_v14 }
 0x128   : > { %v1100_v4 = vsel %vm1089_vm8, %v1064_v31, %v863_v39 }
 0x129   : > { %1285 = vmatmul.bf16.gmra.mxu0 %v1100_v4 }
 0x12a   : > { %839 = vrot.lane.b32.xlu2 %v2540_v1, %s1862_s28  ;;  %802 = vrot.lane.b32.xlu1 %v771_v5, %s1858_s24 }
 0x12b   : > { %767 = vrot.lane.b32.xlu0 %v736_v13, %s1859_s25 }
 0x12c   : > { %v678_v62 = vpop.permute.xlu1 %677  ;;  %v818_v59 = vpop.permute.xlu2 %817 }
 0x12d   : > { %v597_v26 = vpop.permute.xlu0 %596 }
 0x12e   : > { %v917_v39 = vsel %vm891_vm2, %v2168_v21, %v597_v26 }
 0x12f   : > { %v950_v13 = vsel %vm924_vm4, %v917_v39, %v678_v62 }
 0x130   : > { %v983_v0 = vsel %vm957_vm3, %v950_v13, %v715_v51 }
 0x132   : > { %704 = vrot.lane.b32.xlu2 %v1958_v45, %s1860_s26  ;;  %667 = vrot.lane.b32.xlu1 %v2186_v40, %s1857_s23  ;;  %v1400_v45 = vpop.f32.mrf.mxu1  ;;  %s1758_s23 = sshll.u32 %s2793_s12, 7 }
 0x133   : > { %886 = vrot.lane.b32.xlu0 %v855_v17, %s1861_s27 }
 0x134   : > { %v797_v5 = vpop.permute.xlu1 %796  ;;  %v680_v19 = vpop.permute.xlu2 %679 }
 0x135   : > { %v762_v56 = vpop.permute.xlu0 %761 }
 0x136   : > { %v1016_v21 = vsel %vm990_vm5, %v983_v0, %v762_v56 }
 0x137   : > { %v1049_v40 = vsel %vm1023_vm6, %v1016_v21, %v797_v5 }
 0x138   : > { %v1082_v2 = vsel %vm1056_vm7, %v1049_v40, %v834_v9 }
 0x13a   : > { %823 = vrot.lane.b32.xlu2 %v2025_v43, %s1862_s28  ;;  %786 = vrot.lane.b32.xlu1 %v2060_v22, %s1858_s24  ;;  %s2596_s24 = scalar_lea.vmem %s2787_s3, %s1758_s23  ;;  %v1402_v20 = vpop.f32.mrf.mxu1 }
 0x13b   : > { %751 = vrot.lane.b32.xlu0 %v2029_v50, %s1859_s25  ;;  %v1311_v51 = vpop.f32.mrf.mxu2  ;;  %v1828_v50 = vld [vmem:[%s1907_s19 + $0x30] sm:$0xff] }
 0x13c   : > { %v1312_v27 = vadd.f32 %v2580_v54, %v1311_v51  ;;  %v662_v34 = vpop.permute.xlu1 %661  ;;  %v901_v22 = vsel %vm891_vm2, %v1828_v50, %v2176_v47  ;;  %v799_v3 = vpop.permute.xlu2 %798 }
 0x13d   : > { %v881_v7 = vpop.permute.xlu0 %880  ;;  %v934_v9 = vsel %vm924_vm4, %v901_v22, %v662_v34 }
 0x13e   : > { %v1401_v6 = vadd.f32 %v1400_v45, %v1312_v27  ;;  %v1127_v43 = vsel %vm1089_vm8, %v1082_v2, %v881_v7  ;;  %v967_v46 = vsel %vm957_vm3, %v934_v9, %v699_v23 }
 0x13f   : > { %1330 = vmatmul.bf16.gmra.mxu2 %v1127_v43  ;;  %v1405_v43 = vpop.f32.mrf.mxu3 }
 0x140   : > { %v1456_v60 = vmax.f32 %v1401_v6, 0.0 }
 0x142   : > { %v1488_v29 = vpack.c.bf16 %v1456_v60, %v1456_v60 }
 0x143   : > { %870 = vrot.lane.b32.xlu0 %v2064_v8, %s1861_s27  ;;  %v1313_v30 = vpop.f32.mrf.mxu2 }
 0x144   : > { %1521 = vst.msk [vmem:[%s2596_s24 + $0x40] sm:$0xf] %vm1504_vm9, %v1488_v29  ;;  %v1314_v44 = vadd.f32 %v2580_v54, %v1313_v30  ;;  %v781_v52 = vpop.permute.xlu1 %780 }
 0x145   : > { %v1271_v31 = vpop.f32.mrf.mxu0  ;;  %v746_v4 = vpop.permute.xlu0 %745 }
 0x146   : > { %v1403_v41 = vadd.f32 %v1402_v20, %v1314_v44  ;;  %v1272_v47 = vadd.f32 %v2580_v54, %v1271_v31  ;;  %v1000_v62 = vsel %vm990_vm5, %v967_v46, %v746_v4  ;;  %v1829_v46 = vld [vmem:[%s1907_s19 + $0x3c] sm:$0xff] }
 0x147   : > { %v1033_v39 = vsel %vm1023_vm6, %v1000_v62, %v781_v52  ;;  %v1407_v4 = vpop.f32.mrf.mxu3 }
 0x148   : > { %v1457_v8 = vmax.f32 %v1403_v41, 0.0  ;;  %v1361_v24 = vadd.f32 %v2295_v12, %v1272_v47  ;;  %v1066_v0 = vsel %vm1056_vm7, %v1033_v39, %v818_v59  ;;  %v664_v12 = vpop.permute.xlu2 %663 }
 0x14a   : > { %v1489_v14 = vpack.c.bf16 %v1457_v8, %v1457_v8  ;;  %v1440_v26 = vmax.f32 %v1361_v24, 0.0 }
 0x14c   : > { %1522 = vst.msk [vmem:[%s2596_s24 + $0x44] sm:$0xf] %vm1504_vm9, %v1489_v14  ;;  %v1472_v17 = vpack.c.bf16 %v1440_v26, %v1440_v26  ;;  %v599_v13 = vpop.permute.xlu1 %598 }
 0x14d   : > { %v1273_v5 = vpop.f32.mrf.mxu0  ;;  %v865_v56 = vpop.permute.xlu0 %864  ;;  %v919_v40 = vsel %vm891_vm2, %v2242_v57, %v599_v13 }
 0x14e   : > { %1505 = vst.msk [vmem:[%s2596_s24] sm:$0xf] %vm1504_vm9, %v1472_v17  ;;  %v1274_v23 = vadd.f32 %v2580_v54, %v1273_v5  ;;  %v1103_v21 = vsel %vm1089_vm8, %v1066_v0, %v865_v56  ;;  %v952_v7 = vsel %vm924_vm4, %v919_v40, %v680_v19 }
 0x14f   : > { %1290 = vmatmul.bf16.gmra.mxu0 %v1103_v21 }
 0x150   : > { %v1363_v45 = vadd.f32 %v2311_v61, %v1274_v23  ;;  %v783_v6 = vpop.permute.xlu2 %782 }
 0x152   : > { %v1441_v51 = vmax.f32 %v1363_v45, 0.0 }
 0x154   : > { %v1473_v27 = vpack.c.bf16 %v1441_v51, %v1441_v51  ;;  %v764_v34 = vpop.permute.xlu1 %763 }
 0x155   : > { %v717_v2 = vpop.permute.xlu0 %716 }
 0x156   : > { %1506 = vst.msk [vmem:[%s2596_s24 + $0x4] sm:$0xf] %vm1504_vm9, %v1473_v27  ;;  %v985_v59 = vsel %vm957_vm3, %v952_v7, %v717_v2 }
 0x157   : > { %v1018_v60 = vsel %vm990_vm5, %v985_v59, %v764_v34 }
 0x158   : > { %v1051_v22 = vsel %vm1023_vm6, %v1018_v60, %v799_v3  ;;  %v601_v52 = vpop.permute.xlu2 %600  ;;  %v903_v3 = vsel %vm891_vm2, %v1829_v46, %v2194_v25 }
 0x159   : > { %v936_v24 = vsel %vm924_vm4, %v903_v3, %v664_v12  ;;  %v921_v59 = vsel %vm891_vm2, %v2327_v18, %v601_v52 }
 0x15b   : > { %v1316_v50 = vpop.f32.mrf.mxu2 }
 0x15c   : > { %v1317_v61 = vadd.f32 %v2580_v54, %v1316_v50  ;;  %v883_v57 = vpop.permute.xlu1 %882 }
 0x15d   : > { %v836_v29 = vpop.permute.xlu0 %835 }
 0x15e   : > { %v1406_v9 = vadd.f32 %v1405_v43, %v1317_v61  ;;  %v1084_v19 = vsel %vm1056_vm7, %v1051_v22, %v836_v29  ;;  %v1410_v61 = vpop.f32.mrf.mxu3 }
 0x15f   : > { %v1130_v30 = vsel %vm1089_vm8, %v1084_v19, %v883_v57 }
 0x160   : > { %v1458_v20 = vmax.f32 %v1406_v9, 0.0  ;;  %1335 = vmatmul.bf16.gmra.mxu2 %v1130_v30  ;;  %v766_v21 = vpop.permute.xlu2 %765 }
 0x162   : > { %v1490_v44 = vpack.c.bf16 %v1458_v20, %v1458_v20 }
 0x163   : > { %v1318_v31 = vpop.f32.mrf.mxu2 }
 0x164   : > { %1523 = vst.msk [vmem:[%s2596_s24 + $0x48] sm:$0xf] %vm1504_vm9, %v1490_v44  ;;  %v1319_v41 = vadd.f32 %v2580_v54, %v1318_v31  ;;  %v748_v47 = vpop.permute.xlu1 %747 }
 0x165   : > { %v1276_v62 = vpop.f32.mrf.mxu0  ;;  %v701_v8 = vpop.permute.xlu0 %700 }
 0x166   : > { %v1408_v14 = vadd.f32 %v1407_v4, %v1319_v41  ;;  %v1277_v26 = vadd.f32 %v2580_v54, %v1276_v62  ;;  %v969_v39 = vsel %vm957_vm3, %v936_v24, %v701_v8  ;;  %v1830_v24 = vld [vmem:[%s1907_s19 + $0x48] sm:$0xff] }
 0x167   : > { %v1002_v0 = vsel %vm990_vm5, %v969_v39, %v748_v47  ;;  %v1412_v47 = vpop.f32.mrf.mxu3 }
 0x168   : > { %v1459_v17 = vmax.f32 %v1408_v14, 0.0  ;;  %v1366_v13 = vadd.f32 %v2329_v37, %v1277_v26  ;;  %v1035_v12 = vsel %vm1023_vm6, %v1002_v0, %v783_v6  ;;  %v885_v60 = vpop.permute.xlu2 %884  ;;  %v905_v14 = vsel %vm891_vm2, %v1830_v24, %v2272_v38 }
 0x16a   : > { %v1491_v5 = vpack.c.bf16 %v1459_v17, %v1459_v17  ;;  %v1442_v56 = vmax.f32 %v1366_v13, 0.0  ;;  %v888_v17 = vrot.slane %v2540_v1, 1 }
 0x16c   : > { %1524 = vst.msk [vmem:[%s2596_s24 + $0x4c] sm:$0xf] %vm1504_vm9, %v1491_v5  ;;  %v1474_v25 = vpack.c.bf16 %v1442_v56, %v1442_v56  ;;  %v867_v23 = vpop.permute.xlu1 %866  ;;  %v889_v5 = vrot.slane %v2549_v10, 1 }
 0x16d   : > { %v1278_v45 = vpop.f32.mrf.mxu0  ;;  %v820_v40 = vpop.permute.xlu0 %819 }
 0x16e   : > { %1507 = vst.msk [vmem:[%s2596_s24 + $0x8] sm:$0xf] %vm1504_vm9, %v1474_v25  ;;  %v1279_v51 = vadd.f32 %v2580_v54, %v1278_v45  ;;  %v1068_v37 = vsel %vm1056_vm7, %v1035_v12, %v820_v40  ;;  %v890_v25 = vsel %vm604_vm1, %v888_v17, %v889_v5  ;;  %v1831_v17 = vld [vmem:[%s1907_s19 + $0x54] sm:$0xff] }
 0x16f   : > { %v1106_v27 = vsel %vm1089_vm8, %v1068_v37, %v867_v23  ;;  %1755 = vmatmul.msk.bf16.gmra.mxu3 %vm891_vm2, %v890_v25 }
 0x170   : > { %v1368_v34 = vadd.f32 %v2346_v63, %v1279_v51  ;;  %1295 = vmatmul.bf16.gmra.mxu0 %v1106_v27  ;;  %v750_v31 = vpop.permute.xlu2 %749 }
 0x172   : > { %v1443_v7 = vmax.f32 %v1368_v34, 0.0 }
 0x174   : > { %v1475_v2 = vpack.c.bf16 %v1443_v7, %v1443_v7  ;;  %v719_v43 = vpop.permute.xlu1 %718 }
 0x175   : > { %v682_v6 = vpop.permute.xlu0 %681 }
 0x176   : > { %1508 = vst.msk [vmem:[%s2596_s24 + $0xc] sm:$0xf] %vm1504_vm9, %v1475_v2  ;;  %v954_v50 = vsel %vm924_vm4, %v921_v59, %v682_v6 }
 0x177   : > { %v987_v57 = vsel %vm957_vm3, %v954_v50, %v719_v43 }
 0x178   : > { %v1020_v9 = vsel %vm990_vm5, %v987_v57, %v766_v21  ;;  %v869_v38 = vpop.permute.xlu2 %868 }
 0x17b   : > { %v1321_v22 = vpop.f32.mrf.mxu2 }
 0x17c   : > { %v1322_v63 = vadd.f32 %v2580_v54, %v1321_v22  ;;  %v838_v29 = vpop.permute.xlu1 %837 }
 0x17d   : > { %v801_v19 = vpop.permute.xlu0 %800 }
 0x17e   : > { %v1411_v18 = vadd.f32 %v1410_v61, %v1322_v63  ;;  %v1053_v30 = vsel %vm1023_vm6, %v1020_v9, %v801_v19  ;;  %v1415_v61 = vpop.f32.mrf.mxu3 }
 0x17f   : > { %v1086_v20 = vsel %vm1056_vm7, %v1053_v30, %v838_v29 }
 0x180   : > { %v1460_v44 = vmax.f32 %v1411_v18, 0.0  ;;  %v1133_v52 = vsel %vm1089_vm8, %v1086_v20, %v885_v60  ;;  %v721_v6 = vpop.permute.xlu2 %720 }
 0x181   : > { %1340 = vmatmul.bf16.gmra.mxu2 %v1133_v52 }
 0x182   : > { %v1492_v4 = vpack.c.bf16 %v1460_v44, %v1460_v44 }
 0x183   : > { %v1323_v41 = vpop.f32.mrf.mxu2 }
 0x184   : > { %1525 = vst.msk [vmem:[%s2596_s24 + $0x50] sm:$0xf] %vm1504_vm9, %v1492_v4  ;;  %v1324_v46 = vadd.f32 %v2580_v54, %v1323_v41  ;;  %v703_v3 = vpop.permute.xlu1 %702 }
 0x185   : > { %v1281_v62 = vpop.f32.mrf.mxu0  ;;  %v666_v8 = vpop.permute.xlu0 %665 }
 0x186   : > { %v1413_v26 = vadd.f32 %v1412_v47, %v1324_v46  ;;  %v1282_v39 = vadd.f32 %v2580_v54, %v1281_v62  ;;  %v938_v13 = vsel %vm924_vm4, %v905_v14, %v666_v8 }
 0x187   : > { %v971_v12 = vsel %vm957_vm3, %v938_v13, %v703_v3  ;;  %v907_v13 = vsel %vm891_vm2, %v1831_v17, %v2270_v36 }
 0x188   : > { %v1461_v56 = vmax.f32 %v1413_v26, 0.0  ;;  %v1371_v0 = vadd.f32 %v2368_v28, %v1282_v39  ;;  %v1004_v40 = vsel %vm990_vm5, %v971_v12, %v750_v31  ;;  %v840_v19 = vpop.permute.xlu2 %839  ;;  %v1417_v31 = vpop.f32.mrf.mxu3 }
 0x18a   : > { %v1493_v23 = vpack.c.bf16 %v1461_v56, %v1461_v56  ;;  %v1444_v21 = vmax.f32 %v1371_v0, 0.0 }
 0x18c   : > { %1526 = vst.msk [vmem:[%s2596_s24 + $0x54] sm:$0xf] %vm1504_vm9, %v1493_v23  ;;  %v1476_v1 = vpack.c.bf16 %v1444_v21, %v1444_v21  ;;  %v822_v45 = vpop.permute.xlu1 %821 }
 0x18d   : > { %v1283_v10 = vpop.f32.mrf.mxu0  ;;  %v785_v51 = vpop.permute.xlu0 %784 }
 0x18e   : > { %1509 = vst.msk [vmem:[%s2596_s24 + $0x10] sm:$0xf] %vm1504_vm9, %v1476_v1  ;;  %v1284_v28 = vadd.f32 %v2580_v54, %v1283_v10  ;;  %v1037_v37 = vsel %vm1023_vm6, %v1004_v40, %v785_v51 }
 0x18f   : > { %v1070_v27 = vsel %vm1056_vm7, %v1037_v37, %v822_v45 }
 0x190   : > { %v1373_v34 = vadd.f32 %v2384_v15, %v1284_v28  ;;  %v1109_v7 = vsel %vm1089_vm8, %v1070_v27, %v869_v38  ;;  %v705_v14 = vpop.permute.xlu2 %704 }
 0x191   : > { %1300 = vmatmul.bf16.gmra.mxu0 %v1109_v7 }
 0x192   : > { %v1445_v2 = vmax.f32 %v1373_v34, 0.0  ;;  %v1420_v34 = vpop.f32.mrf.mxu3 }
 0x194   : > { %v1477_v59 = vpack.c.bf16 %v1445_v2, %v1445_v2  ;;  %v684_v43 = vpop.permute.xlu1 %683 }
 0x195   : > { %v603_v60 = vpop.permute.xlu0 %602 }
 0x196   : > { %1510 = vst.msk [vmem:[%s2596_s24 + $0x14] sm:$0xf] %vm1504_vm9, %v1477_v59  ;;  %v923_v50 = vsel %vm891_vm2, %v2399_v53, %v603_v60 }
 0x197   : > { %v956_v57 = vsel %vm924_vm4, %v923_v50, %v684_v43 }
 0x198   : > { %v989_v9 = vsel %vm957_vm3, %v956_v57, %v721_v6  ;;  %v824_v40 = vpop.permute.xlu2 %823 }
 0x19a   : > { %v1422_v60 = vpop.f32.mrf.mxu3 }
 0x19c   : > { %v1326_v22 = vpop.f32.mrf.mxu2  ;;  %v803_v63 = vpop.permute.xlu1 %802 }
 0x19d   : > { %v1327_v15 = vadd.f32 %v2580_v54, %v1326_v22  ;;  %v768_v29 = vpop.permute.xlu0 %767 }
 0x19e   : > { %v1022_v18 = vsel %vm990_vm5, %v989_v9, %v768_v29 }
 0x19f   : > { %v1416_v30 = vadd.f32 %v1415_v61, %v1327_v15  ;;  %v1055_v44 = vsel %vm1023_vm6, %v1022_v18, %v803_v63 }
 0x1a0   : > { %v1088_v4 = vsel %vm1056_vm7, %v1055_v44, %v840_v19 }
 0x1a1   : > { %v1462_v20 = vmax.f32 %v1416_v30, 0.0 }
 0x1a3   : > { %v1494_v52 = vpack.c.bf16 %v1462_v20, %v1462_v20 }
 0x1a4   : > { %v1328_v53 = vpop.f32.mrf.mxu2  ;;  %v668_v47 = vpop.permute.xlu1 %667 }
 0x1a5   : > { %1527 = vst.msk [vmem:[%s2596_s24 + $0x58] sm:$0xf] %vm1504_vm9, %v1494_v52  ;;  %v1329_v41 = vadd.f32 %v2580_v54, %v1328_v53  ;;  %v887_v46 = vpop.permute.xlu0 %886  ;;  %v940_v5 = vsel %vm924_vm4, %v907_v13, %v668_v47  ;;  %v1425_v53 = vpop.f32.mrf.mxu3 }
 0x1a6   : > { %v1286_v3 = vpop.f32.mrf.mxu0  ;;  %v1136_v62 = vsel %vm1089_vm8, %v1088_v4, %v887_v46  ;;  %v973_v21 = vsel %vm957_vm3, %v940_v5, %v705_v14 }
 0x1a7   : > { %v1418_v8 = vadd.f32 %v1417_v31, %v1329_v41  ;;  %v1287_v24 = vadd.f32 %v2580_v54, %v1286_v3  ;;  %1345 = vmatmul.bf16.gmra.mxu2 %v1136_v62 }
 0x1a9   : > { %v1463_v26 = vmax.f32 %v1418_v8, 0.0  ;;  %v1376_v39 = vadd.f32 %v2401_v58, %v1287_v24 }
 0x1ab   : > { %v1495_v56 = vpack.c.bf16 %v1463_v26, %v1463_v26  ;;  %v1446_v0 = vmax.f32 %v1376_v39, 0.0 }
 0x1ac   : > { %v787_v38 = vpop.permute.xlu1 %786 }
 0x1ad   : > { %1528 = vst.msk [vmem:[%s2596_s24 + $0x5c] sm:$0xf] %vm1504_vm9, %v1495_v56  ;;  %v1478_v25 = vpack.c.bf16 %v1446_v0, %v1446_v0  ;;  %v752_v23 = vpop.permute.xlu0 %751  ;;  %v1427_v3 = vpop.f32.mrf.mxu3 }
 0x1ae   : > { %v1288_v12 = vpop.f32.mrf.mxu0  ;;  %v1006_v58 = vsel %vm990_vm5, %v973_v21, %v752_v23 }
 0x1af   : > { %1511 = vst.msk [vmem:[%s2596_s24 + $0x18] sm:$0xf] %vm1504_vm9, %v1478_v25  ;;  %v1289_v1 = vadd.f32 %v2580_v54, %v1288_v12  ;;  %v1039_v45 = vsel %vm1023_vm6, %v1006_v58, %v787_v38 }
 0x1b0   : > { %v1072_v28 = vsel %vm1056_vm7, %v1039_v45, %v824_v40 }
 0x1b1   : > { %v1378_v36 = vadd.f32 %v2419_v42, %v1289_v1 }
 0x1b3   : > { %v1447_v10 = vmax.f32 %v1378_v36, 0.0 }
 0x1b5   : > { %v1479_v51 = vpack.c.bf16 %v1447_v10, %v1447_v10  ;;  %v871_v37 = vpop.permute.xlu0 %870  ;;  %v1430_v21 = vpop.f32.mrf.mxu3 }
 0x1b6   : > { %v1112_v27 = vsel %vm1089_vm8, %v1072_v28, %v871_v37 }
 0x1b7   : > { %1512 = vst.msk [vmem:[%s2596_s24 + $0x1c] sm:$0xf] %vm1504_vm9, %v1479_v51  ;;  %1305 = vmatmul.bf16.gmra.mxu0 %v1112_v27 }
 0x1bd   : > { %v1432_v45 = vpop.f32.mrf.mxu3 }
 0x1c2   : > { %v1331_v7 = vpop.f32.mrf.mxu2 }
 0x1c3   : > { %v1332_v2 = vadd.f32 %v2580_v54, %v1331_v7 }
 0x1c5   : > { %v1421_v42 = vadd.f32 %v1420_v34, %v1332_v2 }
 0x1c7   : > { %v1464_v59 = vmax.f32 %v1421_v42, 0.0 }
 0x1c9   : > { %v1496_v43 = vpack.c.bf16 %v1464_v59, %v1464_v59 }
 0x1ca   : > { %v1333_v6 = vpop.f32.mrf.mxu2 }
 0x1cb   : > { %1529 = vst.msk [vmem:[%s2596_s24 + $0x60] sm:$0xf] %vm1504_vm9, %v1496_v43  ;;  %v1334_v50 = vadd.f32 %v2580_v54, %v1333_v6 }
 0x1cc   : > { %v1291_v61 = vpop.f32.mrf.mxu0 }
 0x1cd   : > { %v1292_v57 = vadd.f32 %v2580_v54, %v1291_v61  ;;  %v1423_v22 = vadd.f32 %v1422_v60, %v1334_v50 }
 0x1cf   : > { %v1381_v63 = vadd.f32 %v2439_v32, %v1292_v57  ;;  %v1465_v15 = vmax.f32 %v1423_v22, 0.0 }
 0x1d1   : > { %v1448_v29 = vmax.f32 %v1381_v63, 0.0  ;;  %v1497_v9 = vpack.c.bf16 %v1465_v15, %v1465_v15 }
 0x1d3   : > { %v1480_v19 = vpack.c.bf16 %v1448_v29, %v1448_v29  ;;  %1530 = vst.msk [vmem:[%s2596_s24 + $0x64] sm:$0xf] %vm1504_vm9, %v1497_v9 }
 0x1d4   : > { %v1293_v18 = vpop.f32.mrf.mxu0 }
 0x1d5   : > { %1513 = vst.msk [vmem:[%s2596_s24 + $0x20] sm:$0xf] %vm1504_vm9, %v1480_v19  ;;  %v1294_v30 = vadd.f32 %v2580_v54, %v1293_v18 }
 0x1d7   : > { %v1383_v20 = vadd.f32 %v2463_v11, %v1294_v30 }
 0x1d9   : > { %v1449_v44 = vmax.f32 %v1383_v20, 0.0 }
 0x1db   : > { %v1481_v52 = vpack.c.bf16 %v1449_v44, %v1449_v44 }
 0x1dd   : > { %1514 = vst.msk [vmem:[%s2596_s24 + $0x24] sm:$0xf] %vm1504_vm9, %v1481_v52 }
 0x1e3   : > { %v1336_v32 = vpop.f32.mrf.mxu2 }
 0x1e4   : > { %v1337_v31 = vadd.f32 %v2580_v54, %v1336_v32 }
 0x1e6   : > { %v1426_v4 = vadd.f32 %v1425_v53, %v1337_v31 }
 0x1e8   : > { %v1466_v41 = vmax.f32 %v1426_v4, 0.0 }
 0x1ea   : > { %v1498_v47 = vpack.c.bf16 %v1466_v41, %v1466_v41 }
 0x1eb   : > { %v1338_v46 = vpop.f32.mrf.mxu2 }
 0x1ec   : > { %1531 = vst.msk [vmem:[%s2596_s24 + $0x68] sm:$0xf] %vm1504_vm9, %v1498_v47  ;;  %v1339_v62 = vadd.f32 %v2580_v54, %v1338_v46 }
 0x1ed   : > { %v1296_v11 = vpop.f32.mrf.mxu0 }
 0x1ee   : > { %v1297_v8 = vadd.f32 %v2580_v54, %v1296_v11  ;;  %v1428_v24 = vadd.f32 %v1427_v3, %v1339_v62 }
 0x1f0   : > { %v1386_v14 = vadd.f32 %v2481_v48, %v1297_v8  ;;  %v1467_v26 = vmax.f32 %v1428_v24, 0.0 }
 0x1f2   : > { %v1450_v39 = vmax.f32 %v1386_v14, 0.0  ;;  %v1499_v17 = vpack.c.bf16 %v1467_v26, %v1467_v26  ;;  %v1435_v60 = vpop.f32.mrf.mxu3 }
 0x1f4   : > { %v1482_v13 = vpack.c.bf16 %v1450_v39, %v1450_v39  ;;  %1532 = vst.msk [vmem:[%s2596_s24 + $0x6c] sm:$0xf] %vm1504_vm9, %v1499_v17 }
 0x1f5   : > { %v1298_v5 = vpop.f32.mrf.mxu0 }
 0x1f6   : > { %1515 = vst.msk [vmem:[%s2596_s24 + $0x28] sm:$0xf] %vm1504_vm9, %v1482_v13  ;;  %v1299_v56 = vadd.f32 %v2580_v54, %v1298_v5 }
 0x1f8   : > { %v1388_v0 = vadd.f32 %v2500_v49, %v1299_v56 }
 0x1fa   : > { %v1451_v25 = vmax.f32 %v1388_v0, 0.0  ;;  %v1437_v15 = vpop.f32.mrf.mxu3 }
 0x1fc   : > { %v1483_v23 = vpack.c.bf16 %v1451_v25, %v1451_v25 }
 0x1fe   : > { %1516 = vst.msk [vmem:[%s2596_s24 + $0x2c] sm:$0xf] %vm1504_vm9, %v1483_v23 }
 0x204   : > { %v1341_v48 = vpop.f32.mrf.mxu2 }
 0x205   : > { %v1342_v12 = vadd.f32 %v2580_v54, %v1341_v48 }
 0x207   : > { %v1431_v58 = vadd.f32 %v1430_v21, %v1342_v12 }
 0x209   : > { %v1468_v38 = vmax.f32 %v1431_v58, 0.0 }
 0x20b   : > { %v1500_v1 = vpack.c.bf16 %v1468_v38, %v1468_v38 }
 0x20c   : > { %v1343_v36 = vpop.f32.mrf.mxu2 }
 0x20d   : > { %1533 = vst.msk [vmem:[%s2596_s24 + $0x70] sm:$0xf] %vm1504_vm9, %v1500_v1  ;;  %v1344_v40 = vadd.f32 %v2580_v54, %v1343_v36 }
 0x20e   : > { %v1301_v49 = vpop.f32.mrf.mxu0 }
 0x20f   : > { %v1302_v10 = vadd.f32 %v2580_v54, %v1301_v49  ;;  %v1433_v51 = vadd.f32 %v1432_v45, %v1344_v40 }
 0x211   : > { %v1391_v28 = vadd.f32 %v2513_v16, %v1302_v10  ;;  %v1469_v37 = vmax.f32 %v1433_v51, 0.0 }
 0x213   : > { %v1452_v27 = vmax.f32 %v1391_v28, 0.0  ;;  %v1501_v34 = vpack.c.bf16 %v1469_v37, %v1469_v37 }
 0x215   : > { %v1484_v7 = vpack.c.bf16 %v1452_v27, %v1452_v27  ;;  %1534 = vst.msk [vmem:[%s2596_s24 + $0x74] sm:$0xf] %vm1504_vm9, %v1501_v34 }
 0x216   : > { %v1303_v2 = vpop.f32.mrf.mxu0 }
 0x217   : > { %1517 = vst.msk [vmem:[%s2596_s24 + $0x30] sm:$0xf] %vm1504_vm9, %v1484_v7  ;;  %v1304_v42 = vadd.f32 %v2580_v54, %v1303_v2 }
 0x219   : > { %v1393_v59 = vadd.f32 %v2532_v55, %v1304_v42 }
 0x21b   : > { %v1453_v43 = vmax.f32 %v1393_v59, 0.0 }
 0x21d   : > { %v1485_v6 = vpack.c.bf16 %v1453_v43, %v1453_v43 }
 0x21f   : > { %1518 = vst.msk [vmem:[%s2596_s24 + $0x34] sm:$0xf] %vm1504_vm9, %v1485_v6 }
 0x22a   : > { %v1346_v16 = vpop.f32.mrf.mxu2 }
 0x22b   : > { %v1347_v50 = vadd.f32 %v2580_v54, %v1346_v16 }
 0x22d   : > { %v1436_v61 = vadd.f32 %v1435_v60, %v1347_v50 }
 0x22f   : > { %v1470_v57 = vmax.f32 %v1436_v61, 0.0 }
 0x231   : > { %v1502_v22 = vpack.c.bf16 %v1470_v57, %v1470_v57 }
 0x232   : > { %v1348_v63 = vpop.f32.mrf.mxu2 }
 0x233   : > { %1535 = vst.msk [vmem:[%s2596_s24 + $0x78] sm:$0xf] %vm1504_vm9, %v1502_v22  ;;  %v1349_v29 = vadd.f32 %v2580_v54, %v1348_v63 }
 0x234   : > { %v1306_v55 = vpop.f32.mrf.mxu0 }
 0x235   : > { %v1307_v9 = vadd.f32 %v2580_v54, %v1306_v55  ;;  %v1438_v19 = vadd.f32 %v1437_v15, %v1349_v29 }
 0x237   : > { %v1396_v18 = vadd.f32 %v2553_v33, %v1307_v9  ;;  %v1471_v30 = vmax.f32 %v1438_v19, 0.0 }
 0x239   : > { %v1454_v20 = vmax.f32 %v1396_v18, 0.0  ;;  %v1503_v44 = vpack.c.bf16 %v1471_v30, %v1471_v30 }
 0x23b   : > { %v1486_v52 = vpack.c.bf16 %v1454_v20, %v1454_v20  ;;  %1536 = vst.msk [vmem:[%s2596_s24 + $0x7c] sm:$0xf] %vm1504_vm9, %v1503_v44 }
 0x23c   : > { %v1308_v53 = vpop.f32.mrf.mxu0 }
 0x23d   : > { %1519 = vst.msk [vmem:[%s2596_s24 + $0x38] sm:$0xf] %vm1504_vm9, %v1486_v52  ;;  %v1309_v32 = vadd.f32 %v2580_v54, %v1308_v53 }
 0x23f   : > { %v1398_v31 = vadd.f32 %v2564_v35, %v1309_v32 }
 0x241   : > { %v1455_v4 = vmax.f32 %v1398_v31, 0.0 }
 0x243   : > { %v1487_v41 = vpack.c.bf16 %v1455_v4, %v1455_v4 }
 0x245   : > { %1520 = vst.msk [vmem:[%s2596_s24 + $0x3c] sm:$0xf] %vm1504_vm9, %v1487_v41 }
 0x246 PF: > { %s13_s14 = sadd.s32 1, %s1854_s14   ;;  %s2788_s12 = smov %s1850_s13 }
 0x247   : > { %p10_p5 = scmp.ge.s32.totalorder %s13_s14, 4   ;;  %s2789_s13 = smov %s2791_s15 }
 0x249   :  { %12 = sbr.rel (!%p10_p5) target bundleno = 2 (0x2), region = 62 }

// kernel: _lambda_.9
= control target key start
LH: loop header
LB: loop body
LE: loop exit
PB: predicated region body
PF: predicated region fallthrough
CT: control target
= control target key end

     0   :  { %s3157_s0 = inlined_call_operand.vmem [shape: bf16[2,18,18,16], index: 0, kind: input, shape index: {}]   ;;  %s3158_s1 = inlined_call_operand.vmem [shape: bf16[1,144,1], index: 1, kind: input, shape index: {}]   ;;  %s3159_s2 = inlined_call_operand.<no memory space> [shape: f32[1,1], index: 2, kind: input, shape index: {}]   ;;  %s3160_s3 = inlined_call_operand.hbm [shape: f32[2,16,16], index: 3, kind: output, shape index: {}]  }
   0x1   :  { %v8_v0 = vstv %s3159_s2 }
   0x2   :  { %9 = vst [vmem:[#allocation2] sm:$0x1] %v8_v0 }
   0x3   :  { %10 = vsyncpa [#allocation4], 0 }
   0x4   :  { %12 = vsyncpa [#allocation4 + $0x1], 0  ;;  %s2082_s14 = smov 0   ;;  %s2084_s15 = smov 0  }
   0x5   :  { %s2086_s16 = smov 0   ;;  %s2088_s17 = smov 0  }
   0x6   :  { %s2090_s18 = smov 0   ;;  %s2092_s19 = smov 0  }
   0x7 LB: > { %s1726_s2 = sadd.s32 4294967295, %s2047_s19   ;;  %s1727_s20 = sadd.s32 4294967294, %s2047_s19   ;;  %s2047_s19 = sphi %s2092_s19, %s18_s19   ;;  %s2043_s18 = sphi %s2090_s18, %s3179_s18   ;;  %s2039_s17 = sphi %s2088_s17, %s3178_s17   ;;  %s2035_s16 = sphi %s2086_s16, %s3177_s16   ;;  %s2031_s15 = sphi %s2084_s15, %s3176_s15   ;;  %s2027_s14 = sphi %s2082_s14, %s3175_s14  }
   0x8   : > { %s30_s21 = sadd.s32 1, %s2043_s18  ;;  %s107_s22 = sadd.s32 1, %s2035_s16 }
   0x9   : > { %p32_p0 = scmp.ge.s32.totalorder %s30_s21, 2  ;;  %p117_p1 = scmp.ne.s32.totalorder %s2035_s16, %s2031_s15 }
   0xa   : > { %p118_p2 = scmp.eq.s32.totalorder %s1726_s2, 1  ;;  %p123_p3 = scmp.ne.s32.totalorder %s2031_s15, %s2027_s14 }
   0xb   : > { %s3181_s21 = smov (%p32_p0, %s30_s21), 0  ;;  %p124_p5 = scmp.eq.s32.totalorder %s1727_s20, 1 }
   0xc   : > { %p2122_p4 = por %p118_p2, %p117_p1  ;;  %s102_s24 = ssub.s32 %s2043_s18, %s3181_s21 }
   0xd   : > { %p1730_p6 = scmp.ge.s32.totalorder %s2047_s19, 1  ;;  %p105_p7 = scmp.eq.s32.totalorder %s102_s24, 0 }
   0xe   : > { %p2129_p8 = por %p124_p5, %p123_p3  ;;  %p156_p9 = scmp.lt.s32.totalorder %s2047_s19, 3 }
   0xf   : > { %s2135_s26 = scalar_select %p105_p7, %s2035_s16, %s107_s22  }
  0x10   : > { %p157_p10 = pnand %p1730_p6, %p156_p9 }
  0x12   : > { %160 = sbr.rel (%p157_p10) target bundleno = 715 (0x2cb), region = 32 }
  0x17   : > { %p180_p11 = scmp.lt.s32.totalorder %s2039_s17, 1  ;;  %vm369_vm0 = vsmask.f32 7424  ;;  %s2049_s5 = smov 16   ;;  %vm594_vm1 = vcmask 1046528   ;;  %vm914_vm2 = vcmask 261120  }
  0x18   : > { %s2050_s6 = smov 32   ;;  %s2051_s7 = smov 48   ;;  %vm881_vm3 = vcmask 130048   ;;  %vm947_vm4 = vcmask 392192   ;;  %vm980_vm5 = vcmask 523264   ;;  %vm1013_vm6 = vcmask 654336  }
  0x19   : > { %s181_s27 = scalar_select %p180_p11, %s2039_s17, 1  ;;  %vm1046_vm7 = vcmask 785408   ;;  %vm1079_vm8 = vcmask 916480   ;;  %vm1563_vm9 = vcmask 130112   ;;  %vm1610_vm10 = vcmask 1041409  }
  0x1a   : > { %s2052_s8 = smov 64   ;;  %s2053_s11 = smov 80   ;;  %vm1612_vm11 = vcmask 1042434   ;;  %vm1614_vm12 = vcmask 1043459   ;;  %vm1616_vm13 = vcmask 1044484   ;;  %vm1618_vm14 = vcmask 1045509  }
  0x1b   : > { %s1899_s28 = smul.u32 216, %s181_s27  ;;  %s2054_s12 = smov 112   ;;  %vm1620_vm15 = vcmask 1046534  }
  0x1c   : > { %s2055_s13 = smov 96   ;;  %s1989_s9 = scalar_lea.hbm %s3160_s3, 32 }
  0x1d   : > { %s2142_s4 = scalar_lea.vmem %s3157_s0, %s1899_s28 }
  0x1e   : > { %v2145_v1 = vld [vmem:[%s2142_s4 + $0x30] sm:$0xff]  ;;  %v201_v2 = vld [vmem:[%s2142_s4 + $0x38] sm:$0x1]  ;;  %v195_v5 = vld [vmem:[%s2142_s4 + $0x20] sm:$0x1] }
  0x1f   : > { %v2149_v3 = vld [vmem:[%s2142_s4 + $0x18] sm:$0xff]  ;;  %v341_v4 = vunpack.c.l.b16 %v201_v2  ;;  %v2153_v6 = vld [vmem:[%s2142_s4] sm:$0xff]  ;;  %v189_v7 = vld [vmem:[%s2142_s4 + $0x8] sm:$0x1]  ;;  %v419_v8 = vshrl.u32 %v2145_v1, 16  ;;  %v421_v9 = vshll.u32 %v2145_v1, 16  ;;  %v339_v10 = vunpack.c.l.b16 %v195_v5 }
  0x20   : > { %v395_v11 = vshrl.u32 %v2149_v3, 16  ;;  %v204_v12 = vld [vmem:[%s2142_s4 + $0x44] sm:$0x1]  ;;  %v397_v14 = vshll.u32 %v2149_v3, 16  ;;  %v337_v15 = vunpack.c.l.b16 %v189_v7  ;;  %v371_v16 = vshrl.u32 %v2153_v6, 16  ;;  %v2165_v17 = vld [vmem:[%s2142_s4 + $0x3c] sm:$0xff] }
  0x21   : > { %v2160_v13 = vpack.c.b16 %v341_v4, %v341_v4  ;;  %v423_v18 = vrot.slane %v421_v9, 1  ;;  %v2167_v19 = vpack.c.b16 %v339_v10, %v339_v10  ;;  %v373_v20 = vshll.u32 %v2153_v6, 16  ;;  %v198_v26 = vld [vmem:[%s2142_s4 + $0x2c] sm:$0x1]  ;;  %v2179_v31 = vld [vmem:[%s2142_s4 + $0x24] sm:$0xff]  ;;  %v2212_v60 = vld [vmem:[%s2142_s4 + $0x54] sm:$0xff] }
  0x22   : > { %v342_v21 = vunpack.c.l.b16 %v204_v12  ;;  %v399_v23 = vrot.slane %v397_v14, 1  ;;  %v2171_v24 = vpack.c.b16 %v337_v15, %v337_v15  ;;  %v431_v25 = vshrl.u32 %v2165_v17, 16  ;;  %v2185_v40 = vld [vmem:[%s2142_s4 + $0xc] sm:$0xff]  ;;  %v192_v41 = vld [vmem:[%s2142_s4 + $0x14] sm:$0x1]  ;;  %v2193_v46 = vld [vmem:[%s2142_s4 + $0x60] sm:$0xff] }
  0x23   : > { %v426_v22 = vshll.u32 %v2160_v13, 16  ;;  %v424_v27 = vor.u32 %v423_v18, %v419_v8  ;;  %v402_v28 = vshll.u32 %v2167_v19, 16  ;;  %v375_v29 = vrot.slane %v373_v20, 1  ;;  %v213_v47 = vld [vmem:[%s2142_s4 + $0x68] sm:$0x1]  ;;  %3167 = vst [vmem:[#allocation6_spill] sm:$0xff] %v2212_v60 }
  0x24   : > { %v2176_v30 = vpack.c.b16 %v342_v21, %v342_v21  ;;  %v400_v33 = vor.u32 %v399_v23, %v395_v11  ;;  %v378_v34 = vshll.u32 %v2171_v24, 16  ;;  %v433_v35 = vshll.u32 %v2165_v17, 16  ;;  %v210_v61 = vld [vmem:[%s2142_s4 + $0x5c] sm:$0x1]  ;;  %v2225_v9 = vld [vmem:[%s2142_s4 + $0x48] sm:$0xff] }
  0x25   : > { %v428_v32 = vrot.slane %v426_v22, 1  ;;  %v404_v36 = vrot.slane %v402_v28, 1  ;;  %v376_v37 = vor.u32 %v375_v29, %v371_v16  ;;  %v340_v39 = vunpack.c.l.b16 %v198_v26  ;;  %v207_v10 = vld [vmem:[%s2142_s4 + $0x50] sm:$0x1]  ;;  %v222_v22 = vld [vmem:[%s2142_s4 + $0x8c] sm:$0x1] }
  0x26   : > { %v438_v38 = vshll.u32 %v2176_v30, 16  ;;  %v380_v43 = vrot.slane %v378_v34, 1  ;;  %v435_v44 = vrot.slane %v433_v35, 1  ;;  %v407_v45 = vshrl.u32 %v2179_v31, 16  ;;  %v2239_v28 = vld [vmem:[%s2142_s4 + $0x84] sm:$0xff]  ;;  %v2246_v35 = vld [vmem:[%s2142_s4 + $0x78] sm:$0xff] }
  0x27   : > { %v2189_v42 = vsel %vm369_vm0, %v424_v27, %v428_v32  ;;  %v2199_v48 = vsel %vm369_vm0, %v400_v33, %v404_v36  ;;  %v2201_v50 = vpack.c.b16 %v340_v39, %v340_v39  ;;  %v409_v51 = vshll.u32 %v2179_v31, 16 }
  0x28   : > { %570 = vrot.lane.b32.xlu2 %v2189_v42, %s2049_s5  ;;  %v440_v49 = vrot.slane %v438_v38, 1  ;;  %566 = vrot.lane.b32.xlu1 %v2199_v48, %s2049_s5  ;;  %v381_v52 = vsel %vm369_vm0, %v376_v37, %v380_v43  ;;  %v436_v53 = vor.u32 %v435_v44, %v431_v25  ;;  %v338_v54 = vunpack.c.l.b16 %v192_v41  ;;  %v219_v41 = vld [vmem:[%s2142_s4 + $0x80] sm:$0x1] }
  0x29   : > { %v383_v55 = vshrl.u32 %v2185_v40, 16  ;;  %562 = vrot.lane.b32.xlu0 %v381_v52, %s2049_s5  ;;  %v411_v56 = vrot.slane %v409_v51, 1  ;;  %v414_v57 = vshll.u32 %v2201_v50, 16  ;;  %v385_v58 = vshll.u32 %v2185_v40, 16 }
  0x2a   : > { %v345_v59 = vunpack.c.l.b16 %v213_v47  ;;  %v2216_v62 = vsel %vm369_vm0, %v436_v53, %v440_v49  ;;  %v2218_v63 = vpack.c.b16 %v338_v54, %v338_v54  ;;  %v467_v0 = vshrl.u32 %v2193_v46, 16  ;;  %v2265_v53 = vld [vmem:[%s2142_s4 + $0x6c] sm:$0xff]  ;;  %v216_v54 = vld [vmem:[%s2142_s4 + $0x74] sm:$0x1] }
  0x2b   : > { %v469_v2 = vshll.u32 %v2193_v46, 16  ;;  %v412_v4 = vor.u32 %v411_v56, %v407_v45  ;;  %v416_v5 = vrot.slane %v414_v57, 1  ;;  %v387_v7 = vrot.slane %v385_v58, 1 }
  0x2c   : > { %v2222_v8 = vpack.c.b16 %v345_v59, %v345_v59  ;;  %v390_v11 = vshll.u32 %v2218_v63, 16  ;;  %v344_v14 = vunpack.c.l.b16 %v210_v61  ;;  %v455_v15 = vshrl.u32 %v2212_v60, 16  ;;  %v2273_v59 = vld [vmem:[%s2142_s4 + $0xa8] sm:$0xff] }
  0x2d   : > { %v471_v12 = vrot.slane %v469_v2, 1  ;;  %v2231_v16 = vsel %vm369_vm0, %v412_v4, %v416_v5  ;;  %v388_v18 = vor.u32 %v387_v7, %v383_v55  ;;  %v457_v21 = vshll.u32 %v2212_v60, 16  ;;  %v231_v5 = vld [vmem:[%s2142_s4 + $0xb0] sm:$0x1] }
  0x2e   : > { %v474_v20 = vshll.u32 %v2222_v8, 16  ;;  %v392_v23 = vrot.slane %v390_v11, 1  ;;  %v2236_v26 = vpack.c.b16 %v344_v14, %v344_v14  ;;  %v343_v27 = vunpack.c.l.b16 %v207_v10 }
  0x2f   : > { %v472_v25 = vor.u32 %v471_v12, %v467_v0  ;;  %v459_v32 = vrot.slane %v457_v21, 1  ;;  %v443_v33 = vshrl.u32 %v2225_v9, 16  ;;  %v445_v34 = vshll.u32 %v2225_v9, 16  ;;  %v2289_v21 = vld [vmem:[%s2142_s4 + $0x9c] sm:$0xff] }
  0x30   : > { %572 = vrot.lane.b32.xlu2 %v2216_v62, %s2049_s5  ;;  %v476_v29 = vrot.slane %v474_v20, 1  ;;  %568 = vrot.lane.b32.xlu1 %v2231_v16, %s2049_s5  ;;  %v2251_v36 = vsel %vm369_vm0, %v388_v18, %v392_v23  ;;  %v462_v37 = vshll.u32 %v2236_v26, 16  ;;  %v2254_v38 = vpack.c.b16 %v343_v27, %v343_v27 }
  0x31   : > { %v348_v39 = vunpack.c.l.b16 %v222_v22  ;;  %564 = vrot.lane.b32.xlu0 %v2251_v36, %s2049_s5  ;;  %v460_v43 = vor.u32 %v459_v32, %v455_v15  ;;  %v447_v44 = vrot.slane %v445_v34, 1  ;;  %v503_v45 = vshrl.u32 %v2239_v28, 16  ;;  %v228_v22 = vld [vmem:[%s2142_s4 + $0xa4] sm:$0x1] }
  0x32   : > { %v464_v47 = vrot.slane %v462_v37, 1  ;;  %v450_v49 = vshll.u32 %v2254_v38, 16  ;;  %v505_v52 = vshll.u32 %v2239_v28, 16  ;;  %v2269_v55 = vsel %vm369_vm0, %v472_v25, %v476_v29 }
  0x33   : > { %v2261_v51 = vpack.c.b16 %v348_v39, %v348_v39  ;;  %3168 = vst [vmem:[#allocation7_spill] sm:$0xff] %v2269_v55  ;;  %v448_v56 = vor.u32 %v447_v44, %v443_v33  ;;  %v347_v57 = vunpack.c.l.b16 %v219_v41  ;;  %v493_v58 = vshll.u32 %v2246_v35, 16  ;;  %v2306_v44 = vld [vmem:[%s2142_s4 + $0x90] sm:$0xff] }
  0x34   : > { %v452_v61 = vrot.slane %v450_v49, 1  ;;  %v507_v0 = vrot.slane %v505_v52, 1  ;;  %v491_v4 = vshrl.u32 %v2246_v35, 16  ;;  %v2279_v7 = vsel %vm369_vm0, %v460_v43, %v464_v47 }
  0x35   : > { %v510_v2 = vshll.u32 %v2261_v51, 16  ;;  %3169 = vst [vmem:[#allocation8_spill] sm:$0xff] %v2279_v7  ;;  %v2281_v10 = vpack.c.b16 %v347_v57, %v347_v57  ;;  %v495_v11 = vrot.slane %v493_v58, 1  ;;  %v346_v12 = vunpack.c.l.b16 %v216_v54 }
  0x36   : > { %v2284_v14 = vsel %vm369_vm0, %v448_v56, %v452_v61  ;;  %v508_v15 = vor.u32 %v507_v0, %v503_v45  ;;  %v479_v18 = vshrl.u32 %v2265_v53, 16  ;;  %v481_v20 = vshll.u32 %v2265_v53, 16  ;;  %v225_v45 = vld [vmem:[%s2142_s4 + $0x98] sm:$0x1] }
  0x37   : > { %v512_v23 = vrot.slane %v510_v2, 1  ;;  %v498_v25 = vshll.u32 %v2281_v10, 16  ;;  %v2295_v27 = vpack.c.b16 %v346_v12, %v346_v12  ;;  %v351_v29 = vunpack.c.l.b16 %v231_v5 }
  0x38   : > { %578 = vrot.lane.b32.xlu2 %v2269_v55, %s2049_s5  ;;  %576 = vrot.lane.b32.xlu1 %v2279_v7, %s2049_s5  ;;  %v496_v32 = vor.u32 %v495_v11, %v491_v4  ;;  %v483_v33 = vrot.slane %v481_v20, 1  ;;  %v541_v34 = vshll.u32 %v2273_v59, 16  ;;  %v350_v43 = vunpack.c.l.b16 %v228_v22 }
  0x39   : > { %574 = vrot.lane.b32.xlu0 %v2284_v14, %s2049_s5  ;;  %v500_v37 = vrot.slane %v498_v25, 1  ;;  %v486_v39 = vshll.u32 %v2295_v27, 16  ;;  %v2303_v41 = vpack.c.b16 %v351_v29, %v351_v29  ;;  %v529_v49 = vshll.u32 %v2289_v21, 16 }
  0x3a   : > { %v484_v47 = vor.u32 %v483_v33, %v479_v18  ;;  %v2311_v52 = vsel %vm369_vm0, %v508_v15, %v512_v23  ;;  %v539_v56 = vshrl.u32 %v2273_v59, 16  ;;  %v2314_v57 = vpack.c.b16 %v350_v43, %v350_v43  ;;  %v234_v15 = vld [vmem:[%s2142_s4 + $0xbc] sm:$0x1]  ;;  %v2331_v23 = vld [vmem:[%s2142_s4 + $0xb4] sm:$0xff] }
  0x3b   : > { %v488_v54 = vrot.slane %v486_v39, 1  ;;  %v543_v58 = vrot.slane %v541_v34, 1  ;;  %v546_v61 = vshll.u32 %v2303_v41, 16  ;;  %v527_v0 = vshrl.u32 %v2289_v21, 16 }
  0x3c   : > { %v349_v2 = vunpack.c.l.b16 %v225_v45  ;;  %v2319_v4 = vsel %vm369_vm0, %v496_v32, %v500_v37  ;;  %v531_v5 = vrot.slane %v529_v49, 1  ;;  %v534_v11 = vshll.u32 %v2314_v57, 16 }
  0x3d   : > { %v517_v12 = vshll.u32 %v2306_v44, 16  ;;  %v2325_v18 = vsel %vm369_vm0, %v484_v47, %v488_v54  ;;  %v515_v22 = vshrl.u32 %v2306_v44, 16  ;;  %v544_v29 = vor.u32 %v543_v58, %v539_v56 }
  0x3e   : > { %3170 = vst [vmem:[#allocation9_spill] sm:$0xff] %v2325_v18  ;;  %v2327_v20 = vpack.c.b16 %v349_v2, %v349_v2  ;;  %v548_v32 = vrot.slane %v546_v61, 1  ;;  %v352_v34 = vunpack.c.l.b16 %v234_v15  ;;  %v532_v37 = vor.u32 %v531_v5, %v527_v0 }
  0x3f   : > { %v519_v25 = vrot.slane %v517_v12, 1  ;;  %v536_v39 = vrot.slane %v534_v11, 1  ;;  %v553_v49 = vshll.u32 %v2331_v23, 16  ;;  %v551_v61 = vshrl.u32 %v2331_v23, 16 }
  0x40   : > { %584 = vrot.lane.b32.xlu2 %v2311_v52, %s2049_s5  ;;  %582 = vrot.lane.b32.xlu1 %v2319_v4, %s2049_s5  ;;  %v522_v33 = vshll.u32 %v2327_v20, 16  ;;  %v2340_v47 = vpack.c.b16 %v352_v34, %v352_v34  ;;  %v2344_v54 = vsel %vm369_vm0, %v544_v29, %v548_v32  ;;  %v598_v5 = vrot.slane %v2185_v40, 1 }
  0x41   : > { %580 = vrot.lane.b32.xlu0 %v2325_v18, %s2049_s5  ;;  %v520_v43 = vor.u32 %v519_v25, %v515_v22  ;;  %v2347_v56 = vsel %vm369_vm0, %v532_v37, %v536_v39  ;;  %v555_v2 = vrot.slane %v553_v49, 1  ;;  %v599_v11 = vrot.slane %v2218_v63, 1 }
  0x42   : > { %v524_v45 = vrot.slane %v522_v33, 1  ;;  %v558_v0 = vshll.u32 %v2340_v47, 16  ;;  %v595_v12 = vrot.slane %v2153_v6, 1  ;;  %v596_v15 = vrot.slane %v2171_v24, 1 }
  0x43   : > { %v556_v22 = vor.u32 %v555_v2, %v551_v61  ;;  %v2365_v29 = vsel %vm594_vm1, %v598_v5, %v599_v11  ;;  %v607_v63 = vrot.slane %v2145_v1, 1  ;;  %v608_v24 = vrot.slane %v2160_v13, 1 }
  0x44   : > { %v2350_v58 = vsel %vm369_vm0, %v520_v43, %v524_v45  ;;  %v560_v25 = vrot.slane %v558_v0, 1  ;;  %v597_v32 = vsel %vm594_vm1, %v595_v12, %v596_v15  ;;  %v604_v34 = vrot.slane %v2179_v31, 1 }
  0x45   : > { %v605_v37 = vrot.slane %v2201_v50, 1  ;;  %v601_v39 = vrot.slane %v2149_v3, 1  ;;  %v602_v43 = vrot.slane %v2167_v19, 1  ;;  %v2383_v45 = vsel %vm594_vm1, %v607_v63, %v608_v24 }
  0x46   : > { %v2369_v33 = vsel %vm369_vm0, %v556_v22, %v560_v25  ;;  %v616_v13 = vrot.slane %v2212_v60, 1  ;;  %v617_v50 = vrot.slane %v2236_v26, 1  ;;  %v613_v19 = vrot.slane %v2225_v9, 1 }
  0x47   : > { %v2386_v49 = vsel %vm594_vm1, %v604_v34, %v605_v37  ;;  %v2389_v61 = vsel %vm594_vm1, %v601_v39, %v602_v43  ;;  %v614_v2 = vrot.slane %v2254_v38, 1  ;;  %v610_v0 = vrot.slane %v2165_v17, 1 }
  0x48   : > { %590 = vrot.lane.b32.xlu2 %v2344_v54, %s2049_s5  ;;  %588 = vrot.lane.b32.xlu1 %v2347_v56, %s2049_s5  ;;  %v611_v5 = vrot.slane %v2176_v30, 1  ;;  %v2404_v11 = vsel %vm594_vm1, %v616_v13, %v617_v50  ;;  %v625_v26 = vrot.slane %v2246_v35, 1  ;;  %v626_v38 = vrot.slane %v2281_v10, 1 }
  0x49   : > { %586 = vrot.lane.b32.xlu0 %v2350_v58, %s2049_s5  ;;  %v2407_v12 = vsel %vm594_vm1, %v613_v19, %v614_v2  ;;  %v622_v30 = vrot.slane %v2265_v53, 1  ;;  %v623_v22 = vrot.slane %v2295_v27, 1  ;;  %v619_v25 = vrot.slane %v2193_v46, 1 }
  0x4a   : > { %v2410_v15 = vsel %vm594_vm1, %v610_v0, %v611_v5  ;;  %v2425_v63 = vsel %vm594_vm1, %v625_v26, %v626_v38  ;;  %v634_v10 = vrot.slane %v2289_v21, 1  ;;  %v635_v27 = vrot.slane %v2314_v57, 1 }
  0x4b   : > { %v2428_v24 = vsel %vm594_vm1, %v622_v30, %v623_v22  ;;  %v632_v37 = vrot.slane %v2327_v20, 1  ;;  %v628_v39 = vrot.slane %v2239_v28, 1  ;;  %v629_v43 = vrot.slane %v2261_v51, 1 }
  0x4c   : > { %v2446_v13 = vsel %vm594_vm1, %v634_v10, %v635_v27  ;;  %v640_v51 = vrot.slane %v2331_v23, 1  ;;  %v641_v57 = vrot.slane %v2340_v47, 1  ;;  %v637_v20 = vrot.slane %v2273_v59, 1 }
  0x4d   : > { %v2452_v19 = vsel %vm594_vm1, %v628_v39, %v629_v43  ;;  %v638_v2 = vrot.slane %v2303_v41, 1  ;;  %v1888_v39 = vld [vmem:[%s3158_s1 + $0x40] sm:$0xff] }
  0x4e   : > { %v2465_v0 = vsel %vm594_vm1, %v640_v51, %v641_v57  ;;  %1348 = vmatpush.bf16.msra.mxu1 %v1888_v39  ;;  %1898 = vmatpush.bf16.msra.mxu3 %v1888_v39 }
  0x4f   : > { %v2468_v5 = vsel %vm594_vm1, %v637_v20, %v638_v2 }
  0x50   : > { %645 = vrot.lane.b32.xlu2 %v2365_v29, %s2050_s6  ;;  %643 = vrot.lane.b32.xlu1 %v597_v32, %s2050_s6  ;;  %v620_v32 = vrot.slane %v2222_v8, 1  ;;  %v631_v8 = vrot.slane %v2306_v44, 1 }
  0x51   : > { %592 = vrot.lane.b32.xlu0 %v2369_v33, %s2049_s5  ;;  %1841 = vmatmul.msk.bf16.vlgmr.msra.gmra.mxu1 %vm881_vm3, %v2389_v61 }
  0x52   : > { %v2431_v34 = vsel %vm594_vm1, %v619_v25, %v620_v32  ;;  %v2449_v50 = vsel %vm594_vm1, %v631_v8, %v632_v37  ;;  %v2496_v25 = vld [vmem:[%s2142_s4 + $0xc0] sm:$0xff]  ;;  %1850 = vmatmul.msk.bf16.vlgmr.msra.gmra.mxu3 %vm881_vm3, %v2452_v19 }
  0x58   : > { %651 = vrot.lane.b32.xlu2 %v2383_v45, %s2050_s6  ;;  %649 = vrot.lane.b32.xlu1 %v2386_v49, %s2050_s6 }
  0x59   : > { %647 = vrot.lane.b32.xlu0 %v2389_v61, %s2050_s6 }
  0x60   : > { %657 = vrot.lane.b32.xlu2 %v2404_v11, %s2050_s6  ;;  %655 = vrot.lane.b32.xlu1 %v2407_v12, %s2050_s6 }
  0x61   : > { %653 = vrot.lane.b32.xlu0 %v2410_v15, %s2050_s6  ;;  %1842 = vmatmul.msk.bf16.gmra.mxu1 %vm881_vm3, %v2386_v49 }
  0x62   : > { %1851 = vmatmul.msk.bf16.gmra.mxu3 %vm881_vm3, %v2449_v50 }
  0x68   : > { %663 = vrot.lane.b32.xlu2 %v2425_v63, %s2050_s6  ;;  %661 = vrot.lane.b32.xlu1 %v2428_v24, %s2050_s6 }
  0x69   : > { %659 = vrot.lane.b32.xlu0 %v2431_v34, %s2050_s6 }
  0x70   : > { %669 = vrot.lane.b32.xlu2 %v2446_v13, %s2050_s6  ;;  %667 = vrot.lane.b32.xlu1 %v2449_v50, %s2050_s6 }
  0x71   : > { %665 = vrot.lane.b32.xlu0 %v2452_v19, %s2050_s6  ;;  %1843 = vmatmul.msk.bf16.gmra.mxu1 %vm881_vm3, %v2383_v45 }
  0x72   : > { %1852 = vmatmul.msk.bf16.gmra.mxu3 %vm881_vm3, %v2446_v13 }
  0x78   : > { %680 = vrot.lane.b32.xlu2 %v2185_v40, %s2051_s7  ;;  %673 = vrot.lane.b32.xlu1 %v2465_v0, %s2050_s6 }
  0x79   : > { %671 = vrot.lane.b32.xlu0 %v2468_v5, %s2050_s6 }
  0x80   : > { %686 = vrot.lane.b32.xlu2 %v2145_v1, %s2051_s7  ;;  %684 = vrot.lane.b32.xlu1 %v2179_v31, %s2051_s7 }
  0x81   : > { %682 = vrot.lane.b32.xlu0 %v2149_v3, %s2051_s7  ;;  %1844 = vmatmul.msk.bf16.gmra.mxu1 %vm881_vm3, %v2410_v15 }
  0x82   : > { %v571_v41 = vpop.permute.xlu2 %570  ;;  %1853 = vmatmul.msk.bf16.gmra.mxu3 %vm881_vm3, %v2468_v5 }
  0x88   : > { %692 = vrot.lane.b32.xlu2 %v2212_v60, %s2051_s7  ;;  %690 = vrot.lane.b32.xlu1 %v2225_v9, %s2051_s7 }
  0x89   : > { %688 = vrot.lane.b32.xlu0 %v2165_v17, %s2051_s7 }
  0x8a   : > { %v2481_v47 = vpop.permute.xlu2 %572 }
  0x90   : > { %698 = vrot.lane.b32.xlu2 %v2246_v35, %s2051_s7  ;;  %696 = vrot.lane.b32.xlu1 %v2265_v53, %s2051_s7 }
  0x91   : > { %694 = vrot.lane.b32.xlu0 %v2193_v46, %s2051_s7  ;;  %1845 = vmatmul.msk.bf16.gmra.mxu1 %vm881_vm3, %v2407_v12 }
  0x92   : > { %v2486_v26 = vpop.permute.xlu2 %578  ;;  %1854 = vmatmul.msk.bf16.gmra.mxu3 %vm881_vm3, %v2465_v0 }
  0x98   : > { %704 = vrot.lane.b32.xlu2 %v2289_v21, %s2051_s7  ;;  %702 = vrot.lane.b32.xlu1 %v2306_v44, %s2051_s7 }
  0x99   : > { %700 = vrot.lane.b32.xlu0 %v2239_v28, %s2051_s7 }
  0x9a   : > { %v2491_v38 = vpop.permute.xlu2 %584  ;;  %v2493_v30 = vpop.permute.xlu1 %566 }
  0x9b   : > { %v563_v22 = vpop.permute.xlu0 %562 }
  0xa0   : > { %710 = vrot.lane.b32.xlu2 %v2496_v25, %s2051_s7  ;;  %708 = vrot.lane.b32.xlu1 %v2331_v23, %s2051_s7 }
  0xa1   : > { %706 = vrot.lane.b32.xlu0 %v2273_v59, %s2051_s7  ;;  %1846 = vmatmul.msk.bf16.gmra.mxu1 %vm881_vm3, %v2404_v11 }
  0xa2   : > { %v2501_v32 = vpop.permute.xlu2 %590  ;;  %v569_v10 = vpop.permute.xlu1 %568 }
  0xa3   : > { %v565_v27 = vpop.permute.xlu0 %564 }
  0xa4   : > { %v885_v8 = vsel %vm881_vm3, %v2185_v40, %v565_v27  ;;  %v891_v40 = vsel %vm881_vm3, %v2145_v1, %v571_v41 }
  0xa8   : > { %731 = vrot.lane.b32.xlu2 %v2231_v16, %s2052_s8  ;;  %729 = vrot.lane.b32.xlu1 %v2199_v48, %s2052_s8 }
  0xa9   : > { %727 = vrot.lane.b32.xlu0 %v2251_v36, %s2052_s8 }
  0xaa   : > { %v646_v37 = vpop.permute.xlu2 %645  ;;  %v577_v43 = vpop.permute.xlu1 %576 }
  0xab   : > { %v2515_v51 = vsel %vm914_vm2, %v885_v8, %v646_v37  ;;  %v575_v57 = vpop.permute.xlu0 %574  ;;  %v897_v8 = vsel %vm881_vm3, %v2212_v60, %v577_v43 }
  0xb0   : > { %737 = vrot.lane.b32.xlu2 %v2284_v14, %s2052_s8  ;;  %735 = vrot.lane.b32.xlu1 %v2216_v62, %s2052_s8 }
  0xb1   : > { %733 = vrot.lane.b32.xlu0 %v2189_v42, %s2052_s8  ;;  %1847 = vmatmul.msk.bf16.gmra.mxu1 %vm881_vm3, %v2431_v34 }
  0xb2   : > { %v652_v36 = vpop.permute.xlu2 %651  ;;  %v583_v20 = vpop.permute.xlu1 %582 }
  0xb3   : > { %v2530_v2 = vsel %vm914_vm2, %v891_v40, %v652_v36  ;;  %v581_v27 = vpop.permute.xlu0 %580  ;;  %v903_v43 = vsel %vm881_vm3, %v2246_v35, %v583_v20 }
  0xb8   : > { %743 = vrot.lane.b32.xlu2 %v2325_v18, %s2052_s8  ;;  %741 = vrot.lane.b32.xlu1 %v2269_v55, %s2052_s8 }
  0xb9   : > { %739 = vrot.lane.b32.xlu0 %v2279_v7, %s2052_s8 }
  0xba   : > { %v658_v41 = vpop.permute.xlu2 %657  ;;  %v589_v37 = vpop.permute.xlu1 %588 }
  0xbb   : > { %v2541_v39 = vsel %vm914_vm2, %v897_v8, %v658_v41  ;;  %v587_v40 = vpop.permute.xlu0 %586  ;;  %v883_v8 = vsel %vm881_vm3, %v2153_v6, %v563_v22  ;;  %v909_v20 = vsel %vm881_vm3, %v2289_v21, %v589_v37  ;;  %v889_v22 = vsel %vm881_vm3, %v2179_v31, %v569_v10 }
  0xc0   : > { %749 = vrot.lane.b32.xlu2 %v2350_v58, %s2052_s8  ;;  %747 = vrot.lane.b32.xlu1 %v2311_v52, %s2052_s8 }
  0xc1   : > { %745 = vrot.lane.b32.xlu0 %v2319_v4, %s2052_s8  ;;  %1848 = vmatmul.msk.bf16.gmra.mxu1 %vm881_vm3, %v2428_v24 }
  0xc2   : > { %v664_v36 = vpop.permute.xlu2 %663  ;;  %v644_v18 = vpop.permute.xlu1 %643 }
  0xc3   : > { %v2558_v41 = vsel %vm914_vm2, %v903_v43, %v664_v36  ;;  %v916_v55 = vsel %vm914_vm2, %v883_v8, %v644_v18  ;;  %v593_v60 = vpop.permute.xlu0 %592  ;;  %v887_v36 = vsel %vm881_vm3, %v2149_v3, %v2493_v30 }
  0xc8   : > { %778 = vrot.lane.b32.xlu2 %v2428_v24, %s2053_s11  ;;  %753 = vrot.lane.b32.xlu1 %v2344_v54, %s2052_s8 }
  0xc9   : > { %751 = vrot.lane.b32.xlu0 %v2347_v56, %s2052_s8 }
  0xca   : > { %v670_v6 = vpop.permute.xlu2 %669  ;;  %v650_v43 = vpop.permute.xlu1 %649 }
  0xcb   : > { %v2572_v18 = vsel %vm914_vm2, %v909_v20, %v670_v6  ;;  %v922_v8 = vsel %vm914_vm2, %v889_v22, %v650_v43  ;;  %v648_v7 = vpop.permute.xlu0 %647  ;;  %v899_v43 = vsel %vm881_vm3, %v2193_v46, %v2486_v26  ;;  %v907_v26 = vsel %vm881_vm3, %v2306_v44, %v587_v40 }
  0xcc   : > { %v920_v37 = vsel %vm914_vm2, %v887_v36, %v648_v7  ;;  %v895_v7 = vsel %vm881_vm3, %v2225_v9, %v575_v57 }
  0xd0   : > { %762 = vrot.lane.b32.xlu2 %v2365_v29, %s2053_s11  ;;  %862 = vrot.lane.b32.xlu1 %v2319_v4, %s2054_s12  ;;  %v893_v29 = vsel %vm881_vm3, %v2165_v17, %v2481_v47 }
  0xd1   : > { %815 = vrot.lane.b32.xlu0 %v2246_v35, %s2055_s13  ;;  %1849 = vmatmul.msk.bf16.gmra.mxu1 %vm881_vm3, %v2425_v63 }
  0xd2   : > { %v681_v30 = vpop.permute.xlu2 %680  ;;  %v656_v20 = vpop.permute.xlu1 %655 }
  0xd3   : > { %v2592_v10 = vsel %vm947_vm4, %v916_v55, %v681_v30  ;;  %v928_v6 = vsel %vm914_vm2, %v895_v7, %v656_v20  ;;  %v654_v22 = vpop.permute.xlu0 %653  ;;  %v901_v55 = vsel %vm881_vm3, %v2265_v53, %v581_v27  ;;  %v905_v7 = vsel %vm881_vm3, %v2239_v28, %v2491_v38 }
  0xd4   : > { %v926_v4 = vsel %vm914_vm2, %v893_v29, %v654_v22  ;;  %v913_v29 = vsel %vm881_vm3, %v2331_v23, %v593_v60 }
  0xd8   : > { %780 = vrot.lane.b32.xlu2 %v2425_v63, %s2053_s11  ;;  %846 = vrot.lane.b32.xlu1 %v2199_v48, %s2054_s12 }
  0xd9   : > { %799 = vrot.lane.b32.xlu0 %v2149_v3, %s2055_s13 }
  0xda   : > { %v687_v35 = vpop.permute.xlu2 %686  ;;  %v662_v57 = vpop.permute.xlu1 %661 }
  0xdb   : > { %v2608_v47 = vsel %vm947_vm4, %v922_v8, %v687_v35  ;;  %v934_v36 = vsel %vm914_vm2, %v901_v55, %v662_v57  ;;  %v660_v30 = vpop.permute.xlu0 %659 }
  0xdc   : > { %v2615_v48 = vsel %vm914_vm2, %v899_v43, %v660_v30 }
  0xe0   : > { %764 = vrot.lane.b32.xlu2 %v2389_v61, %s2053_s11  ;;  %864 = vrot.lane.b32.xlu1 %v2311_v52, %s2054_s12 }
  0xe1   : > { %817 = vrot.lane.b32.xlu0 %v2239_v28, %s2055_s13 }
  0xe2   : > { %v693_v3 = vpop.permute.xlu2 %692  ;;  %v668_v8 = vpop.permute.xlu1 %667 }
  0xe3   : > { %v2630_v27 = vsel %vm947_vm4, %v928_v6, %v693_v3  ;;  %v940_v61 = vsel %vm914_vm2, %v907_v26, %v668_v8  ;;  %v666_v20 = vpop.permute.xlu0 %665  ;;  %v911_v6 = vsel %vm881_vm3, %v2273_v59, %v2501_v32 }
  0xe4   : > { %v938_v52 = vsel %vm914_vm2, %v905_v7, %v666_v20  ;;  %v1882_v20 = vld [vmem:[%s3158_s1 + $0x10] sm:$0xff] }
  0xe8   : > { %782 = vrot.lane.b32.xlu2 %v2452_v19, %s2053_s11  ;;  %848 = vrot.lane.b32.xlu1 %v2231_v16, %s2054_s12 }
  0xe9   : > { %801 = vrot.lane.b32.xlu0 %v2179_v31, %s2055_s13 }
  0xea   : > { %v699_v40 = vpop.permute.xlu2 %698  ;;  %v674_v38 = vpop.permute.xlu1 %673 }
  0xeb   : > { %v2646_v28 = vsel %vm947_vm4, %v934_v36, %v699_v40  ;;  %v946_v19 = vsel %vm914_vm2, %v913_v29, %v674_v38  ;;  %v672_v22 = vpop.permute.xlu0 %671  ;;  %v759_v29 = vrot.slane %v2496_v25, 1 }
  0xec   : > { %v944_v16 = vsel %vm914_vm2, %v911_v6, %v672_v22 }
  0xf0   : > { %766 = vrot.lane.b32.xlu2 %v2386_v49, %s2053_s11  ;;  %866 = vrot.lane.b32.xlu1 %v2350_v58, %s2054_s12 }
  0xf1   : > { %819 = vrot.lane.b32.xlu0 %v2306_v44, %s2055_s13 }
  0xf2   : > { %v705_v31 = vpop.permute.xlu2 %704  ;;  %v685_v32 = vpop.permute.xlu1 %684 }
  0xf3   : > { %v2664_v60 = vsel %vm947_vm4, %v940_v61, %v705_v31  ;;  %v953_v35 = vsel %vm947_vm4, %v920_v37, %v685_v32  ;;  %v683_v55 = vpop.permute.xlu0 %682 }
  0xf4   : > { %v2669_v57 = vsel %vm947_vm4, %v2515_v51, %v683_v55  ;;  %v3171_v55 = vld [vmem:[#allocation8_spill] sm:$0xff] }
  0xf8   : > { %784 = vrot.lane.b32.xlu2 %v2449_v50, %s2053_s11  ;;  %850 = vrot.lane.b32.xlu1 %v2189_v42, %s2054_s12 }
  0xf9   : > { %803 = vrot.lane.b32.xlu0 %v2145_v1, %s2055_s13 }
  0xfa   : > { %v711_v44 = vpop.permute.xlu2 %710  ;;  %v691_v49 = vpop.permute.xlu1 %690 }
  0xfb   : > { %v2678_v58 = vsel %vm947_vm4, %v946_v19, %v711_v44  ;;  %v959_v37 = vsel %vm947_vm4, %v926_v4, %v691_v49  ;;  %v689_v43 = vpop.permute.xlu0 %688  ;;  %v1880_v19 = vld [vmem:[%s3158_s1] sm:$0xff] }
  0xfc   : > { %v2683_v51 = vsel %vm947_vm4, %v2530_v2, %v689_v43  ;;  %v3172_v44 = vld [vmem:[#allocation6_spill] sm:$0xff] }
 0x100   : > { %768 = vrot.lane.b32.xlu2 %v2383_v45, %s2053_s11  ;;  %868 = vrot.lane.b32.xlu1 %v2347_v56, %s2054_s12  ;;  %v1887_v45 = vld [vmem:[%s3158_s1 + $0x38] sm:$0xff]  ;;  %v1886_v56 = vld [vmem:[%s3158_s1 + $0x30] sm:$0xff] }
 0x101   : > { %821 = vrot.lane.b32.xlu0 %v2289_v21, %s2055_s13  ;;  %1890 = vmatpush.bf16.msra.mxu2 %v1887_v45 }
 0x102   : > { %v732_v1 = vpop.permute.xlu2 %731  ;;  %v2696_v50 = vpop.permute.xlu1 %696  ;;  %1252 = vmatpush.bf16.msra.mxu0 %v1887_v45 }
 0x103   : > { %v2694_v42 = vsel %vm980_vm5, %v953_v35, %v732_v1  ;;  %v695_v2 = vpop.permute.xlu0 %694 }
 0x104   : > { %v2700_v4 = vsel %vm947_vm4, %v2541_v39, %v695_v2 }
 0x105   : > { %1891 = vmatpush.bf16.msra.mxu2 %v1886_v56 }
 0x106   : > { %1253 = vmatpush.bf16.msra.mxu0 %v1886_v56 }
 0x108   : > { %786 = vrot.lane.b32.xlu2 %v2446_v13, %s2053_s11  ;;  %852 = vrot.lane.b32.xlu1 %v2216_v62, %s2054_s12 }
 0x109   : > { %805 = vrot.lane.b32.xlu0 %v2165_v17, %s2055_s13  ;;  %v1885_v17 = vld [vmem:[%s3158_s1 + $0x28] sm:$0xff] }
 0x10a   : > { %v738_v21 = vpop.permute.xlu2 %737  ;;  %v703_v36 = vpop.permute.xlu1 %702  ;;  %1892 = vmatpush.bf16.msra.mxu2 %v1885_v17  ;;  %1254 = vmatpush.bf16.msra.mxu0 %v1885_v17 }
 0x10b   : > { %v2715_v39 = vsel %vm980_vm5, %v959_v37, %v738_v21  ;;  %v2718_v30 = vsel %vm947_vm4, %v938_v52, %v703_v36  ;;  %v701_v3 = vpop.permute.xlu0 %700  ;;  %v240_v21 = vld [vmem:[%s2142_s4 + $0xd4] sm:$0x1] }
 0x10c   : > { %v2722_v62 = vsel %vm947_vm4, %v2558_v41, %v701_v3  ;;  %v1884_v41 = vld [vmem:[%s3158_s1 + $0x20] sm:$0xff]  ;;  %v832_v36 = vunpack.c.l.b16 %v240_v21  ;;  %v3173_v3 = vld [vmem:[#allocation7_spill] sm:$0xff] }
 0x10e   : > { %1893 = vmatpush.bf16.msra.mxu2 %v1884_v41  ;;  %1255 = vmatpush.bf16.msra.mxu0 %v1884_v41 }
 0x110   : > { %770 = vrot.lane.b32.xlu2 %v2410_v15, %s2053_s11  ;;  %870 = vrot.lane.b32.xlu1 %v2344_v54, %s2054_s12  ;;  %v237_v54 = vld [vmem:[%s2142_s4 + $0xc8] sm:$0x1] }
 0x111   : > { %823 = vrot.lane.b32.xlu0 %v2273_v59, %s2055_s13  ;;  %v1883_v59 = vld [vmem:[%s3158_s1 + $0x18] sm:$0xff]  ;;  %v713_v61 = vunpack.c.l.b16 %v237_v54 }
 0x112   : > { %v2735_v13 = vpop.permute.xlu2 %743  ;;  %v709_v26 = vpop.permute.xlu1 %708  ;;  %1894 = vmatpush.bf16.msra.mxu2 %v1883_v59  ;;  %1256 = vmatpush.bf16.msra.mxu0 %v1883_v59 }
 0x113   : > { %v2741_v8 = vsel %vm947_vm4, %v944_v16, %v709_v26  ;;  %v707_v15 = vpop.permute.xlu0 %706  ;;  %v714_v40 = vpack.c.b16 %v713_v61, %v713_v61 }
 0x114   : > { %v2745_v7 = vsel %vm947_vm4, %v2572_v18, %v707_v15 }
 0x115   : > { %v760_v38 = vrot.slane %v714_v40, 1  ;;  %v723_v35 = vshll.u32 %v714_v40, 16 }
 0x116   : > { %1895 = vmatpush.bf16.msra.mxu2 %v1882_v20  ;;  %1257 = vmatpush.bf16.msra.mxu0 %v1882_v20 }
 0x118   : > { %788 = vrot.lane.b32.xlu2 %v2468_v5, %s2053_s11  ;;  %854 = vrot.lane.b32.xlu1 %v2284_v14, %s2054_s12  ;;  %v1881_v14 = vld [vmem:[%s3158_s1 + $0x8] sm:$0xff] }
 0x119   : > { %807 = vrot.lane.b32.xlu0 %v2225_v9, %s2055_s13  ;;  %v761_v9 = vsel %vm594_vm1, %v759_v29, %v760_v38 }
 0x11a   : > { %v2757_v18 = vpop.permute.xlu2 %749  ;;  %v2762_v52 = vpop.permute.xlu1 %729  ;;  %1896 = vmatpush.bf16.msra.mxu2 %v1881_v14  ;;  %1258 = vmatpush.bf16.msra.mxu0 %v1881_v14 }
 0x11b   : > { %v2764_v5 = vpop.permute.xlu0 %727  ;;  %1855 = vmatmul.msk.bf16.gmra.mxu3 %vm881_vm3, %v761_v9 }
 0x11e   : > { %1897 = vmatpush.bf16.msra.mxu2 %v1880_v19  ;;  %1259 = vmatpush.bf16.msra.mxu0 %v1880_v19 }
 0x120   : > { %772 = vrot.lane.b32.xlu2 %v2407_v12, %s2053_s11  ;;  %872 = vrot.lane.b32.xlu1 %v2369_v33, %s2054_s12  ;;  %v718_v12 = vshll.u32 %v2496_v25, 16 }
 0x121   : > { %825 = vrot.lane.b32.xlu0 %v2331_v23, %s2055_s13  ;;  %v716_v23 = vshrl.u32 %v2496_v25, 16 }
 0x122   : > { %v779_v6 = vpop.permute.xlu2 %778  ;;  %v736_v24 = vpop.permute.xlu1 %735  ;;  %v720_v32 = vrot.slane %v718_v12, 1 }
 0x123   : > { %v2786_v22 = vsel %vm980_vm5, %v2683_v51, %v736_v24  ;;  %v734_v16 = vpop.permute.xlu0 %733 }
 0x124   : > { %v2790_v31 = vsel %vm980_vm5, %v2608_v47, %v734_v16  ;;  %v721_v37 = vor.u32 %v720_v32, %v716_v23  ;;  %v725_v47 = vrot.slane %v723_v35, 1  ;;  %v3174_v16 = vld [vmem:[#allocation9_spill] sm:$0xff] }
 0x126   : > { %v726_v2 = vsel %vm369_vm0, %v721_v37, %v725_v47 }
 0x128   : > { %755 = vrot.lane.b32.xlu2 %v2369_v33, %s2052_s8  ;;  %856 = vrot.lane.b32.xlu1 %v3171_v55, %s2054_s12 }
 0x129   : > { %809 = vrot.lane.b32.xlu0 %v3172_v44, %s2055_s13  ;;  %v984_v44 = vsel %vm980_vm5, %v2669_v57, %v2762_v52 }
 0x12a   : > { %v742_v49 = vpop.permute.xlu1 %741  ;;  %v763_v43 = vpop.permute.xlu2 %762 }
 0x12b   : > { %v2801_v51 = vsel %vm980_vm5, %v2700_v4, %v742_v49  ;;  %v740_v1 = vpop.permute.xlu0 %739 }
 0x12c   : > { %v2805_v33 = vsel %vm980_vm5, %v2630_v27, %v740_v1  ;;  %v2819_v27 = vld [vmem:[%s2142_s4 + $0xcc] sm:$0xff]  ;;  %s177_s4 = sand.u32 1, %s2031_s15  }
 0x12d   : > { %v835_v15 = vshrl.u32 %v2819_v27, 16  ;;  %s1636_s29 = scalar_lea.sflag [#allocation4], %s177_s4 }
 0x130   : > { %874 = vrot.lane.b32.xlu2 %v726_v2, %s2054_s12  ;;  %827 = vrot.lane.b32.xlu1 %v2496_v25, %s2055_s13  ;;  %v2827_v25 = vpack.c.b16 %v832_v36, %v832_v36 }
 0x131   : > { %790 = vrot.lane.b32.xlu0 %v2465_v0, %s2053_s11  ;;  %v837_v0 = vshll.u32 %v2819_v27, 16 }
 0x132   : > { %v2815_v4 = vpop.permute.xlu1 %747  ;;  %v781_v56 = vpop.permute.xlu2 %780  ;;  %v842_v59 = vshll.u32 %v2827_v25, 16 }
 0x133   : > { %v746_v45 = vpop.permute.xlu0 %745 }
 0x134   : > { %v844_v20 = vrot.slane %v842_v59, 1 }
 0x138   : > { %858 = vrot.lane.b32.xlu2 %v3173_v3, %s2054_s12  ;;  %811 = vrot.lane.b32.xlu1 %v2193_v46, %s2055_s13  ;;  %v839_v46 = vrot.slane %v837_v0, 1 }
 0x139   : > { %774 = vrot.lane.b32.xlu0 %v2404_v11, %s2053_s11 }
 0x13a   : > { %v754_v63 = vpop.permute.xlu1 %753  ;;  %v765_v11 = vpop.permute.xlu2 %764  ;;  %v840_v61 = vor.u32 %v839_v46, %v835_v15 }
 0x13b   : > { %v2832_v17 = vsel %vm980_vm5, %v2745_v7, %v754_v63  ;;  %v752_v41 = vpop.permute.xlu0 %751  ;;  %v965_v7 = vsel %vm947_vm4, %v2615_v48, %v2696_v50  ;;  %v1017_v37 = vsel %vm1013_vm6, %v984_v44, %v765_v11  ;;  %v1004_v11 = vsel %vm980_vm5, %v2718_v30, %v2757_v18 }
 0x13c   : > { %v2836_v26 = vsel %vm980_vm5, %v2664_v60, %v752_v41  ;;  %v998_v60 = vsel %vm980_vm5, %v965_v7, %v2735_v13  ;;  %v845_v48 = vsel %vm369_vm0, %v840_v61, %v844_v20  ;;  %v982_v13 = vsel %vm980_vm5, %v2592_v10, %v2764_v5 }
 0x13d   : > { %v1031_v40 = vsel %vm1013_vm6, %v998_v60, %v779_v6  ;;  %v1015_v6 = vsel %vm1013_vm6, %v982_v13, %v763_v43  ;;  %vm1622_vm0 = vcmask 1047559  }
 0x140   : > { %829 = vrot.lane.b32.xlu2 %v2819_v27, %s2055_s13  ;;  %792 = vrot.lane.b32.xlu1 %v761_v9, %s2053_s11 }
 0x141   : > { %757 = vrot.lane.b32.xlu0 %v726_v2, %s2052_s8  ;;  %s1731_s8 = sshll.u32 %s177_s4, 4 }
 0x142   : > { %v863_v54 = vpop.permute.xlu1 %862  ;;  %v783_v50 = vpop.permute.xlu2 %782 }
 0x143   : > { %v816_v14 = vpop.permute.xlu0 %815 }
 0x144   : > { %v1064_v29 = vsel %vm1046_vm7, %v1031_v40, %v816_v14 }
 0x145   : > { %v1105_v38 = vsel %vm1079_vm8, %v1064_v29, %v863_v54 }
 0x146   : > { %1300 = vmatmul.bf16.vlgmr.msra.gmra.mxu2 %v1105_v38 }
 0x148   : > { %813 = vrot.lane.b32.xlu2 %v2265_v53, %s2055_s13  ;;  %776 = vrot.lane.b32.xlu1 %v2431_v34, %s2053_s11  ;;  %v1000_v53 = vsel %vm980_vm5, %v2646_v28, %v746_v45  ;;  %v2866_v34 = vpop.f32.mrf.mxu1  ;;  %v1002_v45 = vsel %vm980_vm5, %v2722_v62, %v2815_v4  ;;  %s1889_s11 = sshll.u32 %s2039_s17, 4 }
 0x149   : > { %876 = vrot.lane.b32.xlu0 %v845_v48, %s2054_s12  ;;  %v1033_v10 = vsel %vm1013_vm6, %v1000_v53, %v781_v56  ;;  %v1035_v56 = vsel %vm1013_vm6, %v1002_v45, %v783_v50  ;;  %s1649_s24 = scalar_lea.hbm %s3160_s3, %s1889_s11 }
 0x14a   : > { %v847_v9 = vpop.permute.xlu1 %846  ;;  %v767_v32 = vpop.permute.xlu2 %766  ;;  %s1652_s28 = sshll.u32 %s1649_s24, 4  ;;  %s1653_s28 = int_to_ptr.hbm [resolvable:$true] %s1652_s28 }
 0x14b   : > { %v800_v19 = vpop.permute.xlu0 %799  ;;  %v1019_v41 = vsel %vm1013_vm6, %v2694_v42, %v767_v32  ;;  %s1983_s30 = sshra.s32 %s1653_s28, 4  ;;  %s1984_s30 = int_to_ptr.hbm [resolvable:$true] %s1983_s30 }
 0x14c   : > { %v1048_v24 = vsel %vm1046_vm7, %v1015_v6, %v800_v19  ;;  %s1985_s5 = scalar_lea.hbm %s1984_s30, 16  ;;  %p1990_p1 = scmp.lt.s32.totalorder %s1984_s30, %s3160_s3 }
 0x14d   : > { %v1081_v12 = vsel %vm1079_vm8, %v1048_v24, %v847_v9  ;;  %p1986_p12 = scmp.ne.s32.totalorder %s1984_s30, %s1985_s5  ;;  %p1991_p2 = scmp.lt.s32.totalorder %s1989_s9, %s1985_s5 }
 0x14e   : > { %1260 = vmatmul.bf16.vlgmr.msra.gmra.mxu0 %v1081_v12 }
 0x14f   : > { %p1987_p13 = pnand %p1986_p12, %p2122_p4  ;;  %p1992_p3 = por %p1991_p2, %p1990_p1 }
 0x150   : > { %v2876_v28 = vpop.f32.mrf.mxu1 }
 0x151   : > { %860 = vrot.lane.b32.xlu0 %v3174_v16, %s2054_s12  ;;  %s179_s12 = scalar_lea.vmem [#allocation3], %s1731_s8  ;;  %p1988_p0 = pneg %p1987_p13 }
 0x152   : > { %v865_v23 = vpop.permute.xlu1 %864  ;;  %v785_v1 = vpop.permute.xlu2 %784  ;;  %s1650_s27 = sshll.u32 %s179_s12, 4  ;;  %s1651_s27 = int_to_ptr.vmem [resolvable:$true] %s1650_s27 }
 0x153   : > { %v818_v5 = vpop.permute.xlu0 %817  ;;  %v1037_v60 = vsel %vm1013_vm6, %v1004_v11, %v785_v1  ;;  %v2056_v11 = vmov 0   ;;  %p1993_p5 = pnand %p1992_p3, %p1988_p0 }
 0x154   : > { %v1066_v35 = vsel %vm1046_vm7, %v1033_v10, %v818_v5  ;;  %1965 = vset.pattern.permute.xlu1 %v2056_v11  ;;  %1966 = vset.pattern.permute.xlu2 %v2056_v11 }
 0x155   : > { %v1108_v55 = vsel %vm1079_vm8, %v1066_v35, %v865_v23  ;;  %1967 = vset.pattern.permute.xlu0 %v2056_v11 }
 0x156   : > { %1305 = vmatmul.bf16.gmra.mxu2 %v1108_v55 }
 0x158   : > { %v2885_v52 = vpop.f32.mrf.mxu1 }
 0x15a   : > { %v849_v49 = vpop.permute.xlu1 %848  ;;  %v769_v63 = vpop.permute.xlu2 %768 }
 0x15b   : > { %v802_v47 = vpop.permute.xlu0 %801  ;;  %v1021_v14 = vsel %vm1013_vm6, %v2790_v31, %v769_v63 }
 0x15c   : > { %v1050_v43 = vsel %vm1046_vm7, %v1017_v37, %v802_v47  ;;  %v879_v37 = vrot.slane %v2827_v25, 1 }
 0x15d   : > { %v1084_v2 = vsel %vm1079_vm8, %v1050_v43, %v849_v49 }
 0x15e   : > { %1265 = vmatmul.bf16.gmra.mxu0 %v1084_v2 }
 0x160   : > { %v2893_v4 = vpop.f32.mrf.mxu1 }
 0x162   : > { %v867_v21 = vpop.permute.xlu1 %866  ;;  %v787_v59 = vpop.permute.xlu2 %786 }
 0x163   : > { %v820_v57 = vpop.permute.xlu0 %819  ;;  %v1039_v13 = vsel %vm1013_vm6, %v2836_v26, %v787_v59 }
 0x164   : > { %v1068_v36 = vsel %vm1046_vm7, %v1035_v56, %v820_v57 }
 0x165   : > { %v1111_v3 = vsel %vm1079_vm8, %v1068_v36, %v867_v21 }
 0x166   : > { %1310 = vmatmul.bf16.gmra.mxu2 %v1111_v3 }
 0x168   : > { %v2901_v20 = vpop.f32.mrf.mxu1 }
 0x16a   : > { %v851_v0 = vpop.permute.xlu1 %850  ;;  %v771_v29 = vpop.permute.xlu2 %770 }
 0x16b   : > { %v804_v15 = vpop.permute.xlu0 %803  ;;  %v1023_v12 = vsel %vm1013_vm6, %v2786_v22, %v771_v29  ;;  %v878_v22 = vrot.slane %v2819_v27, 1 }
 0x16c   : > { %v1052_v46 = vsel %vm1046_vm7, %v1019_v41, %v804_v15 }
 0x16d   : > { %v1087_v62 = vsel %vm1079_vm8, %v1052_v46, %v851_v0  ;;  %v880_v47 = vsel %vm594_vm1, %v878_v22, %v879_v37 }
 0x16e   : > { %1270 = vmatmul.bf16.gmra.mxu0 %v1087_v62  ;;  %1856 = vmatmul.msk.bf16.gmra.mxu3 %vm881_vm3, %v880_v47 }
 0x170   : > { %v2907_v18 = vpop.f32.mrf.mxu1 }
 0x172   : > { %v869_v7 = vpop.permute.xlu1 %868  ;;  %v789_v19 = vpop.permute.xlu2 %788 }
 0x173   : > { %v822_v54 = vpop.permute.xlu0 %821  ;;  %v1041_v5 = vsel %vm1013_vm6, %v2832_v17, %v789_v19 }
 0x174   : > { %v1070_v61 = vsel %vm1046_vm7, %v1037_v60, %v822_v54 }
 0x175   : > { %v1114_v42 = vsel %vm1079_vm8, %v1070_v61, %v869_v7 }
 0x176   : > { %1315 = vmatmul.bf16.gmra.mxu2 %v1114_v42 }
 0x178   : > { %v2915_v16 = vpop.f32.mrf.mxu1 }
 0x17a   : > { %v853_v40 = vpop.permute.xlu1 %852  ;;  %v773_v26 = vpop.permute.xlu2 %772 }
 0x17b   : > { %v806_v38 = vpop.permute.xlu0 %805  ;;  %v1025_v17 = vsel %vm1013_vm6, %v2715_v39, %v773_v26 }
 0x17c   : > { %v1054_v48 = vsel %vm1046_vm7, %v1021_v14, %v806_v38 }
 0x17d   : > { %v1090_v30 = vsel %vm1079_vm8, %v1054_v48, %v853_v40 }
 0x17e   : > { %1275 = vmatmul.bf16.gmra.mxu0 %v1090_v30 }
 0x180   : > { %v2923_v49 = vpop.f32.mrf.mxu1 }
 0x182   : > { %v871_v50 = vpop.permute.xlu1 %870  ;;  %v756_v43 = vpop.permute.xlu2 %755 }
 0x183   : > { %v824_v9 = vpop.permute.xlu0 %823  ;;  %v1010_v25 = vsel %vm980_vm5, %v2741_v8, %v756_v43 }
 0x184   : > { %v1072_v6 = vsel %vm1046_vm7, %v1039_v13, %v824_v9 }
 0x185   : > { %v1117_v24 = vsel %vm1079_vm8, %v1072_v6, %v871_v50  ;;  %v1395_v6 = vpop.f32.mrf.mxu3 }
 0x186   : > { %1320 = vmatmul.bf16.gmra.mxu2 %v1117_v24 }
 0x188   : > { %v2933_v56 = vpop.f32.mrf.mxu1 }
 0x18a   : > { %v855_v31 = vpop.permute.xlu1 %854  ;;  %v875_v27 = vpop.permute.xlu2 %874 }
 0x18b   : > { %v808_v53 = vpop.permute.xlu0 %807 }
 0x18c   : > { %v1056_v23 = vsel %vm1046_vm7, %v1023_v12, %v808_v53 }
 0x18d   : > { %v1093_v32 = vsel %vm1079_vm8, %v1056_v23, %v855_v31  ;;  %v2961_v31 = vld [vmem:[#allocation2] ss:$0 sm:$0xff] }
 0x18e   : > { %1280 = vmatmul.bf16.gmra.mxu0 %v1093_v32  ;;  %v2965_v32 = vpop.f32.mrf.mxu3 }
 0x190   : > { %v2940_v0 = vpop.f32.mrf.mxu1 }
 0x192   : > { %v873_v10 = vpop.permute.xlu1 %872  ;;  %v859_v46 = vpop.permute.xlu2 %858 }
 0x193   : > { %v826_v35 = vpop.permute.xlu0 %825 }
 0x194   : > { %v1074_v55 = vsel %vm1046_vm7, %v1041_v5, %v826_v35 }
 0x195   : > { %v1120_v44 = vsel %vm1079_vm8, %v1074_v55, %v873_v10 }
 0x196   : > { %1325 = vmatmul.bf16.gmra.mxu2 %v1120_v44  ;;  %v1400_v22 = vpop.f32.mrf.mxu3 }
 0x198   : > { %v2946_v54 = vpop.f32.mrf.mxu1 }
 0x19a   : > { %v857_v1 = vpop.permute.xlu1 %856  ;;  %v830_v42 = vpop.permute.xlu2 %829 }
 0x19b   : > { %v810_v2 = vpop.permute.xlu0 %809 }
 0x19c   : > { %v1058_v45 = vsel %vm1046_vm7, %v1025_v17, %v810_v2 }
 0x19d   : > { %v1096_v21 = vsel %vm1079_vm8, %v1058_v45, %v857_v1 }
 0x19e   : > { %1285 = vmatmul.bf16.gmra.mxu0 %v1096_v21  ;;  %v1402_v2 = vpop.f32.mrf.mxu3 }
 0x1a0   : > { %v2953_v48 = vpop.f32.mrf.mxu1 }
 0x1a2   : > { %v828_v57 = vpop.permute.xlu1 %827  ;;  %v814_v50 = vpop.permute.xlu2 %813 }
 0x1a3   : > { %v791_v36 = vpop.permute.xlu0 %790 }
 0x1a4   : > { %v1043_v3 = vsel %vm1013_vm6, %v1010_v25, %v791_v36 }
 0x1a5   : > { %v1076_v63 = vsel %vm1046_vm7, %v1043_v3, %v828_v57 }
 0x1a6   : > { %v1123_v39 = vsel %vm1079_vm8, %v1076_v63, %v875_v27  ;;  %v2981_v36 = vpop.f32.mrf.mxu3 }
 0x1a7   : > { %1330 = vmatmul.bf16.gmra.mxu2 %v1123_v39 }
 0x1a8   : > { %v2959_v19 = vpop.f32.mrf.mxu1 }
 0x1aa   : > { %v812_v41 = vpop.permute.xlu1 %811 }
 0x1ab   : > { %v775_v15 = vpop.permute.xlu0 %774 }
 0x1ac   : > { %v1027_v62 = vsel %vm1013_vm6, %v2805_v33, %v775_v15 }
 0x1ad   : > { %v1060_v59 = vsel %vm1046_vm7, %v1027_v62, %v812_v41 }
 0x1ae   : > { %v1099_v8 = vsel %vm1079_vm8, %v1060_v59, %v859_v46  ;;  %v1407_v15 = vpop.f32.mrf.mxu3 }
 0x1af   : > { %1290 = vmatmul.bf16.gmra.mxu0 %v1099_v8 }
 0x1b0   : > { %v2967_v26 = vpop.f32.mrf.mxu1 }
 0x1b2   : > { %v793_v7 = vpop.permute.xlu1 %792 }
 0x1b3   : > { %v758_v60 = vpop.permute.xlu0 %757 }
 0x1b4   : > { %v1012_v61 = vsel %vm980_vm5, %v2678_v58, %v758_v60 }
 0x1b5   : > { %v1045_v40 = vsel %vm1013_vm6, %v1012_v61, %v793_v7 }
 0x1b6   : > { %v1078_v33 = vsel %vm1046_vm7, %v1045_v40, %v830_v42  ;;  %v1410_v42 = vpop.f32.mrf.mxu3 }
 0x1b8   : > { %v2972_v47 = vpop.f32.mrf.mxu1 }
 0x1ba   : > { %v777_v38 = vpop.permute.xlu1 %776 }
 0x1bb   : > { %v877_v14 = vpop.permute.xlu0 %876  ;;  %v1029_v30 = vsel %vm1013_vm6, %v2801_v51, %v777_v38 }
 0x1bc   : > { %v1126_v29 = vsel %vm1079_vm8, %v1078_v33, %v877_v14  ;;  %v1062_v13 = vsel %vm1046_vm7, %v1029_v30, %v814_v50 }
 0x1bd   : > { %1335 = vmatmul.bf16.gmra.mxu2 %v1126_v29 }
 0x1be   : > { %v1412_v50 = vpop.f32.mrf.mxu3 }
 0x1c0   : > { %v2977_v21 = vpop.f32.mrf.mxu1 }
 0x1c3   : > { %v861_v9 = vpop.permute.xlu0 %860 }
 0x1c4   : > { %v1102_v58 = vsel %vm1079_vm8, %v1062_v13, %v861_v9 }
 0x1c5   : > { %1295 = vmatmul.bf16.gmra.mxu0 %v1102_v58 }
 0x1c9   : > { %v1301_v24 = vpop.f32.mrf.mxu2 }
 0x1ca   : > { %v1302_v29 = vadd.f32 %v2961_v31, %v1301_v24 }
 0x1cb   : > { %v1261_v12 = vpop.f32.mrf.mxu0 }
 0x1cc   : > { %v1262_v53 = vadd.f32 %v2961_v31, %v1261_v12 }
 0x1ce   : > { %v1351_v23 = vadd.f32 %v2866_v34, %v1262_v53 }
 0x1d0   : > { %1463 = vperm.xlu1 %1965, %v1351_v23  }
 0x1d1   : > { %v1303_v51 = vpop.f32.mrf.mxu2 }
 0x1d2   : > { %v1304_v46 = vadd.f32 %v2961_v31, %v1303_v51 }
 0x1d3   : > { %v1263_v10 = vpop.f32.mrf.mxu0 }
 0x1d4   : > { %v1264_v5 = vadd.f32 %v2961_v31, %v1263_v10 }
 0x1d6   : > { %v1353_v35 = vadd.f32 %v2876_v28, %v1264_v5  ;;  %v1415_v5 = vpop.f32.mrf.mxu3 }
 0x1d8   : > { %1466 = vperm.xlu2 %1966, %v1353_v35  }
 0x1d9   : > { %v1306_v55 = vpop.f32.mrf.mxu2 }
 0x1da   : > { %v1307_v60 = vadd.f32 %v2961_v31, %v1306_v55 }
 0x1db   : > { %v1266_v44 = vpop.f32.mrf.mxu0 }
 0x1dc   : > { %v1267_v37 = vadd.f32 %v2961_v31, %v1266_v44  ;;  %v1396_v40 = vadd.f32 %v1395_v6, %v1307_v60 }
 0x1de   : > { %v1356_v34 = vadd.f32 %v2885_v52, %v1267_v37  ;;  %v1390_v52 = vpop.f32.mrf.mxu1 }
 0x1df   : > { %v1391_v13 = vadd.f32 %v1390_v52, %v1302_v29 }
 0x1e0   : > { %1469 = vperm.xlu0 %1967, %v1356_v34  }
 0x1e1   : > { %v1308_v43 = vpop.f32.mrf.mxu2 }
 0x1e3   : > { %v1268_v1 = vpop.f32.mrf.mxu0 }
 0x1e4   : > { %v1269_v17 = vadd.f32 %v2961_v31, %v1268_v1 }
 0x1e6   : > { %v1358_v45 = vadd.f32 %v2893_v4, %v1269_v17  ;;  %v1392_v62 = vpop.f32.mrf.mxu1 }
 0x1e8   : > { %1472 = vperm.xlu1 %1965, %v1358_v45  }
 0x1e9   : > { %v1311_v28 = vpop.f32.mrf.mxu2 }
 0x1ea   : > { %v1312_v12 = vadd.f32 %v2961_v31, %v1311_v28 }
 0x1eb   : > { %v1271_v27 = vpop.f32.mrf.mxu0 }
 0x1ec   : > { %v1272_v57 = vadd.f32 %v2961_v31, %v1271_v27  ;;  %v1401_v10 = vadd.f32 %v1400_v22, %v1312_v12 }
 0x1ee   : > { %v1361_v25 = vadd.f32 %v2901_v20, %v1272_v57  ;;  %v1393_v20 = vadd.f32 %v1392_v62, %v1304_v46  ;;  %v1558_v62 = vlaneseq }
 0x1f0   : > { %1475 = vperm.xlu2 %1966, %v1361_v25  }
 0x1f1   : > { %v1313_v3 = vpop.f32.mrf.mxu2 }
 0x1f2   : > { %v1314_v38 = vadd.f32 %v2961_v31, %v1313_v3 }
 0x1f3   : > { %v1273_v63 = vpop.f32.mrf.mxu0 }
 0x1f4   : > { %v1274_v39 = vadd.f32 %v2961_v31, %v1273_v63  ;;  %v1403_v9 = vadd.f32 %v1402_v2, %v1314_v38 }
 0x1f6   : > { %v1363_v41 = vadd.f32 %v2907_v18, %v1274_v39 }
 0x1f8   : > { %1478 = vperm.xlu1 %1965, %v1363_v41  }
 0x1f9   : > { %v1316_v4 = vpop.f32.mrf.mxu2 }
 0x1fa   : > { %v1317_v22 = vadd.f32 %v2961_v31, %v1316_v4 }
 0x1fb   : > { %v1276_v59 = vpop.f32.mrf.mxu0 }
 0x1fc   : > { %v1277_v8 = vadd.f32 %v2961_v31, %v1276_v59  ;;  %v1406_v28 = vadd.f32 %v2981_v36, %v1317_v22 }
 0x1fe   : > { %v1366_v11 = vadd.f32 %v2915_v16, %v1277_v8 }
 0x200   : > { %1514 = vperm.xlu1 %1965, %v1393_v20   ;;  %1481 = vperm.xlu2 %1966, %v1366_v11   ;;  %v3016_v11 = vand.u32 127, %v1558_v62 }
 0x201   : > { %v1318_v7 = vpop.f32.mrf.mxu2 }
 0x202   : > { %v1319_v55 = vadd.f32 %v2961_v31, %v1318_v7  ;;  %v3019_v60 = vadd.s32 4294967288, %v3016_v11 }
 0x203   : > { %v1278_v61 = vpop.f32.mrf.mxu0 }
 0x204   : > { %v1279_v18 = vadd.f32 %v2961_v31, %v1278_v61  ;;  %v1408_v1 = vadd.f32 %v1407_v15, %v1319_v55 }
 0x206   : > { %v1368_v33 = vadd.f32 %v2923_v49, %v1279_v18  ;;  %v1309_v49 = vadd.f32 %v2961_v31, %v1308_v43 }
 0x208   : > { %1484 = vperm.xlu0 %1967, %v1368_v33   ;;  %1517 = vperm.xlu2 %1966, %v1396_v40   ;;  %v1398_v23 = vadd.f32 %v2965_v32, %v1309_v49  ;;  %v1417_v32 = vpop.f32.mrf.mxu3 }
 0x209   : > { %v1321_v14 = vpop.f32.mrf.mxu2 }
 0x20a   : > { %v1322_v35 = vadd.f32 %v2961_v31, %v1321_v14 }
 0x20b   : > { %v1281_v16 = vpop.f32.mrf.mxu0 }
 0x20c   : > { %v1282_v30 = vadd.f32 %v2961_v31, %v1281_v16  ;;  %v1411_v34 = vadd.f32 %v1410_v42, %v1322_v35 }
 0x20e   : > { %v1371_v58 = vadd.f32 %v2933_v56, %v1282_v30 }
 0x210   : > { %1511 = vperm.xlu0 %1967, %v1391_v13   ;;  %1526 = vperm.xlu2 %1966, %v1403_v9   ;;  %v1420_v52 = vpop.f32.mrf.mxu3 }
 0x211   : > { %1487 = vperm.xlu1 %1965, %v1371_v58   ;;  %v1323_v6 = vpop.f32.mrf.mxu2 }
 0x213   : > { %v1283_v53 = vpop.f32.mrf.mxu0 }
 0x214   : > { %v1284_v24 = vadd.f32 %v2961_v31, %v1283_v53 }
 0x216   : > { %v1373_v51 = vadd.f32 %v2940_v0, %v1284_v24 }
 0x218   : > { %1520 = vperm.xlu0 %1967, %v1398_v23   ;;  %1490 = vperm.xlu2 %1966, %v1373_v51   ;;  %v1422_v46 = vpop.f32.mrf.mxu3 }
 0x219   : > { %1523 = vperm.xlu1 %1965, %v1401_v10   ;;  %v1326_v56 = vpop.f32.mrf.mxu2 }
 0x21a   : > { %v1327_v25 = vadd.f32 %v2961_v31, %v1326_v56 }
 0x21b   : > { %v1286_v44 = vpop.f32.mrf.mxu0 }
 0x21c   : > { %v1287_v37 = vadd.f32 %v2961_v31, %v1286_v44  ;;  %v1416_v4 = vadd.f32 %v1415_v5, %v1327_v25 }
 0x21e   : > { %v1376_v43 = vadd.f32 %v2946_v54, %v1287_v37  ;;  %v1324_v54 = vadd.f32 %v2961_v31, %v1323_v6 }
 0x220   : > { %1535 = vperm.xlu2 %1966, %v1411_v34   ;;  %1493 = vperm.xlu0 %1967, %v1376_v43   ;;  %v1413_v39 = vadd.f32 %v1412_v50, %v1324_v54 }
 0x221   : > { %1532 = vperm.xlu1 %1965, %v1408_v1   ;;  %v1328_v0 = vpop.f32.mrf.mxu2 }
 0x222   : > { %v1329_v17 = vadd.f32 %v2961_v31, %v1328_v0 }
 0x223   : > { %v1288_v2 = vpop.f32.mrf.mxu0 }
 0x224   : > { %v1289_v45 = vadd.f32 %v2961_v31, %v1288_v2  ;;  %v1418_v57 = vadd.f32 %v1417_v32, %v1329_v17 }
 0x226   : > { %v1378_v27 = vadd.f32 %v2953_v48, %v1289_v45 }
 0x228   : > { %1544 = vperm.xlu2 %1966, %v1418_v57   ;;  %1529 = vperm.xlu0 %1967, %v1406_v28  }
 0x229   : > { %1496 = vperm.xlu1 %1965, %v1378_v27  }
 0x22a   : > { %v1331_v41 = vpop.f32.mrf.mxu2 }
 0x22b   : > { %v1332_v20 = vadd.f32 %v2961_v31, %v1331_v41 }
 0x22c   : > { %v1291_v3 = vpop.f32.mrf.mxu0 }
 0x22d   : > { %v1292_v63 = vadd.f32 %v2961_v31, %v1291_v3  ;;  %v1421_v7 = vadd.f32 %v1420_v52, %v1332_v20 }
 0x22f   : > { %v1381_v15 = vadd.f32 %v2959_v19, %v1292_v63  ;;  %v1425_v19 = vpop.f32.mrf.mxu3 }
 0x230   : > { %1538 = vperm.xlu0 %1967, %v1413_v39  }
 0x231   : > { %1541 = vperm.xlu1 %1965, %v1416_v4   ;;  %1499 = vperm.xlu2 %1966, %v1381_v15  }
 0x232   : > { %v1333_v8 = vpop.f32.mrf.mxu2  ;;  %v1467_v61 = vpop.permute.xlu2 %1466 }
 0x233   : > { %v1562_v33 = vperm.slane %v1467_v61, %v3019_v60  ;;  %v1334_v30 = vadd.f32 %v2961_v31, %v1333_v8 }
 0x234   : > { %v1293_v48 = vpop.f32.mrf.mxu0 }
 0x235   : > { %v1294_v36 = vadd.f32 %v2961_v31, %v1293_v48  ;;  %v1423_v49 = vadd.f32 %v1422_v46, %v1334_v30 }
 0x237   : > { %v1383_v59 = vadd.f32 %v2967_v26, %v1294_v36  ;;  %v1427_v13 = vpop.f32.mrf.mxu3 }
 0x239   : > { %1502 = vperm.xlu0 %1967, %v1383_v59  }
 0x240   : > { %v1336_v42 = vpop.f32.mrf.mxu2 }
 0x241   : > { %1547 = vperm.xlu0 %1967, %v1421_v7   ;;  %v1337_v53 = vadd.f32 %v2961_v31, %v1336_v42 }
 0x242   : > { %v1464_v18 = vpop.permute.xlu1 %1463  ;;  %v1296_v40 = vpop.f32.mrf.mxu0 }
 0x243   : > { %v1560_v26 = vperm.slane %v1464_v18, %v3016_v11  ;;  %v1297_v14 = vadd.f32 %v2961_v31, %v1296_v40 }
 0x245   : > { %v1564_v29 = vsel %vm1563_vm9, %v1562_v33, %v1560_v26  ;;  %v1386_v38 = vadd.f32 %v2972_v47, %v1297_v14  ;;  %v1426_v47 = vadd.f32 %v1425_v19, %v1337_v53 }
 0x247   : > { %1505 = vperm.xlu1 %1965, %v1386_v38  }
 0x248   : > { %v1338_v16 = vpop.f32.mrf.mxu2 }
 0x249   : > { %v1339_v50 = vadd.f32 %v2961_v31, %v1338_v16 }
 0x24a   : > { %v1298_v9 = vpop.f32.mrf.mxu0  ;;  %v1476_v24 = vpop.permute.xlu2 %1475 }
 0x24b   : > { %v1428_v58 = vadd.f32 %v1427_v13, %v1339_v50  ;;  %v1299_v6 = vadd.f32 %v2961_v31, %v1298_v9  ;;  %v1568_v3 = vperm.slane %v1476_v24, %v3016_v11 }
 0x24d   : > { %v1388_v12 = vadd.f32 %v2977_v21, %v1299_v6  ;;  %1556 = vperm.xlu0 %1967, %v1428_v58  }
 0x24f   : > { %1508 = vperm.xlu2 %1966, %v1388_v12   ;;  %1550 = vperm.xlu1 %1965, %v1423_v49  }
 0x252   : > { %v1470_v51 = vpop.permute.xlu0 %1469 }
 0x253   : > { %v1565_v54 = vperm.slane %v1470_v51, %v3016_v11 }
 0x257   : > { %1553 = vperm.xlu2 %1966, %v1426_v47  }
 0x25a   : > { %v1473_v23 = vpop.permute.xlu1 %1472  ;;  %v1482_v10 = vpop.permute.xlu2 %1481 }
 0x25b   : > { %v1566_v28 = vperm.slane %v1473_v23, %v3019_v60  ;;  %v1571_v4 = vperm.slane %v1482_v10, %v3016_v11 }
 0x25d   : > { %v1567_v63 = vsel %vm1563_vm9, %v1566_v28, %v1565_v54 }
 0x25e   : > { %v1611_v36 = vsel %vm1610_vm10, %v1567_v63, %v1564_v29 }
 0x262   : > { %v1518_v35 = vpop.permute.xlu2 %1517 }
 0x263   : > { %v1589_v7 = vperm.slane %v1518_v35, %v3016_v11 }
 0x26a   : > { %v1479_v5 = vpop.permute.xlu1 %1478  ;;  %v3035_v37 = vpop.permute.xlu2 %1526 }
 0x26b   : > { %v1569_v25 = vperm.slane %v1479_v5, %v3019_v60  ;;  %v1593_v61 = vperm.slane %v3035_v37, %v3019_v60 }
 0x26d   : > { %v1570_v15 = vsel %vm1563_vm9, %v1569_v25, %v1568_v3 }
 0x26e   : > { %v1613_v19 = vsel %vm1612_vm11, %v1570_v15, %v1611_v36 }
 0x272   : > { %v3031_v55 = vpop.permute.xlu1 %1514  ;;  %v1491_v43 = vpop.permute.xlu2 %1490 }
 0x273   : > { %v1575_v48 = vperm.slane %v1491_v43, %v3019_v60  ;;  %v1587_v40 = vperm.slane %v3031_v55, %v3019_v60 }
 0x27a   : > { %v1485_v56 = vpop.permute.xlu0 %1484  ;;  %v3037_v0 = vpop.permute.xlu2 %1535 }
 0x27b   : > { %v1572_v52 = vperm.slane %v1485_v56, %v3019_v60  ;;  %v1598_v53 = vperm.slane %v3037_v0, %v3016_v11 }
 0x27d   : > { %v1573_v46 = vsel %vm1563_vm9, %v1572_v52, %v1571_v4 }
 0x27e   : > { %v1615_v33 = vsel %vm1614_vm12, %v1573_v46, %v1613_v19 }
 0x282   : > { %v3033_v44 = vpop.permute.xlu0 %1511  ;;  %v3045_v2 = vpop.permute.xlu2 %1544 }
 0x283   : > { %v1488_v21 = vpop.permute.xlu1 %1487  ;;  %v1586_v26 = vperm.slane %v3033_v44, %v3016_v11 }
 0x284   : > { %v1574_v39 = vperm.slane %v1488_v21, %v3016_v11  ;;  %v1602_v21 = vperm.slane %v3045_v2, %v3019_v60 }
 0x285   : > { %v1588_v47 = vsel %vm1563_vm9, %v1587_v40, %v1586_v26 }
 0x286   : > { %v1576_v59 = vsel %vm1563_vm9, %v1575_v48, %v1574_v39 }
 0x287   : > { %v1617_v38 = vsel %vm1616_vm13, %v1576_v59, %v1615_v33 }
 0x28a   : > { %v1521_v34 = vpop.permute.xlu0 %1520 }
 0x28b   : > { %v1524_v31 = vpop.permute.xlu1 %1523  ;;  %v1500_v57 = vpop.permute.xlu2 %1499  ;;  %v1590_v8 = vperm.slane %v1521_v34, %v3019_v60 }
 0x28c   : > { %v1580_v14 = vperm.slane %v1500_v57, %v3016_v11  ;;  %v1592_v16 = vperm.slane %v1524_v31, %v3016_v11 }
 0x28d   : > { %v1591_v50 = vsel %vm1563_vm9, %v1590_v8, %v1589_v7 }
 0x28e   : > { %v1594_v51 = vsel %vm1563_vm9, %v1593_v61, %v1592_v16  ;;  %v1624_v10 = vsel %vm1610_vm10, %v1591_v50, %v1588_v47 }
 0x28f   : > { %v1625_v34 = vsel %vm1612_vm11, %v1594_v51, %v1624_v10 }
 0x292   : > { %v1494_v1 = vpop.permute.xlu0 %1493 }
 0x293   : > { %v3041_v22 = vpop.permute.xlu1 %1532  ;;  %v1577_v42 = vperm.slane %v1494_v1, %v3016_v11 }
 0x294   : > { %v1596_v24 = vperm.slane %v3041_v22, %v3019_v60 }
 0x29a   : > { %v3039_v32 = vpop.permute.xlu0 %1529 }
 0x29b   : > { %v1497_v45 = vpop.permute.xlu1 %1496  ;;  %v1595_v13 = vperm.slane %v3039_v32, %v3016_v11 }
 0x29c   : > { %v1578_v62 = vperm.slane %v1497_v45, %v3019_v60 }
 0x29d   : > { %v1597_v35 = vsel %vm1563_vm9, %v1596_v24, %v1595_v13 }
 0x29e   : > { %v1579_v30 = vsel %vm1563_vm9, %v1578_v62, %v1577_v42  ;;  %v1626_v1 = vsel %vm1614_vm12, %v1597_v35, %v1625_v34 }
 0x29f   : > { %v1619_v23 = vsel %vm1618_vm14, %v1579_v30, %v1617_v38 }
 0x2a2   : > { %v3043_v17 = vpop.permute.xlu0 %1538 }
 0x2a3   : > { %v1542_v41 = vpop.permute.xlu1 %1541  ;;  %v1599_v6 = vperm.slane %v3043_v17, %v3019_v60 }
 0x2a4   : > { %v1601_v55 = vperm.slane %v1542_v41, %v3016_v11 }
 0x2a5   : > { %v1600_v37 = vsel %vm1563_vm9, %v1599_v6, %v1598_v53 }
 0x2a6   : > { %v1603_v0 = vsel %vm1563_vm9, %v1602_v21, %v1601_v55  ;;  %v1627_v32 = vsel %vm1616_vm13, %v1600_v37, %v1626_v1 }
 0x2a7   : > { %v1628_v57 = vsel %vm1618_vm14, %v1603_v0, %v1627_v32 }
 0x2a9   : > { %v1509_v18 = vpop.permute.xlu2 %1508 }
 0x2aa   : > { %v1584_v49 = vperm.slane %v1509_v18, %v3019_v60 }
 0x2ab   : > { %v1503_v27 = vpop.permute.xlu0 %1502 }
 0x2ac   : > { %v1581_v20 = vperm.slane %v1503_v27, %v3019_v60 }
 0x2ae   : > { %v1582_v9 = vsel %vm1563_vm9, %v1581_v20, %v1580_v14 }
 0x2af   : > { %v1621_v5 = vsel %vm1620_vm15, %v1582_v9, %v1619_v23 }
 0x2b1   : > { %v1554_v31 = vpop.permute.xlu2 %1553 }
 0x2b2   : > { %v1607_v28 = vperm.slane %v1554_v31, %v3016_v11 }
 0x2b3   : > { %v1548_v29 = vpop.permute.xlu0 %1547 }
 0x2b4   : > { %v1604_v45 = vperm.slane %v1548_v29, %v3016_v11 }
 0x2b9   : > { %v1506_v58 = vpop.permute.xlu1 %1505 }
 0x2ba   : > { %v1583_v12 = vperm.slane %v1506_v58, %v3016_v11 }
 0x2bc   : > { %v1585_v56 = vsel %vm1563_vm9, %v1584_v49, %v1583_v12 }
 0x2bd   : > { %v1623_v44 = vsel %vm1622_vm0, %v1585_v56, %v1621_v5 }
 0x2be   : > { %1633 = vst.msk [vmem:[%s179_s12] sm:$0xff] %vm881_vm3, %v1623_v44 }
 0x2bf   : > { %v1557_v43 = vpop.permute.xlu0 %1556 }
 0x2c0   : > { %v1608_v22 = vperm.slane %v1557_v43, %v3019_v60 }
 0x2c1   : > { %v1551_v17 = vpop.permute.xlu1 %1550 }
 0x2c2   : > { %v1605_v2 = vperm.slane %v1551_v17, %v3019_v60  ;;  %v1609_v54 = vsel %vm1563_vm9, %v1608_v22, %v1607_v28 }
 0x2c4   : > { %v1606_v27 = vsel %vm1563_vm9, %v1605_v2, %v1604_v45 }
 0x2c5   : > { %v1629_v25 = vsel %vm1620_vm15, %v1606_v27, %v1628_v57 }
 0x2c6   : > { %v1630_v52 = vsel %vm1622_vm0, %v1609_v54, %v1629_v25 }
 0x2c7   : > { %1634 = vst.msk [vmem:[%s179_s12 + $0x8] sm:$0xff] %vm881_vm3, %v1630_v52 }
 0x2c8   : > { %1996 = shalt.err (!%p1993_p5)
}
 0x2c9   : > { %s2057_s20 = smov 128   ;;  %s2058_s22 = smov 8  }
 0x2ca   : > { %1900 = dma.vmem_to_hbm [thread:$0]  (%p2122_p4), %s1651_s27, 256, %s1653_s28, %s1636_s29, %s2057_s20, %s2057_s20, %s2058_s22  }
 0x2cb PF: > { %p1906_p6 = scmp.ge.s32.totalorder %s2047_s19, 2  ;;  %s1667_s4 = sand.u32 1, %s2027_s14  }
 0x2cc   : > { %s1668_s8 = scalar_lea.sflag [#allocation4], %s1667_s4 }
 0x2cd   : > { %p1903_p7 = pnand %p1906_p6, %p2129_p8 }
 0x2cf   : > { %p1904_p9 = pneg %p1903_p7 }
 0x2d1   : > { %2022 = dma.done.wait (%p1904_p9), %s1668_s8, 256  }
 0x2d2   : > { %2024 = vsyncadd (%p1904_p9), %s1668_s8, 4294967040  ;;  %s18_s19 = sadd.s32 1, %s2047_s19   ;;  %s3175_s14 = smov %s2031_s15 }
 0x2d3   : > { %p15_p10 = scmp.ge.s32.totalorder %s18_s19, 4   ;;  %s3176_s15 = smov %s2035_s16 }
 0x2d4   : > { %s3177_s16 = smov %s2135_s26  ;;  %s3178_s17 = smov %s2043_s18 }
 0x2d5   : > { %s3179_s18 = smov %s3181_s21  ;;  %17 = sbr.rel (!%p15_p10) target bundleno = 7 (0x7), region = 67 }
 0x2da   :  { %1674 = vsyncpa [#allocation4], 1 }
 0x2db   :  { %1676 = vsyncpa [#allocation4 + $0x1], 1 }

</bundles_post_ra>
